<compile_context>
chip_gen: v7x
topology: tpu7x:2x2x1
jax: 0.10.0
libtpu: 0.0.40
codegen_flags: <defaults>
</compile_context>

<pallas_src>
import jax
import jax.numpy as jnp
import numpy as np
from jax.experimental import pallas as pl
from jax.experimental.pallas import tpu as pltpu

BN_EPS = 1e-5


# ---------------------------------------------------------------------------
# Fused kernel: the entire Projector forward in one body, everything in VMEM.
# ---------------------------------------------------------------------------
def _projector_kernel(x_ref, w1_ref, w2_ref, w3_ref, w4_ref,
                      g1_ref, be1_ref, g2_ref, be2_ref, g3_ref, be3_ref,
                      b4_ref, o_ref):
    def bn_relu(h, g, be):
        # Train-mode BatchNorm1d (biased variance, eps=1e-5) + ReLU, centered form.
        inv_b = 1.0 / h.shape[0]
        mean = jnp.sum(h, axis=0, keepdims=True) * inv_b          # XLU reduce
        c = h - mean
        var = jnp.sum(c * c, axis=0, keepdims=True) * inv_b       # centered variance
        scale = g * jax.lax.rsqrt(var + BN_EPS)                   # EUP rsqrt
        return jnp.maximum(c * scale + be, 0.0)

    # Layer 1: Linear (bias cancelled by BN mean subtraction) -> BN -> ReLU
    h = jnp.dot(x_ref[...], w1_ref[...], preferred_element_type=jnp.float32)
    h = bn_relu(h, g1_ref[...], be1_ref[...])

    # Layer 2
    h = jnp.dot(h.astype(jnp.bfloat16), w2_ref[...],
                preferred_element_type=jnp.float32)
    h = bn_relu(h, g2_ref[...], be2_ref[...])

    # Layer 3
    h = jnp.dot(h.astype(jnp.bfloat16), w3_ref[...],
                preferred_element_type=jnp.float32)
    h = bn_relu(h, g3_ref[...], be3_ref[...])

    # Layer 4: plain Linear (bias kept)
    h = jnp.dot(h.astype(jnp.bfloat16), w4_ref[...],
                preferred_element_type=jnp.float32)
    o_ref[...] = (h + b4_ref[...]).astype(o_ref.dtype)


# ---------------------------------------------------------------------------
# Wrapper
# ---------------------------------------------------------------------------
def _pad_to_multiple(a, axis, multiple):
    pad = (-a.shape[axis]) % multiple
    if pad == 0:
        return a
    widths = [(0, 0)] * a.ndim
    widths[axis] = (0, pad)
    return jnp.pad(a, widths)


def _full_spec(shape):
    nd = len(shape)
    return pl.BlockSpec(shape, lambda i, _nd=nd: (0,) * _nd)


def _check_vmem_budget(B, K1p, D):
    # Everything is resident at once (grid has a single step); stay well under
    # v7x's 32 MiB scoped default (64 MiB physical) so the same kernel also runs
    # on v5e/v6e.  Factor 2 on in/out for Pallas' buffer allocation, plus a rough
    # allowance for compiler-managed intermediate activations.
    bytes_weights = 2 * (K1p * D + 3 * D * D) * 2          # bf16, double-buffered
    bytes_x = 2 * B * K1p * 2
    bytes_rows = 2 * 7 * D * 4
    bytes_out = 2 * B * D * 4
    bytes_act = 4 * B * D * 4                               # intermediate f32 activations
    total = bytes_weights + bytes_x + bytes_rows + bytes_out + bytes_act
    assert total < 24 * 1024 * 1024, (
        f"fused-projector VMEM estimate {total} B too large; "
        "switch to the batch-tiled (carried-stats) variant")


def prepare_params(params):
    """One-time prep: pad layer-1 K dim to a 128 multiple and pre-cast weights to bf16.

    Returns (w1p, w2, w3, w4, g1, be1, g2, be2, g3, be3, b4).  b1/b2/b3 are dropped:
    they are exactly cancelled by train-mode BatchNorm mean subtraction.
    """
    (w1, b1, g1, be1,
     w2, b2, g2, be2,
     w3, b3, g3, be3,
     w4, b4) = params
    del b1, b2, b3
    w1p = _pad_to_multiple(w1, axis=0, multiple=128).astype(jnp.bfloat16)
    return (w1p,
            w2.astype(jnp.bfloat16),
            w3.astype(jnp.bfloat16),
            w4.astype(jnp.bfloat16),
            g1, be1, g2, be2, g3, be3, b4)


def projector_forward(x, prepped):
    """x: (B, encoder_dim) float32.  prepped: output of prepare_params()."""
    (w1p, w2, w3, w4, g1, be1, g2, be2, g3, be3, b4) = prepped
    B = x.shape[0]
    K1p, D = w1p.shape
    assert D % 128 == 0, "projector_dim must be a multiple of 128 for lane-dense stores"
    _check_vmem_budget(B, K1p, D)

    # Input prep (pad contraction dim to match pre-padded w1, ship bf16 to the MXU).
    xk = _pad_to_multiple(x, axis=1, multiple=128).astype(jnp.bfloat16)

    args = (xk, w1p, w2, w3, w4, g1, be1, g2, be2, g3, be3, b4)
    in_specs = [_full_spec(a.shape) for a in args]

    return pl.pallas_call(
        _projector_kernel,
        out_shape=jax.ShapeDtypeStruct((B, D), jnp.float32),
        grid_spec=pltpu.PrefetchScalarGridSpec(
            num_scalar_prefetch=0,
            grid=(1,),
            in_specs=in_specs,
            out_specs=_full_spec((B, D)),
        ),
        compiler_params=pltpu.CompilerParams(
            dimension_semantics=("arbitrary",),
            vmem_limit_bytes=32 * 1024 * 1024,
        ),
    )(*args)


# ---------------------------------------------------------------------------
# Pure-JAX reference (same bf16 operand rounding / f32 accumulation)
# ---------------------------------------------------------------------------
def projector_reference(x, params):
    (w1, b1, g1, be1,
     w2, b2, g2, be2,
     w3, b3, g3, be3,
     w4, b4) = params

    def lin(h, w, b):
        return jnp.dot(h.astype(jnp.bfloat16), w.astype(jnp.bfloat16),
                       preferred_element_type=jnp.float32) + b

    def bn_relu(h, g, be):
        mean = jnp.mean(h, axis=0, keepdims=True)
        var = jnp.mean(jnp.square(h - mean), axis=0, keepdims=True)
        return jnp.maximum((h - mean) * jax.lax.rsqrt(var + BN_EPS) * g + be, 0.0)

    h = bn_relu(lin(x, w1, b1), g1, be1)
    h = bn_relu(lin(h, w2, b2), g2, be2)
    h = bn_relu(lin(h, w3, b3), g3, be3)
    return lin(h, w4, b4)


def init_params(key, encoder_dim, projector_dim):
    """Synthetic init mirroring the PyTorch module's shapes.

    Linear weights are stored as (in, out) (transposed vs. torch's (out, in));
    biases and BN gamma/beta are (1, D) rows for lane-dense VMEM layout.
    BatchNorm running_mean/running_var are not modelled (train-mode forward only).
    """
    keys = jax.random.split(key, 8)
    dims = [(encoder_dim, projector_dim),
            (projector_dim, projector_dim),
            (projector_dim, projector_dim),
            (projector_dim, projector_dim)]

    params = []
    for li, (d_in, d_out) in enumerate(dims):
        bound = 1.0 / float(np.sqrt(d_in))
        w = jax.random.uniform(keys[2 * li], (d_in, d_out), jnp.float32,
                               minval=-bound, maxval=bound)
        b = jax.random.uniform(keys[2 * li + 1], (1, d_out), jnp.float32,
                               minval=-bound, maxval=bound)
        params.append(w)
        params.append(b)
        if li < 3:  # BatchNorm1d after the first three linears
            params.append(jnp.ones((1, d_out), jnp.float32))   # gamma
            params.append(jnp.zeros((1, d_out), jnp.float32))  # beta
    return tuple(params)


if __name__ == "__main__":
    B = 128              # fills the MXU M dimension
    encoder_dim = 64     # zero-padded to 128 along K (once, at prepare time)
    projector_dim = 512  # multiple of 128 -> lane-dense unmasked output stores

    key = jax.random.PRNGKey(0)
    kx, kp = jax.random.split(key)
    x = jax.random.normal(kx, (B, encoder_dim), jnp.float32)
    params = init_params(kp, encoder_dim, projector_dim)

    prepped = prepare_params(params)                 # one-time: pad + bf16-cast weights
    fwd = jax.jit(projector_forward)

    out = fwd(x, prepped)
    jax.block_until_ready(out)
    assert out.shape == (B, projector_dim) and out.dtype == jnp.float32

    ref = projector_reference(x, params)
    np.testing.assert_allclose(np.asarray(out), np.asarray(ref), rtol=3e-2, atol=3e-2)

    print("KERNEL_OK")
</pallas_src>

<mosaic_0001>
module attributes {stable_mosaic.version = 11 : i64} {
  func.func @_projector_kernel(%arg0: i32, %arg1: memref<128x128xbf16, #tpu.memory_space<vmem>>, %arg2: memref<128x512xbf16, #tpu.memory_space<vmem>>, %arg3: memref<512x512xbf16, #tpu.memory_space<vmem>>, %arg4: memref<512x512xbf16, #tpu.memory_space<vmem>>, %arg5: memref<512x512xbf16, #tpu.memory_space<vmem>>, %arg6: memref<1x512xf32, #tpu.memory_space<vmem>>, %arg7: memref<1x512xf32, #tpu.memory_space<vmem>>, %arg8: memref<1x512xf32, #tpu.memory_space<vmem>>, %arg9: memref<1x512xf32, #tpu.memory_space<vmem>>, %arg10: memref<1x512xf32, #tpu.memory_space<vmem>>, %arg11: memref<1x512xf32, #tpu.memory_space<vmem>>, %arg12: memref<1x512xf32, #tpu.memory_space<vmem>>, %arg13: memref<128x512xf32, #tpu.memory_space<vmem>>) attributes {dimension_semantics = [#tpu.dimension_semantics<arbitrary>], iteration_bounds = array<i64: 1>, scalar_prefetch = 0 : i64, scratch_operands = 0 : i64, tpu.core_type = #tpu.core_type<tc>, window_params = [{pipeline_mode = #tpu.pipeline_mode<synchronous>, transform_indices = @transform_0, window_bounds = array<i64: 128, 128>}, {pipeline_mode = #tpu.pipeline_mode<synchronous>, transform_indices = @transform_1, window_bounds = array<i64: 128, 512>}, {pipeline_mode = #tpu.pipeline_mode<synchronous>, transform_indices = @transform_2, window_bounds = array<i64: 512, 512>}, {pipeline_mode = #tpu.pipeline_mode<synchronous>, transform_indices = @transform_3, window_bounds = array<i64: 512, 512>}, {pipeline_mode = #tpu.pipeline_mode<synchronous>, transform_indices = @transform_4, window_bounds = array<i64: 512, 512>}, {pipeline_mode = #tpu.pipeline_mode<synchronous>, transform_indices = @transform_5, window_bounds = array<i64: 1, 512>}, {pipeline_mode = #tpu.pipeline_mode<synchronous>, transform_indices = @transform_6, window_bounds = array<i64: 1, 512>}, {pipeline_mode = #tpu.pipeline_mode<synchronous>, transform_indices = @transform_7, window_bounds = array<i64: 1, 512>}, {pipeline_mode = #tpu.pipeline_mode<synchronous>, transform_indices = @transform_8, window_bounds = array<i64: 1, 512>}, {pipeline_mode = #tpu.pipeline_mode<synchronous>, transform_indices = @transform_9, window_bounds = array<i64: 1, 512>}, {pipeline_mode = #tpu.pipeline_mode<synchronous>, transform_indices = @transform_10, window_bounds = array<i64: 1, 512>}, {pipeline_mode = #tpu.pipeline_mode<synchronous>, transform_indices = @transform_11, window_bounds = array<i64: 1, 512>}, {pipeline_mode = #tpu.pipeline_mode<synchronous>, transform_indices = @transform_12, window_bounds = array<i64: 128, 512>}]} {
    %c0 = arith.constant 0 : index
    %c0_0 = arith.constant 0 : index
    %0 = vector.load %arg1[%c0, %c0_0] : memref<128x128xbf16, #tpu.memory_space<vmem>>, vector<128x128xbf16>
    %c0_1 = arith.constant 0 : index
    %c0_2 = arith.constant 0 : index
    %1 = vector.load %arg2[%c0_1, %c0_2] : memref<128x512xbf16, #tpu.memory_space<vmem>>, vector<128x512xbf16>
    %cst = arith.constant dense<0.000000e+00> : vector<128x512xf32>
    %2 = tpu.matmul %0, %1, %cst {dimension_numbers = #tpu.dot_dimension_numbers<[1], [0], [0], [1], [0, 0, 1, 1], [], []>} : vector<128x128xbf16>, vector<128x512xbf16>, vector<128x512xf32> -> vector<128x512xf32>
    %c0_3 = arith.constant 0 : index
    %c0_4 = arith.constant 0 : index
    %3 = vector.load %arg6[%c0_3, %c0_4] : memref<1x512xf32, #tpu.memory_space<vmem>>, vector<1x512xf32>
    %c0_5 = arith.constant 0 : index
    %c0_6 = arith.constant 0 : index
    %4 = vector.load %arg7[%c0_5, %c0_6] : memref<1x512xf32, #tpu.memory_space<vmem>>, vector<1x512xf32>
    %cst_7 = arith.constant dense<0.000000e+00> : vector<512xf32>
    %5 = vector.multi_reduction <add>, %2, %cst_7 [0] : vector<128x512xf32> to vector<512xf32>
    %6 = vector.shape_cast %5 : vector<512xf32> to vector<1x512xf32>
    %cst_8 = arith.constant 7.812500e-03 : f32
    %7 = vector.broadcast %cst_8 : f32 to vector<1x512xf32>
    %8 = arith.mulf %6, %7 : vector<1x512xf32>
    %9 = vector.broadcast %8 : vector<1x512xf32> to vector<128x512xf32>
    %10 = arith.subf %2, %9 : vector<128x512xf32>
    %11 = arith.mulf %10, %10 : vector<128x512xf32>
    %cst_9 = arith.constant dense<0.000000e+00> : vector<512xf32>
    %12 = vector.multi_reduction <add>, %11, %cst_9 [0] : vector<128x512xf32> to vector<512xf32>
    %13 = vector.shape_cast %12 : vector<512xf32> to vector<1x512xf32>
    %cst_10 = arith.constant 7.812500e-03 : f32
    %14 = vector.broadcast %cst_10 : f32 to vector<1x512xf32>
    %15 = arith.mulf %13, %14 : vector<1x512xf32>
    %cst_11 = arith.constant 9.99999974E-6 : f32
    %16 = vector.broadcast %cst_11 : f32 to vector<1x512xf32>
    %17 = arith.addf %15, %16 : vector<1x512xf32>
    %18 = math.rsqrt %17 : vector<1x512xf32>
    %19 = arith.mulf %3, %18 : vector<1x512xf32>
    %20 = vector.broadcast %19 : vector<1x512xf32> to vector<128x512xf32>
    %21 = arith.mulf %10, %20 : vector<128x512xf32>
    %22 = vector.broadcast %4 : vector<1x512xf32> to vector<128x512xf32>
    %23 = arith.addf %21, %22 : vector<128x512xf32>
    %cst_12 = arith.constant 0.000000e+00 : f32
    %24 = vector.broadcast %cst_12 : f32 to vector<128x512xf32>
    %25 = arith.maximumf %23, %24 : vector<128x512xf32>
    %26 = arith.truncf %25 : vector<128x512xf32> to vector<128x512xbf16>
    %c0_13 = arith.constant 0 : index
    %c0_14 = arith.constant 0 : index
    %27 = vector.load %arg3[%c0_13, %c0_14] : memref<512x512xbf16, #tpu.memory_space<vmem>>, vector<512x512xbf16>
    %cst_15 = arith.constant dense<0.000000e+00> : vector<128x512xf32>
    %28 = tpu.matmul %26, %27, %cst_15 {dimension_numbers = #tpu.dot_dimension_numbers<[1], [0], [0], [1], [0, 0, 1, 1], [], []>} : vector<128x512xbf16>, vector<512x512xbf16>, vector<128x512xf32> -> vector<128x512xf32>
    %c0_16 = arith.constant 0 : index
    %c0_17 = arith.constant 0 : index
    %29 = vector.load %arg8[%c0_16, %c0_17] : memref<1x512xf32, #tpu.memory_space<vmem>>, vector<1x512xf32>
    %c0_18 = arith.constant 0 : index
    %c0_19 = arith.constant 0 : index
    %30 = vector.load %arg9[%c0_18, %c0_19] : memref<1x512xf32, #tpu.memory_space<vmem>>, vector<1x512xf32>
    %cst_20 = arith.constant dense<0.000000e+00> : vector<512xf32>
    %31 = vector.multi_reduction <add>, %28, %cst_20 [0] : vector<128x512xf32> to vector<512xf32>
    %32 = vector.shape_cast %31 : vector<512xf32> to vector<1x512xf32>
    %cst_21 = arith.constant 7.812500e-03 : f32
    %33 = vector.broadcast %cst_21 : f32 to vector<1x512xf32>
    %34 = arith.mulf %32, %33 : vector<1x512xf32>
    %35 = vector.broadcast %34 : vector<1x512xf32> to vector<128x512xf32>
    %36 = arith.subf %28, %35 : vector<128x512xf32>
    %37 = arith.mulf %36, %36 : vector<128x512xf32>
    %cst_22 = arith.constant dense<0.000000e+00> : vector<512xf32>
    %38 = vector.multi_reduction <add>, %37, %cst_22 [0] : vector<128x512xf32> to vector<512xf32>
    %39 = vector.shape_cast %38 : vector<512xf32> to vector<1x512xf32>
    %cst_23 = arith.constant 7.812500e-03 : f32
    %40 = vector.broadcast %cst_23 : f32 to vector<1x512xf32>
    %41 = arith.mulf %39, %40 : vector<1x512xf32>
    %cst_24 = arith.constant 9.99999974E-6 : f32
    %42 = vector.broadcast %cst_24 : f32 to vector<1x512xf32>
    %43 = arith.addf %41, %42 : vector<1x512xf32>
    %44 = math.rsqrt %43 : vector<1x512xf32>
    %45 = arith.mulf %29, %44 : vector<1x512xf32>
    %46 = vector.broadcast %45 : vector<1x512xf32> to vector<128x512xf32>
    %47 = arith.mulf %36, %46 : vector<128x512xf32>
    %48 = vector.broadcast %30 : vector<1x512xf32> to vector<128x512xf32>
    %49 = arith.addf %47, %48 : vector<128x512xf32>
    %cst_25 = arith.constant 0.000000e+00 : f32
    %50 = vector.broadcast %cst_25 : f32 to vector<128x512xf32>
    %51 = arith.maximumf %49, %50 : vector<128x512xf32>
    %52 = arith.truncf %51 : vector<128x512xf32> to vector<128x512xbf16>
    %c0_26 = arith.constant 0 : index
    %c0_27 = arith.constant 0 : index
    %53 = vector.load %arg4[%c0_26, %c0_27] : memref<512x512xbf16, #tpu.memory_space<vmem>>, vector<512x512xbf16>
    %cst_28 = arith.constant dense<0.000000e+00> : vector<128x512xf32>
    %54 = tpu.matmul %52, %53, %cst_28 {dimension_numbers = #tpu.dot_dimension_numbers<[1], [0], [0], [1], [0, 0, 1, 1], [], []>} : vector<128x512xbf16>, vector<512x512xbf16>, vector<128x512xf32> -> vector<128x512xf32>
    %c0_29 = arith.constant 0 : index
    %c0_30 = arith.constant 0 : index
    %55 = vector.load %arg10[%c0_29, %c0_30] : memref<1x512xf32, #tpu.memory_space<vmem>>, vector<1x512xf32>
    %c0_31 = arith.constant 0 : index
    %c0_32 = arith.constant 0 : index
    %56 = vector.load %arg11[%c0_31, %c0_32] : memref<1x512xf32, #tpu.memory_space<vmem>>, vector<1x512xf32>
    %cst_33 = arith.constant dense<0.000000e+00> : vector<512xf32>
    %57 = vector.multi_reduction <add>, %54, %cst_33 [0] : vector<128x512xf32> to vector<512xf32>
    %58 = vector.shape_cast %57 : vector<512xf32> to vector<1x512xf32>
    %cst_34 = arith.constant 7.812500e-03 : f32
    %59 = vector.broadcast %cst_34 : f32 to vector<1x512xf32>
    %60 = arith.mulf %58, %59 : vector<1x512xf32>
    %61 = vector.broadcast %60 : vector<1x512xf32> to vector<128x512xf32>
    %62 = arith.subf %54, %61 : vector<128x512xf32>
    %63 = arith.mulf %62, %62 : vector<128x512xf32>
    %cst_35 = arith.constant dense<0.000000e+00> : vector<512xf32>
    %64 = vector.multi_reduction <add>, %63, %cst_35 [0] : vector<128x512xf32> to vector<512xf32>
    %65 = vector.shape_cast %64 : vector<512xf32> to vector<1x512xf32>
    %cst_36 = arith.constant 7.812500e-03 : f32
    %66 = vector.broadcast %cst_36 : f32 to vector<1x512xf32>
    %67 = arith.mulf %65, %66 : vector<1x512xf32>
    %cst_37 = arith.constant 9.99999974E-6 : f32
    %68 = vector.broadcast %cst_37 : f32 to vector<1x512xf32>
    %69 = arith.addf %67, %68 : vector<1x512xf32>
    %70 = math.rsqrt %69 : vector<1x512xf32>
    %71 = arith.mulf %55, %70 : vector<1x512xf32>
    %72 = vector.broadcast %71 : vector<1x512xf32> to vector<128x512xf32>
    %73 = arith.mulf %62, %72 : vector<128x512xf32>
    %74 = vector.broadcast %56 : vector<1x512xf32> to vector<128x512xf32>
    %75 = arith.addf %73, %74 : vector<128x512xf32>
    %cst_38 = arith.constant 0.000000e+00 : f32
    %76 = vector.broadcast %cst_38 : f32 to vector<128x512xf32>
    %77 = arith.maximumf %75, %76 : vector<128x512xf32>
    %78 = arith.truncf %77 : vector<128x512xf32> to vector<128x512xbf16>
    %c0_39 = arith.constant 0 : index
    %c0_40 = arith.constant 0 : index
    %79 = vector.load %arg5[%c0_39, %c0_40] : memref<512x512xbf16, #tpu.memory_space<vmem>>, vector<512x512xbf16>
    %cst_41 = arith.constant dense<0.000000e+00> : vector<128x512xf32>
    %80 = tpu.matmul %78, %79, %cst_41 {dimension_numbers = #tpu.dot_dimension_numbers<[1], [0], [0], [1], [0, 0, 1, 1], [], []>} : vector<128x512xbf16>, vector<512x512xbf16>, vector<128x512xf32> -> vector<128x512xf32>
    %c0_42 = arith.constant 0 : index
    %c0_43 = arith.constant 0 : index
    %81 = vector.load %arg12[%c0_42, %c0_43] : memref<1x512xf32, #tpu.memory_space<vmem>>, vector<1x512xf32>
    %82 = vector.broadcast %81 : vector<1x512xf32> to vector<128x512xf32>
    %83 = arith.addf %80, %82 : vector<128x512xf32>
    %c0_44 = arith.constant 0 : index
    %c0_45 = arith.constant 0 : index
    %84 = vector.load %arg13[%c0_44, %c0_45] : memref<128x512xf32, #tpu.memory_space<vmem>>, vector<128x512xf32>
    tpu.vector_store %arg13[%c0_44, %c0_45], %83 {strides = array<i32>} : memref<128x512xf32, #tpu.memory_space<vmem>>, vector<128x512xf32>,
    return
  }
  func.func @transform_0(%arg0: i32) -> (i32, i32) {
    %c0_i32 = arith.constant 0 : i32
    %c0_i32_0 = arith.constant 0 : i32
    %c0_i32_1 = arith.constant 0 : i32
    return %c0_i32, %c0_i32_0 : i32, i32
  }
  func.func @transform_1(%arg0: i32) -> (i32, i32) {
    %c0_i32 = arith.constant 0 : i32
    %c0_i32_0 = arith.constant 0 : i32
    %c0_i32_1 = arith.constant 0 : i32
    return %c0_i32, %c0_i32_0 : i32, i32
  }
  func.func @transform_2(%arg0: i32) -> (i32, i32) {
    %c0_i32 = arith.constant 0 : i32
    %c0_i32_0 = arith.constant 0 : i32
    %c0_i32_1 = arith.constant 0 : i32
    return %c0_i32, %c0_i32_0 : i32, i32
  }
  func.func @transform_3(%arg0: i32) -> (i32, i32) {
    %c0_i32 = arith.constant 0 : i32
    %c0_i32_0 = arith.constant 0 : i32
    %c0_i32_1 = arith.constant 0 : i32
    return %c0_i32, %c0_i32_0 : i32, i32
  }
  func.func @transform_4(%arg0: i32) -> (i32, i32) {
    %c0_i32 = arith.constant 0 : i32
    %c0_i32_0 = arith.constant 0 : i32
    %c0_i32_1 = arith.constant 0 : i32
    return %c0_i32, %c0_i32_0 : i32, i32
  }
  func.func @transform_5(%arg0: i32) -> (i32, i32) {
    %c0_i32 = arith.constant 0 : i32
    %c0_i32_0 = arith.constant 0 : i32
    %c0_i32_1 = arith.constant 0 : i32
    return %c0_i32, %c0_i32_0 : i32, i32
  }
  func.func @transform_6(%arg0: i32) -> (i32, i32) {
    %c0_i32 = arith.constant 0 : i32
    %c0_i32_0 = arith.constant 0 : i32
    %c0_i32_1 = arith.constant 0 : i32
    return %c0_i32, %c0_i32_0 : i32, i32
  }
  func.func @transform_7(%arg0: i32) -> (i32, i32) {
    %c0_i32 = arith.constant 0 : i32
    %c0_i32_0 = arith.constant 0 : i32
    %c0_i32_1 = arith.constant 0 : i32
    return %c0_i32, %c0_i32_0 : i32, i32
  }
  func.func @transform_8(%arg0: i32) -> (i32, i32) {
    %c0_i32 = arith.constant 0 : i32
    %c0_i32_0 = arith.constant 0 : i32
    %c0_i32_1 = arith.constant 0 : i32
    return %c0_i32, %c0_i32_0 : i32, i32
  }
  func.func @transform_9(%arg0: i32) -> (i32, i32) {
    %c0_i32 = arith.constant 0 : i32
    %c0_i32_0 = arith.constant 0 : i32
    %c0_i32_1 = arith.constant 0 : i32
    return %c0_i32, %c0_i32_0 : i32, i32
  }
  func.func @transform_10(%arg0: i32) -> (i32, i32) {
    %c0_i32 = arith.constant 0 : i32
    %c0_i32_0 = arith.constant 0 : i32
    %c0_i32_1 = arith.constant 0 : i32
    return %c0_i32, %c0_i32_0 : i32, i32
  }
  func.func @transform_11(%arg0: i32) -> (i32, i32) {
    %c0_i32 = arith.constant 0 : i32
    %c0_i32_0 = arith.constant 0 : i32
    %c0_i32_1 = arith.constant 0 : i32
    return %c0_i32, %c0_i32_0 : i32, i32
  }
  func.func @transform_12(%arg0: i32) -> (i32, i32) {
    %c0_i32 = arith.constant 0 : i32
    %c0_i32_0 = arith.constant 0 : i32
    %c0_i32_1 = arith.constant 0 : i32
    return %c0_i32, %c0_i32_0 : i32, i32
  }
}

</mosaic_0001>

<bundles_post_ra>
// kernel: projector_forward.1
= control target key start
LH: loop header
LB: loop body
LE: loop exit
PB: predicated region body
PF: predicated region fallthrough
CT: control target
= control target key end

     0   :  { %17 = vsyncpa [#allocation3], 0  ;;  %s10340_s0 = inlined_call_operand.vmem [shape: bf16[128,128], index: 0, kind: input, shape index: {}]   ;;  %s10341_s1 = inlined_call_operand.vmem [shape: bf16[128,512], index: 1, kind: input, shape index: {}]   ;;  %s10342_s2 = inlined_call_operand.hbm [shape: bf16[512,512], index: 2, kind: input, shape index: {}]   ;;  %s10343_s3 = inlined_call_operand.hbm [shape: bf16[512,512], index: 3, kind: input, shape index: {}]   ;;  %s10344_s4 = inlined_call_operand.hbm [shape: bf16[512,512], index: 4, kind: input, shape index: {}]   ;;  %s10345_s5 = inlined_call_operand.vmem [shape: f32[1,512], index: 5, kind: input, shape index: {}]   ;;  %s10346_s6 = inlined_call_operand.vmem [shape: f32[1,512], index: 6, kind: input, shape index: {}]   ;;  %s10347_s7 = inlined_call_operand.vmem [shape: f32[1,512], index: 7, kind: input, shape index: {}]   ;;  %s10348_s8 = inlined_call_operand.vmem [shape: f32[1,512], index: 8, kind: input, shape index: {}]   ;;  %s10349_s9 = inlined_call_operand.vmem [shape: f32[1,512], index: 9, kind: input, shape index: {}]   ;;  %s10350_s10 = inlined_call_operand.vmem [shape: f32[1,512], index: 10, kind: input, shape index: {}]   ;;  %s10351_s11 = inlined_call_operand.vmem [shape: f32[1,512], index: 11, kind: input, shape index: {}]   ;;  %s10352_s12 = inlined_call_operand.hbm [shape: f32[128,512], index: 12, kind: output, shape index: {}]  }
   0x1   :  { %18 = vsyncpa [#allocation6], 0 }
   0x2   :  { %19 = vsyncpa [#allocation4], 0  ;;  %s7600_s21 = smov [#allocation5]   ;;  %s7601_s23 = smov [#allocation2]  }
   0x3   :  { %s41_s22 = sshll.u32 %s7600_s21, 4  ;;  %s29_s24 = sshll.u32 %s7601_s23, 4  ;;  %s42_s22 = int_to_ptr.vmem [resolvable:$true] %s41_s22  ;;  %s7675_s24 = int_to_ptr.vmem [resolvable:$true] %s29_s24 }
   0x4   :  { %s7506_s27 = scalar_lea.hbm %s10343_s3, 16384 }
   0x5   :  { %p7507_p0 = scmp.ne.s32.totalorder %s10343_s3, %s7506_s27  ;;  %p7510_p1 = scmp.lt.u32.totalorder %s7506_s27, %s10343_s3 }
   0x7   :  { %p7512_p2 = pnand %p7510_p1, %p7507_p0 }
   0x9   :  { %7515 = shalt.err (!%p7512_p2)
}
   0xa   :  { %s7516_s14 = scalar_lea.vmem %s42_s22, 16384  ;;  %p7521_p4 = scmp.lt.s32.totalorder %s42_s22, %s42_s22 }
   0xb   :  { %p7517_p3 = scmp.ne.s32.totalorder %s42_s22, %s7516_s14  ;;  %p7522_p5 = scmp.lt.s32.totalorder %s7516_s14, %s7516_s14 }
   0xd   :  { %p7523_p6 = por %p7522_p5, %p7521_p4 }
   0xf   :  { %p7524_p7 = pnand %p7523_p6, %p7517_p3 }
  0x11   :  { %7527 = shalt.err (!%p7524_p7)
}
  0x12   :  { %s7602_s15 = smov 256   ;;  %s7603_s16 = smov 16  }
  0x13   :  { %47 = dma.hbm_to_vmem [thread:$0]  %s10343_s3, 16384, %s42_s22, [#allocation6], %s7602_s15, %s7602_s15, %s7603_s16  }
  0x14   :  { %s7528_s21 = scalar_lea.hbm %s10342_s2, 16384 }
  0x15   :  { %p7529_p8 = scmp.ne.s32.totalorder %s10342_s2, %s7528_s21  ;;  %p7532_p9 = scmp.lt.u32.totalorder %s7528_s21, %s10342_s2 }
  0x17   :  { %p7534_p10 = pnand %p7532_p9, %p7529_p8 }
  0x19   :  { %7537 = shalt.err (!%p7534_p10)
}
  0x1a   :  { %s7538_s28 = scalar_lea.vmem %s7675_s24, 16384  ;;  %p7543_p12 = scmp.lt.s32.totalorder %s7675_s24, %s7675_s24 }
  0x1b   :  { %p7539_p11 = scmp.ne.s32.totalorder %s7675_s24, %s7538_s28  ;;  %p7544_p13 = scmp.lt.s32.totalorder %s7538_s28, %s7538_s28 }
  0x1d   :  { %p7545_p0 = por %p7544_p13, %p7543_p12 }
  0x1f   :  { %p7546_p1 = pnand %p7545_p0, %p7539_p11 }
  0x21   :  { %7549 = shalt.err (!%p7546_p1)
}
  0x22   :  { %35 = dma.hbm_to_vmem [thread:$0]  %s10342_s2, 16384, %s7675_s24, [#allocation3], %s7602_s15, %s7602_s15, %s7603_s16  }
  0x23   :  { %s7604_s29 = smov [#allocation7]   ;;  %s7550_s17 = scalar_lea.hbm %s10344_s4, 16384 }
  0x24   :  { %s53_s30 = sshll.u32 %s7604_s29, 4  ;;  %p7551_p2 = scmp.ne.s32.totalorder %s10344_s4, %s7550_s17  ;;  %s54_s30 = int_to_ptr.vmem [resolvable:$true] %s53_s30 }
  0x25   :  { %p7554_p3 = scmp.lt.u32.totalorder %s7550_s17, %s10344_s4 }
  0x27   :  { %p7556_p4 = pnand %p7554_p3, %p7551_p2 }
  0x29   :  { %7559 = shalt.err (!%p7556_p4)
}
  0x2a   :  { %s7560_s23 = scalar_lea.vmem %s54_s30, 16384  ;;  %p7565_p6 = scmp.lt.s32.totalorder %s54_s30, %s54_s30 }
  0x2b   :  { %p7561_p5 = scmp.ne.s32.totalorder %s54_s30, %s7560_s23  ;;  %p7566_p7 = scmp.lt.s32.totalorder %s7560_s23, %s7560_s23 }
  0x2d   :  { %p7567_p8 = por %p7566_p7, %p7565_p6 }
  0x2f   :  { %p7568_p9 = pnand %p7567_p8, %p7561_p5 }
  0x31   :  { %7571 = shalt.err (!%p7568_p9)
}
  0x32   :  { %59 = dma.hbm_to_vmem [thread:$0]  %s10344_s4, 16384, %s54_s30, [#allocation6], %s7602_s15, %s7602_s15, %s7603_s16  }
  0x33   :  { %7594 = dma.done.wait [#allocation3], 16384  }
  0x34   :  { %7595 = vsyncadd [#allocation3], 4294950912 }
  0x35   :  { %7596 = dma.done.wait [#allocation6], 32768  }
  0x36   :  { %7597 = vsyncadd [#allocation6], 4294934528  ;;  %v7605_v0 = vmov 0   ;;  %v6850_v1 = vld [vmem:[%s10341_s1 + $0x4] ss:$16 sps:$4 sm:$0xff]   ;;  %v6899_v34 = vld [vmem:[%s10340_s0 + $0x8] sm:$0xff]  }
  0x37   :  { %372 = vmatprep.mubr.bf16.mxu0 %v7605_v0  ;;  %485 = vmatprep.mubr.bf16.mxu1 %v7605_v0  ;;  %v6852_v2 = vld [vmem:[%s10341_s1 + $0xc] ss:$16 sps:$4 sm:$0xff]   ;;  %v6854_v3 = vld [vmem:[%s10341_s1] ss:$16 sps:$4 sm:$0xff]   ;;  %v6855_v4 = vld [vmem:[%s10341_s1 + $0x8] ss:$16 sps:$4 sm:$0xff]  }
  0x38   :  { %340 = vmatprep.subr.bf16.mxu0 %v6850_v1  ;;  %453 = vmatprep.subr.bf16.mxu1 %v6852_v2  ;;  %v6856_v5 = vld [vmem:[%s10341_s1 + $0x24] ss:$16 sps:$4 sm:$0xff]   ;;  %v6858_v6 = vld [vmem:[%s10341_s1 + $0x2c] ss:$16 sps:$4 sm:$0xff]   ;;  %v6860_v7 = vld [vmem:[%s10341_s1 + $0x20] ss:$16 sps:$4 sm:$0xff]  }
  0x39   :  { %341 = vmatpush1.bf16.msra.mxu0 %v6854_v3  ;;  %454 = vmatpush1.bf16.msra.mxu1 %v6855_v4  ;;  %v6861_v8 = vld [vmem:[%s10341_s1 + $0x28] ss:$16 sps:$4 sm:$0xff]   ;;  %v6862_v9 = vld [vmem:[%s10341_s1 + $0x44] ss:$16 sps:$4 sm:$0xff]   ;;  %v6864_v10 = vld [vmem:[%s10341_s1 + $0x4c] ss:$16 sps:$4 sm:$0xff]  }
  0x3a   :  { %342 = vmatprep.subr.bf16.mxu0 %v6856_v5  ;;  %455 = vmatprep.subr.bf16.mxu1 %v6858_v6  ;;  %v6866_v11 = vld [vmem:[%s10341_s1 + $0x40] ss:$16 sps:$4 sm:$0xff]   ;;  %v6867_v12 = vld [vmem:[%s10341_s1 + $0x48] ss:$16 sps:$4 sm:$0xff]   ;;  %v6868_v13 = vld [vmem:[%s10341_s1 + $0x64] ss:$16 sps:$4 sm:$0xff]  }
  0x3b   :  { %v6870_v14 = vld [vmem:[%s10341_s1 + $0x6c] ss:$16 sps:$4 sm:$0xff]   ;;  %v6872_v15 = vld [vmem:[%s10341_s1 + $0x60] ss:$16 sps:$4 sm:$0xff]   ;;  %v6873_v16 = vld [vmem:[%s10341_s1 + $0x68] ss:$16 sps:$4 sm:$0xff]  }
  0x3c   :  { %v6874_v17 = vld [vmem:[%s10341_s1 + $0x84] ss:$16 sps:$4 sm:$0xff]   ;;  %v6876_v18 = vld [vmem:[%s10341_s1 + $0x8c] ss:$16 sps:$4 sm:$0xff]   ;;  %v6878_v19 = vld [vmem:[%s10341_s1 + $0x80] ss:$16 sps:$4 sm:$0xff]  }
  0x3d   :  { %343 = vmatpush1.bf16.msra.mxu0 %v6860_v7  ;;  %456 = vmatpush1.bf16.msra.mxu1 %v6861_v8  ;;  %v6879_v20 = vld [vmem:[%s10341_s1 + $0x88] ss:$16 sps:$4 sm:$0xff]   ;;  %v6880_v21 = vld [vmem:[%s10341_s1 + $0xa4] ss:$16 sps:$4 sm:$0xff]   ;;  %v6882_v22 = vld [vmem:[%s10341_s1 + $0xac] ss:$16 sps:$4 sm:$0xff]  }
  0x3e   :  { %344 = vmatprep.subr.bf16.mxu0 %v6862_v9  ;;  %457 = vmatprep.subr.bf16.mxu1 %v6864_v10  ;;  %v6884_v23 = vld [vmem:[%s10341_s1 + $0xa0] ss:$16 sps:$4 sm:$0xff]   ;;  %v6885_v24 = vld [vmem:[%s10341_s1 + $0xa8] ss:$16 sps:$4 sm:$0xff]   ;;  %v6886_v25 = vld [vmem:[%s10341_s1 + $0xc4] ss:$16 sps:$4 sm:$0xff]  }
  0x3f   :  { %v6888_v26 = vld [vmem:[%s10341_s1 + $0xcc] ss:$16 sps:$4 sm:$0xff]   ;;  %v6890_v27 = vld [vmem:[%s10341_s1 + $0xc0] ss:$16 sps:$4 sm:$0xff]   ;;  %v6891_v28 = vld [vmem:[%s10341_s1 + $0xc8] ss:$16 sps:$4 sm:$0xff]  }
  0x40   :  { %v6892_v29 = vld [vmem:[%s10341_s1 + $0xe4] ss:$16 sps:$4 sm:$0xff]   ;;  %v6894_v30 = vld [vmem:[%s10341_s1 + $0xec] ss:$16 sps:$4 sm:$0xff]   ;;  %v6896_v31 = vld [vmem:[%s10341_s1 + $0xe0] ss:$16 sps:$4 sm:$0xff]  }
  0x41   :  { %345 = vmatpush1.bf16.msra.mxu0 %v6866_v11  ;;  %458 = vmatpush1.bf16.msra.mxu1 %v6867_v12  ;;  %v6897_v32 = vld [vmem:[%s10341_s1 + $0xe8] ss:$16 sps:$4 sm:$0xff]   ;;  %v6898_v33 = vld [vmem:[%s10340_s0] sm:$0xff]   ;;  %v6900_v35 = vld [vmem:[%s10340_s0 + $0x10] sm:$0xff]  }
  0x42   :  { %346 = vmatprep.subr.bf16.mxu0 %v6868_v13  ;;  %459 = vmatprep.subr.bf16.mxu1 %v6870_v14  ;;  %v6901_v36 = vld [vmem:[%s10340_s0 + $0x18] sm:$0xff]   ;;  %v6902_v37 = vld [vmem:[%s10340_s0 + $0x20] sm:$0xff]   ;;  %v6903_v38 = vld [vmem:[%s10340_s0 + $0x28] sm:$0xff]  }
  0x43   :  { %v6904_v39 = vld [vmem:[%s10340_s0 + $0x30] sm:$0xff]   ;;  %v6905_v40 = vld [vmem:[%s10340_s0 + $0x38] sm:$0xff]  }
  0x44   :  { %v6908_v45 = vld [vmem:[#allocation2 + $0x4] ss:$16 sps:$4 sm:$0xff]   ;;  %v6911_v46 = vld [vmem:[#allocation2 + $0xc] ss:$16 sps:$4 sm:$0xff]   ;;  %v6906_v49 = vld [vmem:[#allocation2] ss:$16 sps:$4 sm:$0xff]  }
  0x45   :  { %347 = vmatpush1.bf16.msra.mxu0 %v6872_v15  ;;  %460 = vmatpush1.bf16.msra.mxu1 %v6873_v16  ;;  %v6909_v50 = vld [vmem:[#allocation2 + $0x8] ss:$16 sps:$4 sm:$0xff]   ;;  %v6914_v57 = vld [vmem:[#allocation2 + $0x24] ss:$16 sps:$4 sm:$0xff]   ;;  %v6917_v58 = vld [vmem:[#allocation2 + $0x2c] ss:$16 sps:$4 sm:$0xff]  }
  0x46   :  { %348 = vmatprep.subr.bf16.mxu0 %v6874_v17  ;;  %461 = vmatprep.subr.bf16.mxu1 %v6876_v18  ;;  %v6912_v59 = vld [vmem:[#allocation2 + $0x20] ss:$16 sps:$4 sm:$0xff]   ;;  %v6915_v60 = vld [vmem:[#allocation2 + $0x28] ss:$16 sps:$4 sm:$0xff]   ;;  %v6920_v3 = vld [vmem:[#allocation2 + $0x44] ss:$16 sps:$4 sm:$0xff]  }
  0x47   :  { %v6923_v4 = vld [vmem:[#allocation2 + $0x4c] ss:$16 sps:$4 sm:$0xff]   ;;  %v6918_v9 = vld [vmem:[#allocation2 + $0x40] ss:$16 sps:$4 sm:$0xff]   ;;  %v6921_v10 = vld [vmem:[#allocation2 + $0x48] ss:$16 sps:$4 sm:$0xff]  }
  0x48   :  { %v6926_v17 = vld [vmem:[#allocation2 + $0x64] ss:$16 sps:$4 sm:$0xff]   ;;  %v6929_v18 = vld [vmem:[#allocation2 + $0x6c] ss:$16 sps:$4 sm:$0xff]  }
  0x49   :  { %349 = vmatpush1.bf16.msra.mxu0 %v6878_v19  ;;  %462 = vmatpush1.bf16.msra.mxu1 %v6879_v20  ;;  %v6924_v19 = vld [vmem:[#allocation2 + $0x60] ss:$16 sps:$4 sm:$0xff]   ;;  %v6927_v20 = vld [vmem:[#allocation2 + $0x68] ss:$16 sps:$4 sm:$0xff]  }
  0x4a   :  { %350 = vmatprep.subr.bf16.mxu0 %v6880_v21  ;;  %463 = vmatprep.subr.bf16.mxu1 %v6882_v22 }
  0x4d   :  { %351 = vmatpush1.bf16.msra.mxu0 %v6884_v23  ;;  %464 = vmatpush1.bf16.msra.mxu1 %v6885_v24 }
  0x4e   :  { %352 = vmatprep.subr.bf16.mxu0 %v6886_v25  ;;  %465 = vmatprep.subr.bf16.mxu1 %v6888_v26 }
  0x51   :  { %353 = vmatpush1.bf16.msra.mxu0 %v6890_v27  ;;  %466 = vmatpush1.bf16.msra.mxu1 %v6891_v28  ;;  %v6932_v27 = vld [vmem:[#allocation2 + $0x84] ss:$16 sps:$4 sm:$0xff]   ;;  %v6935_v28 = vld [vmem:[#allocation2 + $0x8c] ss:$16 sps:$4 sm:$0xff]  }
  0x52   :  { %354 = vmatprep.subr.bf16.mxu0 %v6892_v29  ;;  %467 = vmatprep.subr.bf16.mxu1 %v6894_v30 }
  0x55   :  { %355 = vmatpush1.bf16.msra.mxu0 %v6896_v31  ;;  %468 = vmatpush1.bf16.msra.mxu1 %v6897_v32 }
  0x56   :  { %1944 = vmatprep.subr.bf16.mxu0 %v6908_v45  ;;  %2170 = vmatprep.subr.bf16.mxu1 %v6911_v46  ;;  %v6938_v45 = vld [vmem:[#allocation2 + $0xa4] ss:$16 sps:$4 sm:$0xff]   ;;  %v6941_v46 = vld [vmem:[#allocation2 + $0xac] ss:$16 sps:$4 sm:$0xff]  }
  0x58   :  { %373 = vmatmul.mubr.bf16.vlgmr.msra.gmra.mrb[0].mxu0 %v6898_v33  ;;  %486 = vmatmul.mubr.bf16.vlgmr.msra.gmra.mrb[0].mxu1 %v6898_v33  ;;  %v6930_v33 = vld [vmem:[#allocation2 + $0x80] ss:$16 sps:$4 sm:$0xff]  }
  0x59   :  { %382 = vmatprep.mubr.bf16.mxu0 %v7605_v0  ;;  %495 = vmatprep.mubr.bf16.mxu1 %v7605_v0 }
  0x5a   :  { %1945 = vmatpush1.bf16.msra.mxu0 %v6906_v49  ;;  %2171 = vmatpush1.bf16.msra.mxu1 %v6909_v50  ;;  %v6936_v49 = vld [vmem:[#allocation2 + $0xa0] ss:$16 sps:$4 sm:$0xff]   ;;  %v6939_v50 = vld [vmem:[#allocation2 + $0xa8] ss:$16 sps:$4 sm:$0xff]  }
  0x5b   :  { %1946 = vmatprep.subr.bf16.mxu0 %v6914_v57  ;;  %2172 = vmatprep.subr.bf16.mxu1 %v6917_v58 }
  0x5e   :  { %1947 = vmatpush1.bf16.msra.mxu0 %v6912_v59  ;;  %2173 = vmatpush1.bf16.msra.mxu1 %v6915_v60  ;;  %v6944_v59 = vld [vmem:[#allocation2 + $0xc4] ss:$16 sps:$4 sm:$0xff]   ;;  %v6947_v60 = vld [vmem:[#allocation2 + $0xcc] ss:$16 sps:$4 sm:$0xff]  }
  0x5f   :  { %1948 = vmatprep.subr.bf16.mxu0 %v6920_v3  ;;  %2174 = vmatprep.subr.bf16.mxu1 %v6923_v4 }
  0x60   :  { %383 = vmatmul.mubr.bf16.gmra.mrb[4].mxu0 %v6899_v34  ;;  %496 = vmatmul.mubr.bf16.gmra.mrb[4].mxu1 %v6899_v34  ;;  %v6933_v34 = vld [vmem:[#allocation2 + $0x88] ss:$16 sps:$4 sm:$0xff]  }
  0x61   :  { %392 = vmatprep.mubr.bf16.mxu0 %v7605_v0  ;;  %505 = vmatprep.mubr.bf16.mxu1 %v7605_v0 }
  0x62   :  { %1949 = vmatpush1.bf16.msra.mxu0 %v6918_v9  ;;  %2175 = vmatpush1.bf16.msra.mxu1 %v6921_v10 }
  0x63   :  { %1950 = vmatprep.subr.bf16.mxu0 %v6926_v17  ;;  %2176 = vmatprep.subr.bf16.mxu1 %v6929_v18  ;;  %v6950_v17 = vld [vmem:[#allocation2 + $0xe4] ss:$16 sps:$4 sm:$0xff]   ;;  %v6953_v18 = vld [vmem:[#allocation2 + $0xec] ss:$16 sps:$4 sm:$0xff]  }
  0x66   :  { %1951 = vmatpush1.bf16.msra.mxu0 %v6924_v19  ;;  %2177 = vmatpush1.bf16.msra.mxu1 %v6927_v20  ;;  %v6948_v19 = vld [vmem:[#allocation2 + $0xe0] ss:$16 sps:$4 sm:$0xff]   ;;  %v6951_v20 = vld [vmem:[#allocation2 + $0xe8] ss:$16 sps:$4 sm:$0xff]  }
  0x67   :  { %1952 = vmatprep.subr.bf16.mxu0 %v6932_v27  ;;  %2178 = vmatprep.subr.bf16.mxu1 %v6935_v28 }
  0x68   :  { %393 = vmatmul.mubr.bf16.gmra.mrb[8].mxu0 %v6900_v35  ;;  %506 = vmatmul.mubr.bf16.gmra.mrb[8].mxu1 %v6900_v35 }
  0x69   :  { %402 = vmatprep.mubr.bf16.mxu0 %v7605_v0  ;;  %515 = vmatprep.mubr.bf16.mxu1 %v7605_v0 }
  0x6a   :  { %1953 = vmatpush1.bf16.msra.mxu0 %v6930_v33  ;;  %2179 = vmatpush1.bf16.msra.mxu1 %v6933_v34  ;;  %v6956_v33 = vld [vmem:[#allocation2 + $0x104] ss:$16 sps:$4 sm:$0xff]   ;;  %v6959_v34 = vld [vmem:[#allocation2 + $0x10c] ss:$16 sps:$4 sm:$0xff]  }
  0x6b   :  { %1954 = vmatprep.subr.bf16.mxu0 %v6938_v45  ;;  %2180 = vmatprep.subr.bf16.mxu1 %v6941_v46 }
  0x6e   :  { %1955 = vmatpush1.bf16.msra.mxu0 %v6936_v49  ;;  %2181 = vmatpush1.bf16.msra.mxu1 %v6939_v50 }
  0x6f   :  { %1956 = vmatprep.subr.bf16.mxu0 %v6944_v59  ;;  %2182 = vmatprep.subr.bf16.mxu1 %v6947_v60 }
  0x70   :  { %403 = vmatmul.mubr.bf16.gmra.mrb[12].mxu0 %v6901_v36  ;;  %516 = vmatmul.mubr.bf16.gmra.mrb[12].mxu1 %v6901_v36 }
  0x71   :  { %412 = vmatprep.mubr.bf16.mxu0 %v7605_v0  ;;  %525 = vmatprep.mubr.bf16.mxu1 %v7605_v0 }
  0x78   :  { %413 = vmatmul.mubr.bf16.gmra.mrb[16].mxu0 %v6902_v37  ;;  %526 = vmatmul.mubr.bf16.gmra.mrb[16].mxu1 %v6902_v37 }
  0x79   :  { %422 = vmatprep.mubr.bf16.mxu0 %v7605_v0  ;;  %535 = vmatprep.mubr.bf16.mxu1 %v7605_v0 }
  0x80   :  { %423 = vmatmul.mubr.bf16.gmra.mrb[20].mxu0 %v6903_v38  ;;  %536 = vmatmul.mubr.bf16.gmra.mrb[20].mxu1 %v6903_v38 }
  0x81   :  { %432 = vmatprep.mubr.bf16.mxu0 %v7605_v0  ;;  %545 = vmatprep.mubr.bf16.mxu1 %v7605_v0 }
  0x88   :  { %433 = vmatmul.mubr.bf16.gmra.mrb[24].mxu0 %v6904_v39  ;;  %546 = vmatmul.mubr.bf16.gmra.mrb[24].mxu1 %v6904_v39 }
  0x89   :  { %442 = vmatprep.mubr.bf16.mxu0 %v7605_v0  ;;  %555 = vmatprep.mubr.bf16.mxu1 %v7605_v0 }
  0x90   :  { %443 = vmatmul.mubr.bf16.gmra.mrb[28].mxu0 %v6905_v40  ;;  %556 = vmatmul.mubr.bf16.gmra.mrb[28].mxu1 %v6905_v40 }
 0x12b   :  { %v7863_v41 = vpop.f32.mrb[0].mxu0  ;;  %v7865_v42 = vpop.f32.mrb[0].mxu1 }
 0x12c   :  { %v7867_v43 = vpop.f32.mrb[1].mxu0  ;;  %v7869_v44 = vpop.f32.mrb[1].mxu1 }
 0x12d   :  { %10526 = vst [vmem:[#allocation12_spill] sm:$0xff] %v7869_v44  ;;  %v7871_v47 = vpop.f32.mrb[2].mxu0  ;;  %v7873_v48 = vpop.f32.mrb[2].mxu1 }
 0x12e   :  { %v568_v51 = vadd.f32 %v7871_v47, %v7863_v41  ;;  %v610_v52 = vadd.f32 %v7873_v48, %v7865_v42  ;;  %v7879_v53 = vpop.f32.mrb[3].mxu0  ;;  %v7881_v54 = vpop.f32.mrb[3].mxu1 }
 0x12f   :  { %10527 = vst [vmem:[#allocation13_spill] sm:$0xff] %v7881_v54  ;;  %v589_v55 = vadd.f32 %v7879_v53, %v7867_v43  ;;  %v631_v56 = vadd.f32 %v7881_v54, %v7869_v44 }
 0x133   :  { %v7887_v61 = vpop.f32.mrb[4].mxu0  ;;  %v7889_v62 = vpop.f32.mrb[4].mxu1 }
 0x134   :  { %v569_v63 = vadd.f32 %v568_v51, %v7887_v61  ;;  %v611_v0 = vadd.f32 %v610_v52, %v7889_v62  ;;  %v7893_v1 = vpop.f32.mrb[5].mxu0  ;;  %v7895_v2 = vpop.f32.mrb[5].mxu1 }
 0x135   :  { %10528 = vst [vmem:[#allocation14_spill] sm:$0xff] %v7895_v2  ;;  %v590_v5 = vadd.f32 %v589_v55, %v7893_v1  ;;  %v632_v6 = vadd.f32 %v631_v56, %v7895_v2  ;;  %v7899_v7 = vpop.f32.mrb[6].mxu0  ;;  %v7901_v8 = vpop.f32.mrb[6].mxu1 }
 0x136   :  { %v570_v11 = vadd.f32 %v569_v63, %v7899_v7  ;;  %v612_v12 = vadd.f32 %v611_v0, %v7901_v8  ;;  %v7905_v13 = vpop.f32.mrb[7].mxu0  ;;  %v7907_v14 = vpop.f32.mrb[7].mxu1 }
 0x137   :  { %10529 = vst [vmem:[#allocation15_spill] sm:$0xff] %v7907_v14  ;;  %v591_v15 = vadd.f32 %v590_v5, %v7905_v13  ;;  %v633_v16 = vadd.f32 %v632_v6, %v7907_v14  ;;  %v6942_v5 = vld [vmem:[#allocation2 + $0xc0] ss:$16 sps:$4 sm:$0xff]   ;;  %v6945_v6 = vld [vmem:[#allocation2 + $0xc8] ss:$16 sps:$4 sm:$0xff]  }
 0x138   :  { %1957 = vmatpush1.bf16.msra.mxu0 %v6942_v5  ;;  %2183 = vmatpush1.bf16.msra.mxu1 %v6945_v6  ;;  %v6960_v5 = vld [vmem:[#allocation2 + $0x120] ss:$16 sps:$4 sm:$0xff]   ;;  %v6963_v6 = vld [vmem:[#allocation2 + $0x128] ss:$16 sps:$4 sm:$0xff]  }
 0x139   :  { %1958 = vmatprep.subr.bf16.mxu0 %v6950_v17  ;;  %2184 = vmatprep.subr.bf16.mxu1 %v6953_v18  ;;  %v6990_v14 = vld [vmem:[#allocation2 + $0x1c0] ss:$16 sps:$4 sm:$0xff]  }
 0x13b   :  { %v7911_v21 = vpop.f32.mrb[8].mxu0  ;;  %v7913_v22 = vpop.f32.mrb[8].mxu1 }
 0x13c   :  { %v571_v23 = vadd.f32 %v570_v11, %v7911_v21  ;;  %v613_v24 = vadd.f32 %v612_v12, %v7913_v22  ;;  %v7917_v25 = vpop.f32.mrb[9].mxu0  ;;  %v7919_v26 = vpop.f32.mrb[9].mxu1  ;;  %1959 = vmatpush1.bf16.msra.mxu0 %v6948_v19  ;;  %2185 = vmatpush1.bf16.msra.mxu1 %v6951_v20  ;;  %v6968_v19 = vld [vmem:[#allocation2 + $0x144] ss:$16 sps:$4 sm:$0xff]   ;;  %v6971_v20 = vld [vmem:[#allocation2 + $0x14c] ss:$16 sps:$4 sm:$0xff]  }
 0x13d   :  { %10530 = vst [vmem:[#allocation16_spill] sm:$0xff] %v7919_v26  ;;  %v592_v29 = vadd.f32 %v591_v15, %v7917_v25  ;;  %v634_v30 = vadd.f32 %v633_v16, %v7919_v26  ;;  %v7923_v31 = vpop.f32.mrb[10].mxu0  ;;  %v7925_v32 = vpop.f32.mrb[10].mxu1  ;;  %1960 = vmatprep.subr.bf16.mxu0 %v6956_v33  ;;  %2186 = vmatprep.subr.bf16.mxu1 %v6959_v34 }
 0x13e   :  { %v572_v35 = vadd.f32 %v571_v23, %v7923_v31  ;;  %v614_v36 = vadd.f32 %v613_v24, %v7925_v32  ;;  %v7929_v37 = vpop.f32.mrb[11].mxu0  ;;  %v7931_v38 = vpop.f32.mrb[11].mxu1 }
 0x13f   :  { %10531 = vst [vmem:[#allocation17_spill] sm:$0xff] %v7931_v38  ;;  %v593_v39 = vadd.f32 %v592_v29, %v7929_v37  ;;  %v635_v40 = vadd.f32 %v634_v30, %v7931_v38  ;;  %v6987_v38 = vld [vmem:[#allocation2 + $0x1a8] ss:$16 sps:$4 sm:$0xff]  }
 0x143   :  { %v7935_v51 = vpop.f32.mrb[12].mxu0  ;;  %v7937_v52 = vpop.f32.mrb[12].mxu1 }
 0x144   :  { %v573_v55 = vadd.f32 %v572_v35, %v7935_v51  ;;  %v615_v56 = vadd.f32 %v614_v36, %v7937_v52  ;;  %v7941_v57 = vpop.f32.mrb[13].mxu0  ;;  %v7943_v58 = vpop.f32.mrb[13].mxu1 }
 0x145   :  { %10532 = vst [vmem:[#allocation18_spill] sm:$0xff] %v7941_v57  ;;  %10533 = vst [vmem:[#allocation19_spill] sm:$0xff] %v7943_v58  ;;  %v594_v63 = vadd.f32 %v593_v39, %v7941_v57  ;;  %v636_v0 = vadd.f32 %v635_v40, %v7943_v58  ;;  %v7947_v3 = vpop.f32.mrb[14].mxu0  ;;  %v7949_v4 = vpop.f32.mrb[14].mxu1  ;;  %v6984_v58 = vld [vmem:[#allocation2 + $0x1a0] ss:$16 sps:$4 sm:$0xff]  }
 0x146   :  { %v574_v9 = vadd.f32 %v573_v55, %v7947_v3  ;;  %v616_v10 = vadd.f32 %v615_v56, %v7949_v4  ;;  %v7953_v11 = vpop.f32.mrb[15].mxu0  ;;  %v7955_v12 = vpop.f32.mrb[15].mxu1  ;;  %v6954_v55 = vld [vmem:[#allocation2 + $0x100] ss:$16 sps:$4 sm:$0xff]   ;;  %v6957_v56 = vld [vmem:[#allocation2 + $0x108] ss:$16 sps:$4 sm:$0xff]  }
 0x147   :  { %10534 = vst [vmem:[#allocation20_spill] sm:$0xff] %v7953_v11  ;;  %10535 = vst [vmem:[#allocation21_spill] sm:$0xff] %v7955_v12  ;;  %v595_v15 = vadd.f32 %v594_v63, %v7953_v11  ;;  %v637_v16 = vadd.f32 %v636_v0, %v7955_v12  ;;  %1961 = vmatpush1.bf16.msra.mxu0 %v6954_v55  ;;  %2187 = vmatpush1.bf16.msra.mxu1 %v6957_v56  ;;  %v6962_v63 = vld [vmem:[#allocation2 + $0x124] ss:$16 sps:$4 sm:$0xff]   ;;  %v6965_v0 = vld [vmem:[#allocation2 + $0x12c] ss:$16 sps:$4 sm:$0xff]  }
 0x148   :  { %1962 = vmatprep.subr.bf16.mxu0 %v6962_v63  ;;  %2188 = vmatprep.subr.bf16.mxu1 %v6965_v0  ;;  %v6974_v63 = vld [vmem:[#allocation2 + $0x164] ss:$16 sps:$4 sm:$0xff]   ;;  %v6977_v0 = vld [vmem:[#allocation2 + $0x16c] ss:$16 sps:$4 sm:$0xff]  }
 0x14b   :  { %v7959_v23 = vpop.f32.mrb[16].mxu0  ;;  %v7961_v24 = vpop.f32.mrb[16].mxu1  ;;  %1963 = vmatpush1.bf16.msra.mxu0 %v6960_v5  ;;  %2189 = vmatpush1.bf16.msra.mxu1 %v6963_v6  ;;  %v6972_v5 = vld [vmem:[#allocation2 + $0x160] ss:$16 sps:$4 sm:$0xff]   ;;  %v6975_v6 = vld [vmem:[#allocation2 + $0x168] ss:$16 sps:$4 sm:$0xff]  }
 0x14c   :  { %v575_v27 = vadd.f32 %v574_v9, %v7959_v23  ;;  %v617_v28 = vadd.f32 %v616_v10, %v7961_v24  ;;  %v7965_v29 = vpop.f32.mrb[17].mxu0  ;;  %v7967_v30 = vpop.f32.mrb[17].mxu1  ;;  %1964 = vmatprep.subr.bf16.mxu0 %v6968_v19  ;;  %2190 = vmatprep.subr.bf16.mxu1 %v6971_v20 }
 0x14d   :  { %10536 = vst [vmem:[#allocation22_spill] sm:$0xff] %v7965_v29  ;;  %10537 = vst [vmem:[#allocation23_spill] sm:$0xff] %v7967_v30  ;;  %v596_v35 = vadd.f32 %v595_v15, %v7965_v29  ;;  %v638_v36 = vadd.f32 %v637_v16, %v7967_v30  ;;  %v7971_v39 = vpop.f32.mrb[18].mxu0  ;;  %v7973_v40 = vpop.f32.mrb[18].mxu1 }
 0x14e   :  { %v576_v45 = vadd.f32 %v575_v27, %v7971_v39  ;;  %v618_v46 = vadd.f32 %v617_v28, %v7973_v40  ;;  %v7977_v49 = vpop.f32.mrb[19].mxu0  ;;  %v7979_v50 = vpop.f32.mrb[19].mxu1 }
 0x14f   :  { %10538 = vst [vmem:[#allocation24_spill] sm:$0xff] %v7977_v49  ;;  %10539 = vst [vmem:[#allocation25_spill] sm:$0xff] %v7979_v50  ;;  %v597_v59 = vadd.f32 %v596_v35, %v7977_v49  ;;  %v639_v60 = vadd.f32 %v638_v36, %v7979_v50  ;;  %v6966_v35 = vld [vmem:[#allocation2 + $0x140] ss:$16 sps:$4 sm:$0xff]   ;;  %v6969_v36 = vld [vmem:[#allocation2 + $0x148] ss:$16 sps:$4 sm:$0xff]  }
 0x150   :  { %1965 = vmatpush1.bf16.msra.mxu0 %v6966_v35  ;;  %2191 = vmatpush1.bf16.msra.mxu1 %v6969_v36  ;;  %v6983_v35 = vld [vmem:[#allocation2 + $0x18c] ss:$16 sps:$4 sm:$0xff]   ;;  %v6978_v50 = vld [vmem:[#allocation2 + $0x180] ss:$16 sps:$4 sm:$0xff]  }
 0x151   :  { %1966 = vmatprep.subr.bf16.mxu0 %v6974_v63  ;;  %2192 = vmatprep.subr.bf16.mxu1 %v6977_v0 }
 0x153   :  { %v7983_v9 = vpop.f32.mrb[20].mxu0  ;;  %v7985_v10 = vpop.f32.mrb[20].mxu1 }
 0x154   :  { %v577_v15 = vadd.f32 %v576_v45, %v7983_v9  ;;  %v619_v16 = vadd.f32 %v618_v46, %v7985_v10  ;;  %v7989_v17 = vpop.f32.mrb[21].mxu0  ;;  %v7991_v18 = vpop.f32.mrb[21].mxu1  ;;  %1967 = vmatpush1.bf16.msra.mxu0 %v6972_v5  ;;  %2193 = vmatpush1.bf16.msra.mxu1 %v6975_v6  ;;  %v6986_v6 = vld [vmem:[#allocation2 + $0x1a4] ss:$16 sps:$4 sm:$0xff]  }
 0x155   :  { %10540 = vst [vmem:[#allocation26_spill] sm:$0xff] %v7989_v17  ;;  %10541 = vst [vmem:[#allocation27_spill] sm:$0xff] %v7991_v18  ;;  %v598_v27 = vadd.f32 %v597_v59, %v7989_v17  ;;  %v640_v28 = vadd.f32 %v639_v60, %v7991_v18  ;;  %v7995_v33 = vpop.f32.mrb[22].mxu0  ;;  %v7997_v34 = vpop.f32.mrb[22].mxu1  ;;  %2194 = vmatprep.subr.bf16.mxu1 %v6983_v35 }
 0x156   :  { %v578_v45 = vadd.f32 %v577_v15, %v7995_v33  ;;  %v620_v46 = vadd.f32 %v619_v16, %v7997_v34  ;;  %v8001_v55 = vpop.f32.mrb[23].mxu0  ;;  %v8003_v56 = vpop.f32.mrb[23].mxu1 }
 0x157   :  { %10542 = vst [vmem:[#allocation28_spill] sm:$0xff] %v8001_v55  ;;  %10543 = vst [vmem:[#allocation29_spill] sm:$0xff] %v8003_v56  ;;  %v599_v59 = vadd.f32 %v598_v27, %v8001_v55  ;;  %v641_v60 = vadd.f32 %v640_v28, %v8003_v56  ;;  %v6980_v28 = vld [vmem:[#allocation2 + $0x184] ss:$16 sps:$4 sm:$0xff]  }
 0x158   :  { %1968 = vmatprep.subr.bf16.mxu0 %v6980_v28 }
 0x159   :  { %1969 = vmatpush1.bf16.msra.mxu0 %v6978_v50  ;;  %v6992_v50 = vld [vmem:[#allocation2 + $0x1c4] ss:$16 sps:$4 sm:$0xff]  }
 0x15a   :  { %1970 = vmatprep.subr.bf16.mxu0 %v6986_v6 }
 0x15b   :  { %v8007_v15 = vpop.f32.mrb[24].mxu0  ;;  %v8009_v16 = vpop.f32.mrb[24].mxu1 }
 0x15c   :  { %v579_v18 = vadd.f32 %v578_v45, %v8007_v15  ;;  %v621_v19 = vadd.f32 %v620_v46, %v8009_v16  ;;  %v8013_v20 = vpop.f32.mrb[25].mxu0  ;;  %v8015_v27 = vpop.f32.mrb[25].mxu1  ;;  %v6981_v45 = vld [vmem:[#allocation2 + $0x188] ss:$16 sps:$4 sm:$0xff]  }
 0x15d   :  { %10544 = vst [vmem:[#allocation30_spill] sm:$0xff] %v8013_v20  ;;  %10545 = vst [vmem:[#allocation31_spill] sm:$0xff] %v8015_v27  ;;  %v600_v36 = vadd.f32 %v599_v59, %v8013_v20  ;;  %v642_v63 = vadd.f32 %v641_v60, %v8015_v27  ;;  %v8019_v0 = vpop.f32.mrb[26].mxu0  ;;  %v8021_v56 = vpop.f32.mrb[26].mxu1  ;;  %2195 = vmatpush1.bf16.msra.mxu1 %v6981_v45  ;;  %v6989_v27 = vld [vmem:[#allocation2 + $0x1ac] ss:$16 sps:$4 sm:$0xff]   ;;  %1971 = vmatpush1.bf16.msra.mxu0 %v6984_v58 }
 0x15e   :  { %v580_v46 = vadd.f32 %v579_v18, %v8019_v0  ;;  %v622_v30 = vadd.f32 %v621_v19, %v8021_v56  ;;  %v8025_v12 = vpop.f32.mrb[27].mxu0  ;;  %v8027_v5 = vpop.f32.mrb[27].mxu1  ;;  %2196 = vmatprep.subr.bf16.mxu1 %v6989_v27  ;;  %1972 = vmatprep.subr.bf16.mxu0 %v6992_v50 }
 0x15f   :  { %10546 = vst [vmem:[#allocation32_spill] sm:$0xff] %v8025_v12  ;;  %10547 = vst [vmem:[#allocation33_spill] sm:$0xff] %v8027_v5  ;;  %v601_v59 = vadd.f32 %v600_v36, %v8025_v12  ;;  %v643_v60 = vadd.f32 %v642_v63, %v8027_v5  ;;  %v6995_v63 = vld [vmem:[#allocation2 + $0x1cc] ss:$16 sps:$4 sm:$0xff]  }
 0x160   :  { %v7001_v12 = vld [vmem:[#allocation2 + $0x1ec] ss:$16 sps:$4 sm:$0xff]  }
 0x161   :  { %2197 = vmatpush1.bf16.msra.mxu1 %v6987_v38  ;;  %1973 = vmatpush1.bf16.msra.mxu0 %v6990_v14  ;;  %v6996_v38 = vld [vmem:[#allocation2 + $0x1e0] ss:$16 sps:$4 sm:$0xff]  }
 0x162   :  { %2198 = vmatprep.subr.bf16.mxu1 %v6995_v63 }
 0x163   :  { %v8031_v18 = vpop.f32.mrb[28].mxu0  ;;  %v8033_v19 = vpop.f32.mrb[28].mxu1 }
 0x164   :  { %v581_v26 = vadd.f32 %v580_v46, %v8031_v18  ;;  %v623_v28 = vadd.f32 %v622_v30, %v8033_v19  ;;  %v8037_v35 = vpop.f32.mrb[29].mxu0  ;;  %v8039_v36 = vpop.f32.mrb[29].mxu1  ;;  %v6993_v46 = vld [vmem:[#allocation2 + $0x1c8] ss:$16 sps:$4 sm:$0xff]  }
 0x165   :  { %10548 = vst [vmem:[#allocation34_spill] sm:$0xff] %v8037_v35  ;;  %10549 = vst [vmem:[#allocation35_spill] sm:$0xff] %v8039_v36  ;;  %v602_v45 = vadd.f32 %v601_v59, %v8037_v35  ;;  %v644_v6 = vadd.f32 %v643_v60, %v8039_v36  ;;  %v8043_v27 = vpop.f32.mrb[30].mxu0  ;;  %v8045_v5 = vpop.f32.mrb[30].mxu1  ;;  %v6998_v36 = vld [vmem:[#allocation2 + $0x1e4] ss:$16 sps:$4 sm:$0xff]   ;;  %2199 = vmatpush1.bf16.msra.mxu1 %v6993_v46 }
 0x166   :  { %v582_v30 = vadd.f32 %v581_v26, %v8043_v27  ;;  %v624_v2 = vadd.f32 %v623_v28, %v8045_v5  ;;  %v8049_v54 = vpop.f32.mrb[31].mxu0  ;;  %v8051_v58 = vpop.f32.mrb[31].mxu1  ;;  %1974 = vmatprep.subr.bf16.mxu0 %v6998_v36  ;;  %v6999_v28 = vld [vmem:[#allocation2 + $0x1e8] ss:$16 sps:$4 sm:$0xff]   ;;  %2200 = vmatprep.subr.bf16.mxu1 %v7001_v12 }
 0x167   :  { %10550 = vst [vmem:[#allocation36_spill] sm:$0xff] %v8049_v54  ;;  %10551 = vst [vmem:[#allocation37_spill] sm:$0xff] %v8051_v58  ;;  %v603_v59 = vadd.f32 %v602_v45, %v8049_v54  ;;  %v645_v60 = vadd.f32 %v644_v6, %v8051_v58  ;;  %1975 = vmatpush1.bf16.msra.mxu0 %v6996_v38  ;;  %v7004_v45 = vld [vmem:[#allocation2 + $0x204] ss:$16 sps:$4 sm:$0xff]   ;;  %v7007_v54 = vld [vmem:[#allocation2 + $0x20c] ss:$16 sps:$4 sm:$0xff]  }
 0x168   :  { %v583_v44 = vrot.slane %v582_v30, 4  ;;  %v625_v35 = vrot.slane %v624_v2, 4  ;;  %2057 = vmatprep.subr.bf16.mxu0 %v7004_v45 }
 0x169   :  { %v604_v20 = vrot.slane %v603_v59, 4  ;;  %v646_v26 = vrot.slane %v645_v60, 4  ;;  %2201 = vmatpush1.bf16.msra.mxu1 %v6999_v28 }
 0x16a   :  { %v584_v55 = vadd.f32 %v583_v44, %v582_v30  ;;  %v626_v17 = vadd.f32 %v625_v35, %v624_v2  ;;  %2283 = vmatprep.subr.bf16.mxu1 %v7007_v54 }
 0x16b   :  { %v605_v50 = vadd.f32 %v604_v20, %v603_v59  ;;  %v647_v58 = vadd.f32 %v646_v26, %v645_v60 }
 0x16c   :  { %v585_v63 = vrot.slane %v584_v55, 2  ;;  %v627_v49 = vrot.slane %v626_v17, 2 }
 0x16d   :  { %v606_v6 = vrot.slane %v605_v50, 2  ;;  %v648_v57 = vrot.slane %v647_v58, 2 }
 0x16e   :  { %v586_v14 = vadd.f32 %v585_v63, %v584_v55  ;;  %v628_v29 = vadd.f32 %v627_v49, %v626_v17 }
 0x16f   :  { %v607_v36 = vadd.f32 %v606_v6, %v605_v50  ;;  %v649_v35 = vadd.f32 %v648_v57, %v647_v58 }
 0x170   :  { %v587_v11 = vrot.slane %v586_v14, 1  ;;  %v629_v46 = vrot.slane %v628_v29, 1 }
 0x171   :  { %v608_v20 = vrot.slane %v607_v36, 1 }
 0x172   :  { %v588_v44 = vadd.f32 %v587_v11, %v586_v14  ;;  %v630_v12 = vadd.f32 %v629_v46, %v628_v29 }
 0x174   :  { %v652_v2 = vmul.f32 0.0078125, %v588_v44 }
 0x176   :  { %v8056_v30 = vsub.f32 %v7863_v41, %v652_v2  ;;  %v8059_v59 = vsub.f32 %v7871_v47, %v652_v2  ;;  %v8062_v55 = vsub.f32 %v7887_v61, %v652_v2  ;;  %v8065_v54 = vsub.f32 %v7899_v7, %v652_v2 }
 0x177   :  { %v8068_v49 = vsub.f32 %v7911_v21, %v652_v2  ;;  %v8071_v11 = vsub.f32 %v7923_v31, %v652_v2  ;;  %v8074_v57 = vsub.f32 %v7935_v51, %v652_v2  ;;  %v8077_v41 = vsub.f32 %v7947_v3, %v652_v2 }
 0x178   :  { %v8080_v47 = vsub.f32 %v7959_v23, %v652_v2  ;;  %v8083_v61 = vsub.f32 %v7971_v39, %v652_v2  ;;  %v8086_v7 = vsub.f32 %v7983_v9, %v652_v2  ;;  %v8089_v21 = vsub.f32 %v7995_v33, %v652_v2 }
 0x179   :  { %10552 = vst [vmem:[#allocation38_spill] sm:$0xff] %v8077_v41  ;;  %v8092_v31 = vsub.f32 %v8007_v15, %v652_v2  ;;  %v8095_v51 = vsub.f32 %v8019_v0, %v652_v2  ;;  %v8098_v3 = vsub.f32 %v8031_v18, %v652_v2  ;;  %v8101_v23 = vsub.f32 %v8043_v27, %v652_v2 }
 0x17a   :  { %10553 = vst [vmem:[#allocation39_spill] sm:$0xff] %v8080_v47  ;;  %10554 = vst [vmem:[#allocation40_spill] sm:$0xff] %v8083_v61  ;;  %v720_v29 = vmul.f32 %v8056_v30, %v8056_v30  ;;  %v724_v39 = vmul.f32 %v8059_v59, %v8059_v59  ;;  %v654_v9 = vmul.f32 0.0078125, %v630_v12  ;;  %v728_v17 = vmul.f32 %v8062_v55, %v8062_v55 }
 0x17b   :  { %10555 = vst [vmem:[#allocation41_spill] sm:$0xff] %v8086_v7  ;;  %10556 = vst [vmem:[#allocation42_spill] sm:$0xff] %v8089_v21  ;;  %v732_v33 = vmul.f32 %v8065_v54, %v8065_v54  ;;  %v609_v15 = vadd.f32 %v608_v20, %v607_v36  ;;  %v650_v0 = vrot.slane %v649_v35, 1  ;;  %v744_v14 = vmul.f32 %v8074_v57, %v8074_v57 }
 0x17c   :  { %10557 = vst [vmem:[#allocation43_spill] sm:$0xff] %v8092_v31  ;;  %10558 = vst [vmem:[#allocation44_spill] sm:$0xff] %v8095_v51  ;;  %v784_v18 = vadd.f32 %v724_v39, %v720_v29  ;;  %v8112_v58 = vsub.f32 %v7865_v42, %v654_v9  ;;  %v8115_v27 = vsub.f32 %v7873_v48, %v654_v9 }
 0x17d   :  { %v8118_v60 = vsub.f32 %v7889_v62, %v654_v9  ;;  %v8121_v38 = vsub.f32 %v7901_v8, %v654_v9  ;;  %v8124_v26 = vsub.f32 %v7913_v22, %v654_v9  ;;  %v8127_v28 = vsub.f32 %v7925_v32, %v654_v9 }
 0x17e   :  { %10559 = vst [vmem:[#allocation45_spill] sm:$0xff] %v8112_v58  ;;  %10560 = vst [vmem:[#allocation46_spill] sm:$0xff] %v8115_v27  ;;  %v8130_v50 = vsub.f32 %v7937_v52, %v654_v9  ;;  %v785_v42 = vadd.f32 %v784_v18, %v728_v17  ;;  %v8133_v63 = vsub.f32 %v7949_v4, %v654_v9  ;;  %v10570_v18 = vld [vmem:[#allocation18_spill] sm:$0xff] }
 0x17f   :  { %10561 = vst [vmem:[#allocation47_spill] sm:$0xff] %v8118_v60  ;;  %10562 = vst [vmem:[#allocation48_spill] sm:$0xff] %v8121_v38  ;;  %v8136_v48 = vsub.f32 %v7961_v24, %v654_v9  ;;  %v8139_v62 = vsub.f32 %v7973_v40, %v654_v9  ;;  %v8142_v8 = vsub.f32 %v7985_v10, %v654_v9 }
 0x180   :  { %10563 = vst [vmem:[#allocation49_spill] sm:$0xff] %v8124_v26  ;;  %10564 = vst [vmem:[#allocation50_spill] sm:$0xff] %v8127_v28  ;;  %v8145_v22 = vsub.f32 %v7997_v34, %v654_v9  ;;  %v8148_v32 = vsub.f32 %v8009_v16, %v654_v9  ;;  %v8151_v52 = vsub.f32 %v8021_v56, %v654_v9  ;;  %v653_v16 = vmul.f32 0.0078125, %v609_v15 }
 0x181   :  { %10565 = vst [vmem:[#allocation51_spill] sm:$0xff] %v8130_v50  ;;  %10566 = vst [vmem:[#allocation52_spill] sm:$0xff] %v8133_v63  ;;  %v736_v4 = vmul.f32 %v8068_v49, %v8068_v49  ;;  %v786_v24 = vadd.f32 %v785_v42, %v732_v33  ;;  %v8156_v45 = vsub.f32 %v8033_v19, %v654_v9  ;;  %v10571_v42 = vld [vmem:[#allocation20_spill] sm:$0xff] }
 0x182   :  { %10567 = vst [vmem:[#allocation53_spill] sm:$0xff] %v8136_v48  ;;  %10568 = vst [vmem:[#allocation54_spill] sm:$0xff] %v8139_v62  ;;  %v8159_v40 = vsub.f32 %v8045_v5, %v654_v9  ;;  %v722_v10 = vmul.f32 %v8112_v58, %v8112_v58  ;;  %v726_v34 = vmul.f32 %v8115_v27, %v8115_v27 }
 0x183   :  { %10569 = vst [vmem:[#allocation55_spill] sm:$0xff] %v8142_v8  ;;  %v740_v56 = vmul.f32 %v8071_v11, %v8071_v11  ;;  %v787_v6 = vadd.f32 %v786_v24, %v736_v4  ;;  %v748_v19 = vmul.f32 %v8077_v41, %v8077_v41  ;;  %v651_v46 = vadd.f32 %v650_v0, %v649_v35  ;;  %v10572_v24 = vld [vmem:[#allocation22_spill] sm:$0xff] }
 0x184   :  { %v752_v5 = vmul.f32 %v8080_v47, %v8080_v47  ;;  %v730_v44 = vmul.f32 %v8118_v60, %v8118_v60  ;;  %v734_v2 = vmul.f32 %v8121_v38, %v8121_v38  ;;  %v738_v12 = vmul.f32 %v8124_v26, %v8124_v26  ;;  %v10591_v38 = vld [vmem:[#allocation23_spill] sm:$0xff]  ;;  %v10593_v60 = vld [vmem:[#allocation25_spill] sm:$0xff] }
 0x185   :  { %v788_v36 = vadd.f32 %v787_v6, %v740_v56  ;;  %v826_v20 = vadd.f32 %v726_v34, %v722_v10  ;;  %v8180_v29 = vsub.f32 %v7867_v43, %v653_v16  ;;  %v8183_v39 = vsub.f32 %v7879_v53, %v653_v16  ;;  %v10573_v10 = vld [vmem:[#allocation24_spill] sm:$0xff]  ;;  %v10574_v34 = vld [vmem:[#allocation26_spill] sm:$0xff]  ;;  %v10596_v47 = vld [vmem:[#allocation31_spill] sm:$0xff] }
 0x186   :  { %v8186_v9 = vsub.f32 %v7893_v1, %v653_v16  ;;  %v8189_v17 = vsub.f32 %v7905_v13, %v653_v16  ;;  %v8192_v33 = vsub.f32 %v7917_v25, %v653_v16  ;;  %v8195_v0 = vsub.f32 %v7929_v37, %v653_v16  ;;  %v10575_v6 = vld [vmem:[#allocation28_spill] sm:$0xff] }
 0x187   :  { %v789_v35 = vadd.f32 %v788_v36, %v744_v14  ;;  %v827_v15 = vadd.f32 %v826_v20, %v730_v44  ;;  %v8198_v43 = vsub.f32 %v10570_v18, %v653_v16  ;;  %v8201_v53 = vsub.f32 %v10571_v42, %v653_v16  ;;  %v10576_v14 = vld [vmem:[#allocation30_spill] sm:$0xff]  ;;  %v10577_v44 = vld [vmem:[#allocation32_spill] sm:$0xff] }
 0x188   :  { %v8204_v1 = vsub.f32 %v10572_v24, %v653_v16  ;;  %v8207_v13 = vsub.f32 %v10573_v10, %v653_v16  ;;  %v8210_v25 = vsub.f32 %v10574_v34, %v653_v16  ;;  %v8213_v37 = vsub.f32 %v10575_v6, %v653_v16  ;;  %v10578_v18 = vld [vmem:[#allocation34_spill] sm:$0xff]  ;;  %v10579_v24 = vld [vmem:[#allocation36_spill] sm:$0xff] }
 0x189   :  { %v790_v4 = vadd.f32 %v789_v35, %v748_v19  ;;  %v828_v56 = vadd.f32 %v827_v15, %v734_v2  ;;  %v8216_v36 = vsub.f32 %v10576_v14, %v653_v16  ;;  %v8219_v20 = vsub.f32 %v10577_v44, %v653_v16 }
 0x18a   :  { %v756_v19 = vmul.f32 %v8083_v61, %v8083_v61  ;;  %v8224_v42 = vsub.f32 %v10578_v18, %v653_v16  ;;  %v8227_v10 = vsub.f32 %v10579_v24, %v653_v16  ;;  %v742_v2 = vmul.f32 %v8127_v28, %v8127_v28  ;;  %v10594_v61 = vld [vmem:[#allocation27_spill] sm:$0xff] }
 0x18b   :  { %v791_v35 = vadd.f32 %v790_v4, %v752_v5  ;;  %v829_v15 = vadd.f32 %v828_v56, %v738_v12  ;;  %v655_v34 = vmul.f32 0.0078125, %v651_v46  ;;  %v760_v6 = vmul.f32 %v8086_v7, %v8086_v7 }
 0x18c   :  { %v721_v44 = vmul.f32 %v8180_v29, %v8180_v29  ;;  %v725_v5 = vmul.f32 %v8183_v39, %v8183_v39  ;;  %v764_v4 = vmul.f32 %v8089_v21, %v8089_v21  ;;  %v768_v16 = vmul.f32 %v8092_v31, %v8092_v31 }
 0x18d   :  { %v792_v14 = vadd.f32 %v791_v35, %v756_v19  ;;  %v746_v12 = vmul.f32 %v8130_v50, %v8130_v50  ;;  %v830_v46 = vadd.f32 %v829_v15, %v742_v2  ;;  %v750_v19 = vmul.f32 %v8133_v63, %v8133_v63  ;;  %v10581_v50 = vld [vmem:[#allocation13_spill] sm:$0xff] }
 0x18e   :  { %v754_v35 = vmul.f32 %v8136_v48, %v8136_v48  ;;  %v758_v18 = vmul.f32 %v8139_v62, %v8139_v62  ;;  %v762_v24 = vmul.f32 %v8142_v8, %v8142_v8  ;;  %v729_v31 = vmul.f32 %v8186_v9, %v8186_v9  ;;  %v10583_v62 = vld [vmem:[#allocation14_spill] sm:$0xff]  ;;  %v10584_v8 = vld [vmem:[#allocation15_spill] sm:$0xff] }
 0x18f   :  { %v793_v56 = vadd.f32 %v792_v14, %v760_v6  ;;  %v831_v28 = vadd.f32 %v830_v46, %v746_v12  ;;  %v733_v2 = vmul.f32 %v8189_v17, %v8189_v17  ;;  %v805_v6 = vadd.f32 %v725_v5, %v721_v44  ;;  %v10580_v14 = vld [vmem:[#allocation12_spill] sm:$0xff]  ;;  %v10587_v5 = vld [vmem:[#allocation17_spill] sm:$0xff] }
 0x190   :  { %v8256_v63 = vsub.f32 %v10580_v14, %v655_v34  ;;  %v8259_v48 = vsub.f32 %v10581_v50, %v655_v34  ;;  %v8262_v21 = vsub.f32 %v10583_v62, %v655_v34  ;;  %v8265_v12 = vsub.f32 %v10584_v8, %v655_v34  ;;  %v10585_v46 = vld [vmem:[#allocation16_spill] sm:$0xff]  ;;  %v10589_v14 = vld [vmem:[#allocation19_spill] sm:$0xff] }
 0x191   :  { %v794_v15 = vadd.f32 %v793_v56, %v764_v4  ;;  %v832_v26 = vadd.f32 %v831_v28, %v750_v19  ;;  %v8268_v7 = vsub.f32 %v10585_v46, %v655_v34  ;;  %v737_v4 = vmul.f32 %v8192_v33, %v8192_v33  ;;  %v10590_v19 = vld [vmem:[#allocation21_spill] sm:$0xff] }
 0x192   :  { %10582 = vst [vmem:[#allocation18_spill] sm:$0xff] %v8259_v48  ;;  %v806_v44 = vadd.f32 %v805_v6, %v729_v31  ;;  %v8273_v56 = vsub.f32 %v10587_v5, %v655_v34  ;;  %v8276_v50 = vsub.f32 %v10589_v14, %v655_v34  ;;  %v8279_v62 = vsub.f32 %v10590_v19, %v655_v34  ;;  %v10595_v6 = vld [vmem:[#allocation29_spill] sm:$0xff] }
 0x193   :  { %10586 = vst [vmem:[#allocation20_spill] sm:$0xff] %v8268_v7  ;;  %v833_v28 = vadd.f32 %v832_v26, %v754_v35  ;;  %v8282_v8 = vsub.f32 %v10591_v38, %v655_v34  ;;  %v8285_v46 = vsub.f32 %v10593_v60, %v655_v34  ;;  %v795_v27 = vadd.f32 %v794_v15, %v768_v16  ;;  %v10598_v35 = vld [vmem:[#allocation33_spill] sm:$0xff]  ;;  %v10600_v38 = vld [vmem:[#allocation35_spill] sm:$0xff] }
 0x194   :  { %10588 = vst [vmem:[#allocation22_spill] sm:$0xff] %v8273_v56  ;;  %v807_v58 = vadd.f32 %v806_v44, %v733_v2  ;;  %v8288_v31 = vsub.f32 %v10594_v61, %v655_v34  ;;  %v8291_v5 = vsub.f32 %v10595_v6, %v655_v34  ;;  %v8294_v26 = vsub.f32 %v10596_v47, %v655_v34  ;;  %v10602_v2 = vld [vmem:[#allocation37_spill] sm:$0xff] }
 0x195   :  { %10592 = vst [vmem:[#allocation24_spill] sm:$0xff] %v8282_v8  ;;  %v834_v14 = vadd.f32 %v833_v28, %v758_v18  ;;  %v8297_v19 = vsub.f32 %v10598_v35, %v655_v34  ;;  %v8300_v41 = vsub.f32 %v10600_v38, %v655_v34  ;;  %v772_v60 = vmul.f32 %v8095_v51, %v8095_v51 }
 0x196   :  { %10597 = vst [vmem:[#allocation26_spill] sm:$0xff] %v8294_v26  ;;  %v741_v61 = vmul.f32 %v8195_v0, %v8195_v0  ;;  %v808_v16 = vadd.f32 %v807_v58, %v737_v4  ;;  %v8307_v15 = vsub.f32 %v10602_v2, %v655_v34  ;;  %v766_v47 = vmul.f32 %v8145_v22, %v8145_v22 }
 0x197   :  { %10599 = vst [vmem:[#allocation28_spill] sm:$0xff] %v8297_v19  ;;  %10601 = vst [vmem:[#allocation30_spill] sm:$0xff] %v8300_v41  ;;  %v835_v18 = vadd.f32 %v834_v14, %v762_v24  ;;  %v796_v44 = vadd.f32 %v795_v27, %v772_v60  ;;  %v745_v28 = vmul.f32 %v8198_v43, %v8198_v43 }
 0x198   :  { %10603 = vst [vmem:[#allocation32_spill] sm:$0xff] %v8307_v15  ;;  %v809_v6 = vadd.f32 %v808_v16, %v741_v61  ;;  %v770_v35 = vmul.f32 %v8148_v32, %v8148_v32  ;;  %v723_v51 = vmul.f32 %v8256_v63, %v8256_v63  ;;  %v727_v58 = vmul.f32 %v8259_v48, %v8259_v48 }
 0x199   :  { %v836_v38 = vadd.f32 %v835_v18, %v766_v47  ;;  %v776_v34 = vmul.f32 %v8098_v3, %v8098_v3  ;;  %v749_v27 = vmul.f32 %v8201_v53, %v8201_v53  ;;  %v774_v4 = vmul.f32 %v8151_v52, %v8151_v52 }
 0x19a   :  { %v810_v24 = vadd.f32 %v809_v6, %v745_v28  ;;  %v753_v61 = vmul.f32 %v8204_v1, %v8204_v1  ;;  %v731_v47 = vmul.f32 %v8262_v21, %v8262_v21  ;;  %v847_v18 = vadd.f32 %v727_v58, %v723_v51 }
 0x19b   :  { %v837_v14 = vadd.f32 %v836_v38, %v770_v35  ;;  %v797_v60 = vadd.f32 %v796_v44, %v776_v34  ;;  %v780_v48 = vmul.f32 %v8101_v23, %v8101_v23  ;;  %v757_v28 = vmul.f32 %v8207_v13, %v8207_v13 }
 0x19c   :  { %v811_v16 = vadd.f32 %v810_v24, %v749_v27  ;;  %v778_v35 = vmul.f32 %v8156_v45, %v8156_v45  ;;  %v735_v44 = vmul.f32 %v8265_v12, %v8265_v12  ;;  %v848_v38 = vadd.f32 %v847_v18, %v731_v47 }
 0x19d   :  { %v838_v2 = vadd.f32 %v837_v14, %v774_v4  ;;  %v798_v34 = vadd.f32 %v797_v60, %v780_v48  ;;  %v761_v27 = vmul.f32 %v8210_v25, %v8210_v25  ;;  %v739_v58 = vmul.f32 %v8268_v7, %v8268_v7 }
 0x19e   :  { %v812_v6 = vadd.f32 %v811_v16, %v753_v61  ;;  %v849_v4 = vadd.f32 %v848_v38, %v735_v44  ;;  %v765_v14 = vmul.f32 %v8213_v37, %v8213_v37  ;;  %v782_v16 = vmul.f32 %v8159_v40, %v8159_v40 }
 0x19f   :  { %v839_v51 = vadd.f32 %v838_v2, %v778_v35  ;;  %v743_v47 = vmul.f32 %v8273_v56, %v8273_v56  ;;  %v799_v60 = vrot.slane %v798_v34, 4  ;;  %v769_v18 = vmul.f32 %v8216_v36, %v8216_v36 }
 0x1a0   :  { %v813_v24 = vadd.f32 %v812_v6, %v757_v28  ;;  %v850_v48 = vadd.f32 %v849_v4, %v739_v58  ;;  %v747_v6 = vmul.f32 %v8276_v50, %v8276_v50  ;;  %v773_v44 = vmul.f32 %v8219_v20, %v8219_v20 }
 0x1a1   :  { %v840_v28 = vadd.f32 %v839_v51, %v782_v16  ;;  %v800_v56 = vadd.f32 %v799_v60, %v798_v34  ;;  %v777_v58 = vmul.f32 %v8224_v42, %v8224_v42  ;;  %v755_v51 = vmul.f32 %v8282_v8, %v8282_v8 }
 0x1a2   :  { %v814_v61 = vadd.f32 %v813_v24, %v761_v27  ;;  %v851_v35 = vadd.f32 %v850_v48, %v743_v47  ;;  %v751_v27 = vmul.f32 %v8279_v62, %v8279_v62  ;;  %v759_v47 = vmul.f32 %v8285_v46, %v8285_v46 }
 0x1a3   :  { %v841_v7 = vrot.slane %v840_v28, 4  ;;  %v763_v60 = vmul.f32 %v8288_v31, %v8288_v31 }
 0x1a4   :  { %v815_v2 = vadd.f32 %v814_v61, %v765_v14  ;;  %v852_v24 = vadd.f32 %v851_v35, %v747_v6  ;;  %v781_v61 = vmul.f32 %v8227_v10, %v8227_v10 }
 0x1a5   :  { %v842_v34 = vadd.f32 %v841_v7, %v840_v28  ;;  %v775_v7 = vmul.f32 %v8297_v19, %v8297_v19 }
 0x1a6   :  { %v816_v38 = vadd.f32 %v815_v2, %v769_v18  ;;  %v853_v14 = vadd.f32 %v852_v24, %v751_v27  ;;  %v801_v18 = vrot.slane %v800_v56, 2 }
 0x1a7   :  { %v843_v8 = vrot.slane %v842_v34, 2 }
 0x1a8   :  { %v817_v4 = vadd.f32 %v816_v38, %v773_v44  ;;  %v854_v48 = vadd.f32 %v853_v14, %v755_v51  ;;  %v767_v44 = vmul.f32 %v8291_v5, %v8291_v5  ;;  %v802_v27 = vadd.f32 %v801_v18, %v800_v56 }
 0x1a9   :  { %v783_v56 = vmul.f32 %v8307_v15, %v8307_v15 }
 0x1aa   :  { %v818_v16 = vadd.f32 %v817_v4, %v777_v58  ;;  %v855_v6 = vadd.f32 %v854_v48, %v759_v47  ;;  %v771_v58 = vmul.f32 %v8294_v26, %v8294_v26  ;;  %v803_v14 = vrot.slane %v802_v27, 1 }
 0x1ab   :  { %v779_v47 = vmul.f32 %v8300_v41, %v8300_v41 }
 0x1ac   :  { %v819_v2 = vadd.f32 %v818_v16, %v781_v61  ;;  %v856_v38 = vadd.f32 %v855_v6, %v763_v60  ;;  %v844_v16 = vadd.f32 %v843_v8, %v842_v34 }
 0x1ae   :  { %v820_v35 = vrot.slane %v819_v2, 4  ;;  %v857_v4 = vadd.f32 %v856_v38, %v767_v44  ;;  %v845_v6 = vrot.slane %v844_v16, 1 }
 0x1b0   :  { %v821_v24 = vadd.f32 %v820_v35, %v819_v2  ;;  %v858_v28 = vadd.f32 %v857_v4, %v771_v58  ;;  %v804_v2 = vadd.f32 %v803_v14, %v802_v27  ;;  %v846_v19 = vadd.f32 %v845_v6, %v844_v16 }
 0x1b1   :  { %v7606_v14 = vmov 1966171168  }
 0x1b2   :  { %v822_v51 = vrot.slane %v821_v24, 2  ;;  %v859_v48 = vadd.f32 %v858_v28, %v775_v7  ;;  %v868_v26 = vmul.f32 0.0078125, %v804_v2  ;;  %v870_v34 = vmul.f32 0.0078125, %v846_v19 }
 0x1b4   :  { %v823_v61 = vadd.f32 %v822_v51, %v821_v24  ;;  %v860_v18 = vadd.f32 %v859_v48, %v779_v47  ;;  %v872_v8 = vadd.f32 1e-05, %v868_v26  ;;  %v874_v28 = vadd.f32 1e-05, %v870_v34 }
 0x1b5   :  { %v889_v48 = vlaneseq }
 0x1b6   :  { %v824_v60 = vrot.slane %v823_v61, 1  ;;  %v861_v44 = vadd.f32 %v860_v18, %v783_v56  ;;  %7482 = vrsqrt.f32 %v872_v8  ;;  %v8395_v8 = vld [vmem:[%s10346_s6] sm:$0xf] }
 0x1b7   :  { %v8375_v56 = vshrl.u32 %v889_v48, 7 }
 0x1b8   :  { %v825_v35 = vadd.f32 %v824_v60, %v823_v61  ;;  %v862_v38 = vrot.slane %v861_v44, 4  ;;  %v887_v61 = vunpack.c.l.s4 %v7606_v14 }
 0x1ba   :  { %v869_v58 = vmul.f32 0.0078125, %v825_v35  ;;  %v863_v4 = vadd.f32 %v862_v38, %v861_v44  ;;  %v888_v60 = vunpack.c.0.s8 %v887_v61  ;;  %v566_v38 = vld [vmem:[%s10345_s5] sm:$0xf] }
 0x1bc   :  { %v864_v24 = vrot.slane %v863_v4, 2  ;;  %v873_v51 = vadd.f32 1e-05, %v869_v58  ;;  %v8378_v18 = vsub.s32 %v888_v60, %v8375_v56 }
 0x1be   :  { %v865_v41 = vadd.f32 %v864_v24, %v863_v4  ;;  %7484 = vrsqrt.f32 %v873_v51  ;;  %10604 = vst [vmem:[#allocation34_spill] sm:$0xff] %v8378_v18  ;;  %v8387_v4 = vsub.s32 0, %v8375_v56  ;;  %v8390_v24 = vsub.s32 1, %v8375_v56 }
 0x1bf   :  { %7486 = vrsqrt.f32 %v874_v28 }
 0x1c0   :  { %v866_v7 = vrot.slane %v865_v41, 1  ;;  %v7483_v16 = vpop.eup %7482  ;;  %10605 = vst [vmem:[#allocation36_spill] sm:$0xff] %v8387_v4  ;;  %10606 = vst [vmem:[#allocation12_spill] sm:$0xff] %v8390_v24  ;;  %v8409_v28 = vrot.slane %v8395_v8, %v8387_v4 }
 0x1c2   :  { %v867_v15 = vadd.f32 %v866_v7, %v865_v41 }
 0x1c4   :  { %v871_v47 = vmul.f32 0.0078125, %v867_v15 }
 0x1c6   :  { %v875_v27 = vadd.f32 1e-05, %v871_v47  ;;  %v8413_v47 = vrot.slane %v8395_v8, %v8390_v24 }
 0x1c8   :  { %7488 = vrsqrt.f32 %v875_v27  ;;  %v7485_v26 = vpop.eup %7484 }
 0x1c9   :  { %v884_v19 = vcombine.low %v7483_v16, %v7485_v26  ;;  %v7487_v2 = vpop.eup %7486 }
 0x1cb   :  { %v892_v41 = vrot.slane %v884_v19, %v8378_v18 }
 0x1d2   :  { %v7489_v6 = vpop.eup %7488 }
 0x1d3   :  { %v885_v15 = vcombine.low %v7487_v2, %v7489_v6 }
 0x1d5   :  { %v899_v35 = vrot.slane %v885_v15, %v8378_v18 }
 0x1d7   :  { %v900_v44 = vcombine.low %v892_v41, %v899_v35 }
 0x1d9   :  { %v907_v58 = vrot.slane %v900_v44, %v8378_v18  ;;  %v7143_v18 = vld [vmem:[#allocation5 + $0xe8] ss:$16 sps:$4 sm:$0xff]  }
 0x1db   :  { %v8397_v34 = vmul.f32 %v907_v58, %v566_v38  ;;  %v7002_v58 = vld [vmem:[#allocation2 + $0x200] ss:$16 sps:$4 sm:$0xff]  }
 0x1dd   :  { %v8401_v51 = vrot.slane %v8397_v34, %v8387_v4  ;;  %v8405_v7 = vrot.slane %v8397_v34, %v8390_v24  ;;  %v7145_v24 = vld [vmem:[#allocation5 + $0xec] ss:$16 sps:$4 sm:$0xff]   ;;  %v7140_v4 = vld [vmem:[#allocation5 + $0xe0] ss:$16 sps:$4 sm:$0xff]  }
 0x1df   :  { %v932_v27 = vmul.f32 %v8405_v7, %v8180_v29  ;;  %v936_v14 = vmul.f32 %v8405_v7, %v8183_v39  ;;  %v931_v61 = vmul.f32 %v8401_v51, %v8056_v30  ;;  %v935_v48 = vmul.f32 %v8401_v51, %v8059_v59 }
 0x1e0   :  { %v940_v16 = vmul.f32 %v8405_v7, %v8186_v9  ;;  %v944_v60 = vmul.f32 %v8405_v7, %v8189_v17  ;;  %v939_v39 = vmul.f32 %v8401_v51, %v8062_v55  ;;  %v943_v9 = vmul.f32 %v8401_v51, %v8065_v54 }
 0x1e1   :  { %v1017_v26 = vadd.f32 %v8413_v47, %v932_v27  ;;  %v1021_v19 = vadd.f32 %v8413_v47, %v936_v14  ;;  %v1016_v29 = vadd.f32 %v8409_v28, %v931_v61  ;;  %v1020_v30 = vadd.f32 %v8409_v28, %v935_v48  ;;  %v7005_v27 = vld [vmem:[#allocation2 + $0x208] ss:$16 sps:$4 sm:$0xff]  }
 0x1e2   :  { %v1025_v2 = vadd.f32 %v8413_v47, %v940_v16  ;;  %v1029_v59 = vadd.f32 %v8413_v47, %v944_v60  ;;  %v948_v55 = vmul.f32 %v8405_v7, %v8192_v33  ;;  %v952_v14 = vmul.f32 %v8405_v7, %v8195_v0  ;;  %v7010_v16 = vld [vmem:[#allocation2 + $0x224] ss:$16 sps:$4 sm:$0xff]   ;;  %v7013_v60 = vld [vmem:[#allocation2 + $0x22c] ss:$16 sps:$4 sm:$0xff]   ;;  %v7008_v33 = vld [vmem:[#allocation2 + $0x220] ss:$16 sps:$4 sm:$0xff]  }
 0x1e3   :  { %v1081_v6 = vmax.f32 %v1017_v26, 0.0  ;;  %v1085_v17 = vmax.f32 %v1021_v19, 0.0  ;;  %v1080_v41 = vmax.f32 %v1016_v29, 0.0  ;;  %v1084_v15 = vmax.f32 %v1020_v30, 0.0  ;;  %v7011_v0 = vld [vmem:[#allocation2 + $0x228] ss:$16 sps:$4 sm:$0xff]  }
 0x1e4   :  { %v1089_v35 = vmax.f32 %v1025_v2, 0.0  ;;  %v1093_v44 = vmax.f32 %v1029_v59, 0.0  ;;  %v1024_v48 = vadd.f32 %v8409_v28, %v939_v39  ;;  %v1028_v54 = vadd.f32 %v8409_v28, %v943_v9  ;;  %v7016_v39 = vld [vmem:[#allocation2 + $0x244] ss:$16 sps:$4 sm:$0xff]   ;;  %v7019_v30 = vld [vmem:[#allocation2 + $0x24c] ss:$16 sps:$4 sm:$0xff]  }
 0x1e5   :  { %v1145_v38 = vpack.c.bf16 %v1085_v17, %v1081_v6  ;;  %v1144_v61 = vpack.c.bf16 %v1084_v15, %v1080_v41  ;;  %v1033_v19 = vadd.f32 %v8413_v47, %v948_v55  ;;  %v1037_v29 = vadd.f32 %v8413_v47, %v952_v14  ;;  %v7025_v55 = vld [vmem:[#allocation2 + $0x26c] ss:$16 sps:$4 sm:$0xff]  }
 0x1e6   :  { %v1149_v26 = vpack.c.bf16 %v1093_v44, %v1089_v35  ;;  %v1088_v2 = vmax.f32 %v1024_v48, 0.0  ;;  %v1092_v59 = vmax.f32 %v1028_v54, 0.0  ;;  %v947_v9 = vmul.f32 %v8401_v51, %v8068_v49  ;;  %v7014_v44 = vld [vmem:[#allocation2 + $0x240] ss:$16 sps:$4 sm:$0xff]   ;;  %v7023_v48 = vld [vmem:[#allocation2 + $0x268] ss:$16 sps:$4 sm:$0xff]  }
 0x1e7   :  { %1976 = vmatprep.mubr.bf16.mxu0 %v1145_v38  ;;  %2202 = vmatprep.mubr.bf16.mxu1 %v1145_v38  ;;  %v951_v6 = vmul.f32 %v8401_v51, %v8071_v11  ;;  %v1097_v17 = vmax.f32 %v1033_v19, 0.0  ;;  %v1101_v41 = vmax.f32 %v1037_v29, 0.0  ;;  %v956_v15 = vmul.f32 %v8405_v7, %v8198_v43  ;;  %v7017_v38 = vld [vmem:[#allocation2 + $0x248] ss:$16 sps:$4 sm:$0xff]   ;;  %v7028_v54 = vld [vmem:[#allocation2 + $0x284] ss:$16 sps:$4 sm:$0xff]  }
 0x1e8   :  { %1977 = vmatmul.mubr.bf16.vlgmr.msra.gmra.mrb[32].mxu0 %v1144_v61  ;;  %2203 = vmatmul.mubr.bf16.vlgmr.msra.gmra.mrb[32].mxu1 %v1144_v61  ;;  %v960_v35 = vmul.f32 %v8405_v7, %v8201_v53  ;;  %v1148_v49 = vpack.c.bf16 %v1092_v59, %v1088_v2  ;;  %v7020_v61 = vld [vmem:[#allocation2 + $0x260] ss:$16 sps:$4 sm:$0xff]   ;;  %v955_v19 = vmul.f32 %v8401_v51, %v8074_v57  ;;  %v7029_v57 = vld [vmem:[#allocation2 + $0x288] ss:$16 sps:$4 sm:$0xff]  }
 0x1e9   :  { %2058 = vmatpush1.bf16.msra.mxu0 %v7002_v58  ;;  %2284 = vmatpush1.bf16.msra.mxu1 %v7005_v27  ;;  %v1032_v58 = vadd.f32 %v8409_v28, %v947_v9  ;;  %v1036_v11 = vadd.f32 %v8409_v28, %v951_v6  ;;  %v7022_v27 = vld [vmem:[#allocation2 + $0x264] ss:$16 sps:$4 sm:$0xff]   ;;  %v1153_v14 = vpack.c.bf16 %v1101_v41, %v1097_v17  ;;  %v7026_v9 = vld [vmem:[#allocation2 + $0x280] ss:$16 sps:$4 sm:$0xff]  }
 0x1ea   :  { %1986 = vmatprep.mubr.bf16.mxu0 %v1149_v26  ;;  %2212 = vmatprep.mubr.bf16.mxu1 %v1149_v26  ;;  %v1041_v43 = vadd.f32 %v8413_v47, %v956_v15  ;;  %v1045_v53 = vadd.f32 %v8413_v47, %v960_v35  ;;  %v10607_v29 = vld [vmem:[#allocation38_spill] sm:$0xff]  ;;  %v964_v2 = vmul.f32 %v8405_v7, %v8204_v1  ;;  %v7037_v1 = vld [vmem:[#allocation2 + $0x2ac] ss:$16 sps:$4 sm:$0xff]  }
 0x1eb   :  { %2059 = vmatprep.subr.bf16.mxu0 %v7010_v16  ;;  %2285 = vmatprep.subr.bf16.mxu1 %v7013_v60  ;;  %v7031_v16 = vld [vmem:[#allocation2 + $0x28c] ss:$16 sps:$4 sm:$0xff]   ;;  %v1096_v60 = vmax.f32 %v1032_v58, 0.0  ;;  %v1100_v26 = vmax.f32 %v1036_v11, 0.0  ;;  %v968_v59 = vmul.f32 %v8405_v7, %v8207_v13  ;;  %v1040_v17 = vadd.f32 %v8409_v28, %v955_v19  ;;  %v7034_v35 = vld [vmem:[#allocation2 + $0x2a4] ss:$16 sps:$4 sm:$0xff]  }
 0x1ec   :  { %v7032_v58 = vld [vmem:[#allocation2 + $0x2a0] ss:$16 sps:$4 sm:$0xff]   ;;  %v7035_v11 = vld [vmem:[#allocation2 + $0x2a8] ss:$16 sps:$4 sm:$0xff]  }
 0x1ed   :  { %2060 = vmatpush1.bf16.msra.mxu0 %v7008_v33  ;;  %2286 = vmatpush1.bf16.msra.mxu1 %v7011_v0  ;;  %v959_v33 = vmul.f32 %v8401_v51, %v10607_v29  ;;  %v8462_v0 = vsub.s32 2, %v8375_v56  ;;  %v1152_v6 = vpack.c.bf16 %v1100_v26, %v1096_v60  ;;  %v10611_v60 = vld [vmem:[#allocation45_spill] sm:$0xff] }
 0x1ee   :  { %2061 = vmatprep.subr.bf16.mxu0 %v7016_v39  ;;  %2287 = vmatprep.subr.bf16.mxu1 %v7019_v30  ;;  %v1105_v39 = vmax.f32 %v1041_v43, 0.0  ;;  %v1109_v30 = vmax.f32 %v1045_v53, 0.0  ;;  %v7043_v43 = vld [vmem:[#allocation2 + $0x2cc] ss:$16 sps:$4 sm:$0xff]   ;;  %v1104_v53 = vmax.f32 %v1040_v17, 0.0 }
 0x1ef   :  { %10608 = vst [vmem:[#allocation13_spill] sm:$0xff] %v8462_v0  ;;  %v1044_v41 = vadd.f32 %v8409_v28, %v959_v33  ;;  %v8472_v15 = vrot.slane %v8397_v34, %v8462_v0  ;;  %v976_v33 = vmul.f32 %v8405_v7, %v8213_v37  ;;  %v7049_v37 = vld [vmem:[#allocation2 + $0x2ec] ss:$16 sps:$4 sm:$0xff]  }
 0x1f0   :  { %1987 = vmatmul.mubr.bf16.gmra.mrb[36].mxu0 %v1148_v49  ;;  %2213 = vmatmul.mubr.bf16.gmra.mrb[36].mxu1 %v1148_v49  ;;  %v1157_v13 = vpack.c.bf16 %v1109_v30, %v1105_v39  ;;  %v8478_v49 = vrot.slane %v8395_v8, %v8462_v0  ;;  %v10612_v39 = vld [vmem:[#allocation46_spill] sm:$0xff] }
 0x1f1   :  { %2062 = vmatpush1.bf16.msra.mxu0 %v7014_v44  ;;  %2288 = vmatpush1.bf16.msra.mxu1 %v7017_v38  ;;  %v1049_v44 = vadd.f32 %v8413_v47, %v964_v2  ;;  %v1053_v38 = vadd.f32 %v8413_v47, %v968_v59  ;;  %v933_v26 = vmul.f32 %v8472_v15, %v10611_v60  ;;  %v7038_v2 = vld [vmem:[#allocation2 + $0x2c0] ss:$16 sps:$4 sm:$0xff]   ;;  %v7041_v59 = vld [vmem:[#allocation2 + $0x2c8] ss:$16 sps:$4 sm:$0xff]  }
 0x1f2   :  { %1996 = vmatprep.mubr.bf16.mxu0 %v1153_v14  ;;  %2222 = vmatprep.mubr.bf16.mxu1 %v1153_v14  ;;  %v7040_v14 = vld [vmem:[#allocation2 + $0x2c4] ss:$16 sps:$4 sm:$0xff]   ;;  %v937_v30 = vmul.f32 %v8472_v15, %v10612_v39  ;;  %v980_v39 = vmul.f32 %v8405_v7, %v8216_v36 }
 0x1f3   :  { %2063 = vmatprep.subr.bf16.mxu0 %v7022_v27  ;;  %2289 = vmatprep.subr.bf16.mxu1 %v7025_v55  ;;  %v10609_v27 = vld [vmem:[#allocation39_spill] sm:$0xff]  ;;  %v1113_v19 = vmax.f32 %v1049_v44, 0.0  ;;  %v1117_v29 = vmax.f32 %v1053_v38, 0.0  ;;  %v10614_v38 = vld [vmem:[#allocation48_spill] sm:$0xff] }
 0x1f4   :  { %v963_v55 = vmul.f32 %v8401_v51, %v10609_v27  ;;  %v1022_v17 = vadd.f32 %v8478_v49, %v937_v30  ;;  %v1061_v27 = vadd.f32 %v8413_v47, %v976_v33 }
 0x1f5   :  { %2064 = vmatpush1.bf16.msra.mxu0 %v7020_v61  ;;  %2290 = vmatpush1.bf16.msra.mxu1 %v7023_v48  ;;  %v1108_v61 = vmax.f32 %v1044_v41, 0.0  ;;  %v10610_v48 = vld [vmem:[#allocation40_spill] sm:$0xff] }
 0x1f6   :  { %2065 = vmatprep.subr.bf16.mxu0 %v7028_v54  ;;  %2291 = vmatprep.subr.bf16.mxu1 %v7031_v16  ;;  %v967_v54 = vmul.f32 %v8401_v51, %v10610_v48  ;;  %v972_v16 = vmul.f32 %v8405_v7, %v8210_v25  ;;  %v7046_v41 = vld [vmem:[#allocation2 + $0x2e4] ss:$16 sps:$4 sm:$0xff]  }
 0x1f7   :  { %v1156_v25 = vpack.c.bf16 %v1108_v61, %v1104_v53  ;;  %v7044_v53 = vld [vmem:[#allocation2 + $0x2e0] ss:$16 sps:$4 sm:$0xff]   ;;  %v7047_v61 = vld [vmem:[#allocation2 + $0x2e8] ss:$16 sps:$4 sm:$0xff]  }
 0x1f8   :  { %1997 = vmatmul.mubr.bf16.gmra.mrb[40].mxu0 %v1152_v6  ;;  %2223 = vmatmul.mubr.bf16.gmra.mrb[40].mxu1 %v1152_v6  ;;  %v1052_v6 = vadd.f32 %v8409_v28, %v967_v54  ;;  %v10616_v54 = vld [vmem:[#allocation42_spill] sm:$0xff] }
 0x1f9   :  { %2066 = vmatpush1.bf16.msra.mxu0 %v7026_v9  ;;  %2292 = vmatpush1.bf16.msra.mxu1 %v7029_v57  ;;  %v1048_v9 = vadd.f32 %v8409_v28, %v963_v55  ;;  %v1018_v57 = vadd.f32 %v8478_v49, %v933_v26  ;;  %v10615_v55 = vld [vmem:[#allocation41_spill] sm:$0xff] }
 0x1fa   :  { %2006 = vmatprep.mubr.bf16.mxu0 %v1157_v13  ;;  %2232 = vmatprep.mubr.bf16.mxu1 %v1157_v13  ;;  %v10613_v13 = vld [vmem:[#allocation47_spill] sm:$0xff]  ;;  %v1116_v33 = vmax.f32 %v1052_v6, 0.0  ;;  %v1125_v6 = vmax.f32 %v1061_v27, 0.0 }
 0x1fb   :  { %2067 = vmatprep.subr.bf16.mxu0 %v7034_v35  ;;  %2293 = vmatprep.subr.bf16.mxu1 %v7037_v1  ;;  %v1057_v35 = vadd.f32 %v8413_v47, %v972_v16  ;;  %v1082_v1 = vmax.f32 %v1018_v57, 0.0  ;;  %v941_v44 = vmul.f32 %v8472_v15, %v10613_v13  ;;  %v1112_v48 = vmax.f32 %v1048_v9, 0.0  ;;  %v10619_v27 = vld [vmem:[#allocation51_spill] sm:$0xff] }
 0x1fc   :  { %v975_v16 = vmul.f32 %v8401_v51, %v10616_v54  ;;  %v984_v9 = vmul.f32 %v8405_v7, %v8219_v20  ;;  %v1065_v54 = vadd.f32 %v8413_v47, %v980_v39  ;;  %v7059_v39 = vld [vmem:[#allocation2 + $0x328] ss:$16 sps:$4 sm:$0xff]  }
 0x1fd   :  { %2068 = vmatpush1.bf16.msra.mxu0 %v7032_v58  ;;  %2294 = vmatpush1.bf16.msra.mxu1 %v7035_v11  ;;  %v945_v58 = vmul.f32 %v8472_v15, %v10614_v38  ;;  %v1161_v11 = vpack.c.bf16 %v1117_v29, %v1113_v19  ;;  %v1026_v60 = vadd.f32 %v8478_v49, %v941_v44  ;;  %v7052_v19 = vld [vmem:[#allocation2 + $0x304] ss:$16 sps:$4 sm:$0xff]   ;;  %v7055_v29 = vld [vmem:[#allocation2 + $0x30c] ss:$16 sps:$4 sm:$0xff]   ;;  %v1121_v44 = vmax.f32 %v1057_v35, 0.0 }
 0x1fe   :  { %2069 = vmatprep.subr.bf16.mxu0 %v7040_v14  ;;  %2295 = vmatprep.subr.bf16.mxu1 %v7043_v43  ;;  %v971_v14 = vmul.f32 %v8401_v51, %v10615_v55  ;;  %v1086_v43 = vmax.f32 %v1022_v17, 0.0  ;;  %v10618_v17 = vld [vmem:[#allocation50_spill] sm:$0xff]  ;;  %v957_v55 = vmul.f32 %v8472_v15, %v10619_v27 }
 0x1ff   :  { %v1030_v26 = vadd.f32 %v8478_v49, %v945_v58  ;;  %v1090_v57 = vmax.f32 %v1026_v60, 0.0  ;;  %v953_v13 = vmul.f32 %v8472_v15, %v10618_v17  ;;  %v10621_v60 = vld [vmem:[#allocation43_spill] sm:$0xff]  ;;  %v10623_v17 = vld [vmem:[#allocation53_spill] sm:$0xff] }
 0x200   :  { %2007 = vmatmul.mubr.bf16.gmra.mrb[44].mxu0 %v1156_v25  ;;  %2233 = vmatmul.mubr.bf16.gmra.mrb[44].mxu1 %v1156_v25  ;;  %v8510_v30 = vpack.c.bf16 %v1086_v43, %v1082_v1  ;;  %v8519_v38 = vadd.f32 %v8409_v28, %v971_v14  ;;  %v7050_v1 = vld [vmem:[#allocation2 + $0x300] ss:$16 sps:$4 sm:$0xff]  }
 0x201   :  { %2070 = vmatpush1.bf16.msra.mxu0 %v7038_v2  ;;  %2296 = vmatpush1.bf16.msra.mxu1 %v7041_v59  ;;  %v10617_v2 = vld [vmem:[#allocation49_spill] sm:$0xff]  ;;  %v1094_v25 = vmax.f32 %v1030_v26, 0.0  ;;  %v1038_v20 = vadd.f32 %v8478_v49, %v953_v13  ;;  %v10620_v14 = vld [vmem:[#allocation52_spill] sm:$0xff]  ;;  %v979_v26 = vmul.f32 %v8401_v51, %v10621_v60 }
 0x202   :  { %2016 = vmatprep.mubr.bf16.mxu0 %v1161_v11  ;;  %2242 = vmatprep.mubr.bf16.mxu1 %v1161_v11  ;;  %v949_v59 = vmul.f32 %v8472_v15, %v10617_v2  ;;  %v1160_v11 = vpack.c.bf16 %v1116_v33, %v1112_v48  ;;  %v961_v43 = vmul.f32 %v8472_v15, %v10620_v14  ;;  %v7064_v13 = vld [vmem:[#allocation2 + $0x344] ss:$16 sps:$4 sm:$0xff]  }
 0x203   :  { %2071 = vmatprep.subr.bf16.mxu0 %v7046_v41  ;;  %2297 = vmatprep.subr.bf16.mxu1 %v7049_v37  ;;  %v7053_v41 = vld [vmem:[#allocation2 + $0x308] ss:$16 sps:$4 sm:$0xff]   ;;  %v1060_v37 = vadd.f32 %v8409_v28, %v975_v16  ;;  %v8523_v58 = vpack.c.bf16 %v1094_v25, %v1090_v57  ;;  %v1069_v16 = vadd.f32 %v8413_v47, %v984_v9  ;;  %v1102_v2 = vmax.f32 %v1038_v20, 0.0 }
 0x204   :  { %v1034_v36 = vadd.f32 %v8478_v49, %v949_v59  ;;  %v1165_v48 = vpack.c.bf16 %v1125_v6, %v1121_v44  ;;  %v1046_v33 = vadd.f32 %v8478_v49, %v961_v43  ;;  %v7056_v59 = vld [vmem:[#allocation2 + $0x320] ss:$16 sps:$4 sm:$0xff]   ;;  %v1120_v9 = vmax.f32 %v8519_v38, 0.0  ;;  %v7067_v44 = vld [vmem:[#allocation2 + $0x34c] ss:$16 sps:$4 sm:$0xff]  }
 0x205   :  { %2072 = vmatpush1.bf16.msra.mxu0 %v7044_v53  ;;  %2298 = vmatpush1.bf16.msra.mxu1 %v7047_v61  ;;  %v7058_v53 = vld [vmem:[#allocation2 + $0x324] ss:$16 sps:$4 sm:$0xff]   ;;  %v7061_v61 = vld [vmem:[#allocation2 + $0x32c] ss:$16 sps:$4 sm:$0xff]   ;;  %v1124_v57 = vmax.f32 %v1060_v37, 0.0  ;;  %v1129_v38 = vmax.f32 %v1065_v54, 0.0  ;;  %v992_v14 = vmul.f32 %v8405_v7, %v8227_v10 }
 0x206   :  { %2073 = vmatprep.subr.bf16.mxu0 %v7052_v19  ;;  %2299 = vmatprep.subr.bf16.mxu1 %v7055_v29  ;;  %v1098_v35 = vmax.f32 %v1034_v36, 0.0  ;;  %v8535_v19 = vsub.s32 3, %v8375_v56  ;;  %v1042_v29 = vadd.f32 %v8478_v49, %v957_v55  ;;  %v965_v56 = vmul.f32 %v8472_v15, %v10623_v17  ;;  %v10624_v6 = vld [vmem:[#allocation44_spill] sm:$0xff] }
 0x207   :  { %v983_v36 = vmul.f32 %v8401_v51, %v10624_v6  ;;  %v1133_v37 = vmax.f32 %v1069_v16, 0.0  ;;  %v8552_v55 = vadd.f32 %v8409_v28, %v979_v26  ;;  %v10626_v16 = vld [vmem:[#allocation55_spill] sm:$0xff]  ;;  %v987_v6 = vmul.f32 %v8401_v51, %v8098_v3 }
 0x208   :  { %10622 = vst [vmem:[#allocation14_spill] sm:$0xff] %v8535_v19  ;;  %2017 = vmatmul.mubr.bf16.gmra.mrb[48].mxu0 %v1160_v11  ;;  %2243 = vmatmul.mubr.bf16.gmra.mrb[48].mxu1 %v1160_v11  ;;  %v8540_v25 = vpack.c.bf16 %v1102_v2, %v1098_v35  ;;  %v1106_v20 = vmax.f32 %v1042_v29, 0.0  ;;  %v988_v35 = vmul.f32 %v8405_v7, %v8224_v42  ;;  %v7065_v42 = vld [vmem:[#allocation2 + $0x348] ss:$16 sps:$4 sm:$0xff]  }
 0x209   :  { %2074 = vmatpush1.bf16.msra.mxu0 %v7050_v1  ;;  %2300 = vmatpush1.bf16.msra.mxu1 %v7053_v41  ;;  %v1110_v1 = vmax.f32 %v1046_v33, 0.0  ;;  %v10625_v41 = vld [vmem:[#allocation54_spill] sm:$0xff]  ;;  %v1050_v27 = vadd.f32 %v8478_v49, %v965_v56  ;;  %v973_v26 = vmul.f32 %v8472_v15, %v10626_v16  ;;  %v977_v2 = vmul.f32 %v8472_v15, %v8145_v22 }
 0x20a   :  { %2026 = vmatprep.mubr.bf16.mxu0 %v1165_v48  ;;  %2252 = vmatprep.mubr.bf16.mxu1 %v1165_v48  ;;  %v969_v11 = vmul.f32 %v8472_v15, %v10625_v41  ;;  %v8569_v10 = vrot.slane %v8397_v34, %v8535_v19  ;;  %v1164_v7 = vpack.c.bf16 %v1124_v57, %v1120_v9  ;;  %v7070_v33 = vld [vmem:[#allocation2 + $0x364] ss:$16 sps:$4 sm:$0xff]   ;;  %v1128_v22 = vmax.f32 %v8552_v55, 0.0  ;;  %v7068_v57 = vld [vmem:[#allocation2 + $0x360] ss:$16 sps:$4 sm:$0xff]  }
 0x20b   :  { %2075 = vmatprep.subr.bf16.mxu0 %v7058_v53  ;;  %2301 = vmatprep.subr.bf16.mxu1 %v7061_v61  ;;  %v8556_v43 = vpack.c.bf16 %v1110_v1, %v1106_v20  ;;  %v8561_v53 = vrot.slane %v8395_v8, %v8535_v19  ;;  %v7062_v61 = vld [vmem:[#allocation2 + $0x340] ss:$16 sps:$4 sm:$0xff]   ;;  %v1114_v54 = vmax.f32 %v1050_v27, 0.0  ;;  %v1068_v8 = vadd.f32 %v8409_v28, %v983_v36  ;;  %v7079_v41 = vld [vmem:[#allocation2 + $0x38c] ss:$16 sps:$4 sm:$0xff]  }
 0x20c   :  { %v1054_v60 = vadd.f32 %v8478_v49, %v969_v11  ;;  %v1169_v29 = vpack.c.bf16 %v1133_v37, %v1129_v38  ;;  %v1058_v17 = vadd.f32 %v8478_v49, %v973_v26  ;;  %v1062_v56 = vadd.f32 %v8478_v49, %v977_v2 }
 0x20d   :  { %2076 = vmatpush1.bf16.msra.mxu0 %v7056_v59  ;;  %2302 = vmatpush1.bf16.msra.mxu1 %v7059_v39  ;;  %v7073_v59 = vld [vmem:[#allocation2 + $0x36c] ss:$16 sps:$4 sm:$0xff]   ;;  %v1073_v39 = vadd.f32 %v8413_v47, %v988_v35  ;;  %v1077_v34 = vadd.f32 %v8413_v47, %v992_v14  ;;  %v981_v9 = vmul.f32 %v8472_v15, %v8148_v32  ;;  %v7076_v47 = vld [vmem:[#allocation2 + $0x384] ss:$16 sps:$4 sm:$0xff]   ;;  %v1132_v11 = vmax.f32 %v1068_v8, 0.0 }
 0x20e   :  { %2077 = vmatprep.subr.bf16.mxu0 %v7064_v13  ;;  %2303 = vmatprep.subr.bf16.mxu1 %v7067_v44  ;;  %v1118_v48 = vmax.f32 %v1054_v60, 0.0  ;;  %v7071_v44 = vld [vmem:[#allocation2 + $0x368] ss:$16 sps:$4 sm:$0xff]   ;;  %v1122_v36 = vmax.f32 %v1058_v17, 0.0  ;;  %v1126_v20 = vmax.f32 %v1062_v56, 0.0  ;;  %v985_v1 = vmul.f32 %v8472_v15, %v8151_v52  ;;  %v10627_v14 = vld [vmem:[#allocation18_spill] sm:$0xff] }
 0x20f   :  { %v991_v32 = vmul.f32 %v8401_v51, %v8101_v23  ;;  %v934_v38 = vmul.f32 %v8569_v10, %v8256_v63  ;;  %v1066_v37 = vadd.f32 %v8478_v49, %v981_v9  ;;  %v1137_v3 = vmax.f32 %v1073_v39, 0.0  ;;  %v7074_v51 = vld [vmem:[#allocation2 + $0x380] ss:$16 sps:$4 sm:$0xff]   ;;  %v7085_v8 = vld [vmem:[#allocation2 + $0x3ac] ss:$16 sps:$4 sm:$0xff]  }
 0x210   :  { %2027 = vmatmul.mubr.bf16.gmra.mrb[52].mxu0 %v1164_v7  ;;  %2253 = vmatmul.mubr.bf16.gmra.mrb[52].mxu1 %v1164_v7  ;;  %v8577_v13 = vpack.c.bf16 %v1118_v48, %v1114_v54  ;;  %v8590_v35 = vpack.c.bf16 %v1126_v20, %v1122_v36  ;;  %v1070_v52 = vadd.f32 %v8478_v49, %v985_v1  ;;  %v1141_v55 = vmax.f32 %v1077_v34, 0.0  ;;  %v7082_v7 = vld [vmem:[#allocation2 + $0x3a4] ss:$16 sps:$4 sm:$0xff]   ;;  %v7080_v39 = vld [vmem:[#allocation2 + $0x3a0] ss:$16 sps:$4 sm:$0xff]  }
 0x211   :  { %2078 = vmatpush1.bf16.msra.mxu0 %v7062_v61  ;;  %2304 = vmatpush1.bf16.msra.mxu1 %v7065_v42  ;;  %v989_v27 = vmul.f32 %v8472_v15, %v8156_v45  ;;  %v938_v60 = vmul.f32 %v8569_v10, %v10627_v14  ;;  %v1130_v23 = vmax.f32 %v1066_v37, 0.0  ;;  %v993_v63 = vmul.f32 %v8472_v15, %v8159_v40  ;;  %v7077_v61 = vld [vmem:[#allocation2 + $0x388] ss:$16 sps:$4 sm:$0xff]   ;;  %v7086_v36 = vld [vmem:[#allocation2 + $0x3c0] ss:$16 sps:$4 sm:$0xff]  }
 0x212   :  { %2036 = vmatprep.mubr.bf16.mxu0 %v1169_v29  ;;  %2262 = vmatprep.mubr.bf16.mxu1 %v1169_v29  ;;  %v1072_v42 = vadd.f32 %v8409_v28, %v987_v6  ;;  %v1134_v54 = vmax.f32 %v1070_v52, 0.0  ;;  %v1168_v45 = vpack.c.bf16 %v1132_v11, %v1128_v22  ;;  %v1076_v26 = vadd.f32 %v8409_v28, %v991_v32  ;;  %v7083_v17 = vld [vmem:[#allocation2 + $0x3a8] ss:$16 sps:$4 sm:$0xff]   ;;  %v7088_v28 = vld [vmem:[#allocation2 + $0x3c4] ss:$16 sps:$4 sm:$0xff]  }
 0x213   :  { %2079 = vmatprep.subr.bf16.mxu0 %v7070_v33  ;;  %2305 = vmatprep.subr.bf16.mxu1 %v7073_v59  ;;  %v1074_v16 = vadd.f32 %v8478_v49, %v989_v27  ;;  %v1078_v2 = vadd.f32 %v8478_v49, %v993_v63  ;;  %v1173_v15 = vpack.c.bf16 %v1141_v55, %v1137_v3  ;;  %v7091_v49 = vld [vmem:[#allocation2 + $0x3cc] ss:$16 sps:$4 sm:$0xff]   ;;  %v7089_v20 = vld [vmem:[#allocation2 + $0x3c8] ss:$16 sps:$4 sm:$0xff]   ;;  %v10628_v52 = vld [vmem:[#allocation20_spill] sm:$0xff] }
 0x214   :  { %v8603_v48 = vpack.c.bf16 %v1134_v54, %v1130_v23  ;;  %v1019_v29 = vadd.f32 %v8561_v53, %v934_v38  ;;  %v1023_v33 = vadd.f32 %v8561_v53, %v938_v60  ;;  %v1136_v56 = vmax.f32 %v1072_v42, 0.0  ;;  %v7095_v38 = vld [vmem:[#allocation2 + $0x3e8] ss:$16 sps:$4 sm:$0xff]   ;;  %v10629_v55 = vld [vmem:[#allocation22_spill] sm:$0xff] }
 0x215   :  { %2080 = vmatpush1.bf16.msra.mxu0 %v7068_v57  ;;  %2306 = vmatpush1.bf16.msra.mxu1 %v7071_v44  ;;  %v1138_v40 = vmax.f32 %v1074_v16, 0.0  ;;  %v1142_v59 = vmax.f32 %v1078_v2, 0.0  ;;  %v1140_v22 = vmax.f32 %v1076_v26, 0.0  ;;  %v942_v9 = vmul.f32 %v8569_v10, %v8262_v21 }
 0x216   :  { %2081 = vmatprep.subr.bf16.mxu0 %v7076_v47  ;;  %2307 = vmatprep.subr.bf16.mxu1 %v7079_v41  ;;  %v946_v57 = vmul.f32 %v8569_v10, %v8265_v12  ;;  %v1083_v44 = vmax.f32 %v1019_v29, 0.0  ;;  %v1087_v6 = vmax.f32 %v1023_v33, 0.0  ;;  %v7094_v47 = vld [vmem:[#allocation2 + $0x3e4] ss:$16 sps:$4 sm:$0xff]   ;;  %v7097_v41 = vld [vmem:[#allocation2 + $0x3ec] ss:$16 sps:$4 sm:$0xff]   ;;  %v950_v27 = vmul.f32 %v8569_v10, %v10628_v52 }
 0x217   :  { %v8607_v34 = vpack.c.bf16 %v1142_v59, %v1138_v40  ;;  %v1172_v1 = vpack.c.bf16 %v1140_v22, %v1136_v56  ;;  %v1027_v11 = vadd.f32 %v8561_v53, %v942_v9  ;;  %v7092_v12 = vld [vmem:[#allocation2 + $0x3e0] ss:$16 sps:$4 sm:$0xff]   ;;  %v954_v14 = vmul.f32 %v8569_v10, %v10629_v55 }
 0x218   :  { %2037 = vmatmul.mubr.bf16.gmra.mrb[56].mxu0 %v1168_v45  ;;  %2263 = vmatmul.mubr.bf16.gmra.mrb[56].mxu1 %v1168_v45  ;;  %v1031_v32 = vadd.f32 %v8561_v53, %v946_v57  ;;  %v1147_v21 = vpack.c.bf16 %v1087_v6, %v1083_v44  ;;  %v1035_v23 = vadd.f32 %v8561_v53, %v950_v27 }
 0x219   :  { %2082 = vmatpush1.bf16.msra.mxu0 %v7074_v51  ;;  %2308 = vmatpush1.bf16.msra.mxu1 %v7077_v61  ;;  %v1091_v37 = vmax.f32 %v1027_v11, 0.0  ;;  %v1039_v63 = vadd.f32 %v8561_v53, %v954_v14  ;;  %v958_v42 = vmul.f32 %v8569_v10, %v8276_v50  ;;  %v962_v54 = vmul.f32 %v8569_v10, %v8279_v62 }
 0x21a   :  { %2046 = vmatprep.mubr.bf16.mxu0 %v1173_v15  ;;  %2272 = vmatprep.mubr.bf16.mxu1 %v1173_v15  ;;  %v1095_v3 = vmax.f32 %v1031_v32, 0.0  ;;  %v1099_v51 = vmax.f32 %v1035_v23, 0.0  ;;  %v970_v50 = vmul.f32 %v8569_v10, %v8285_v46  ;;  %v974_v33 = vmul.f32 %v8569_v10, %v8288_v31  ;;  %v10632_v31 = vld [vmem:[#allocation28_spill] sm:$0xff] }
 0x21b   :  { %2083 = vmatprep.subr.bf16.mxu0 %v7082_v7  ;;  %2309 = vmatprep.subr.bf16.mxu1 %v7085_v8  ;;  %v1103_v61 = vmax.f32 %v1039_v63, 0.0  ;;  %v1043_v45 = vadd.f32 %v8561_v53, %v958_v42  ;;  %v1047_v26 = vadd.f32 %v8561_v53, %v962_v54  ;;  %v10630_v7 = vld [vmem:[#allocation24_spill] sm:$0xff]  ;;  %v978_v59 = vmul.f32 %v8569_v10, %v8291_v5 }
 0x21c   :  { %v1151_v60 = vpack.c.bf16 %v1095_v3, %v1091_v37  ;;  %v966_v8 = vmul.f32 %v8569_v10, %v10630_v7  ;;  %v1055_v15 = vadd.f32 %v8561_v53, %v970_v50  ;;  %v986_v22 = vmul.f32 %v8569_v10, %v10632_v31 }
 0x21d   :  { %2084 = vmatpush1.bf16.msra.mxu0 %v7080_v39  ;;  %2310 = vmatpush1.bf16.msra.mxu1 %v7083_v17  ;;  %v1155_v16 = vpack.c.bf16 %v1103_v61, %v1099_v51  ;;  %v1111_v2 = vmax.f32 %v1047_v26, 0.0  ;;  %v1059_v39 = vadd.f32 %v8561_v53, %v974_v33  ;;  %v1063_v17 = vadd.f32 %v8561_v53, %v978_v59  ;;  %v7100_v59 = vld [vmem:[#allocation5 + $0x4] ss:$16 sps:$4 sm:$0xff]  }
 0x21e   :  { %2085 = vmatprep.subr.bf16.mxu0 %v7088_v28  ;;  %2311 = vmatprep.subr.bf16.mxu1 %v7091_v49  ;;  %v1051_v40 = vadd.f32 %v8561_v53, %v966_v8  ;;  %v1119_v29 = vmax.f32 %v1055_v15, 0.0  ;;  %v10631_v49 = vld [vmem:[#allocation26_spill] sm:$0xff]  ;;  %v1071_v57 = vadd.f32 %v8561_v53, %v986_v22 }
 0x21f   :  { %v1127_v28 = vmax.f32 %v1063_v17, 0.0  ;;  %v982_v56 = vmul.f32 %v8569_v10, %v10631_v49  ;;  %v7098_v49 = vld [vmem:[#allocation5] ss:$16 sps:$4 sm:$0xff]  }
 0x220   :  { %2047 = vmatmul.mubr.bf16.gmra.mrb[60].mxu0 %v1172_v1  ;;  %2273 = vmatmul.mubr.bf16.gmra.mrb[60].mxu1 %v1172_v1 }
 0x221   :  { %2086 = vmatpush1.bf16.msra.mxu0 %v7086_v36  ;;  %2312 = vmatpush1.bf16.msra.mxu1 %v7089_v20  ;;  %v1067_v9 = vadd.f32 %v8561_v53, %v982_v56  ;;  %v1135_v36 = vmax.f32 %v1071_v57, 0.0  ;;  %v10634_v20 = vld [vmem:[#allocation30_spill] sm:$0xff]  ;;  %v7101_v56 = vld [vmem:[#allocation5 + $0x8] ss:$16 sps:$4 sm:$0xff]  }
 0x222   :  { %2089 = vmatprep.mubr.bf16.mxu0 %v1147_v21  ;;  %2315 = vmatprep.mubr.bf16.mxu1 %v1147_v21  ;;  %v990_v1 = vmul.f32 %v8569_v10, %v10634_v20  ;;  %v7107_v20 = vld [vmem:[#allocation5 + $0x28] ss:$16 sps:$4 sm:$0xff]  }
 0x223   :  { %2087 = vmatprep.subr.bf16.mxu0 %v7094_v47  ;;  %2313 = vmatprep.subr.bf16.mxu1 %v7097_v41  ;;  %v1131_v6 = vmax.f32 %v1067_v9, 0.0 }
 0x224   :  { %v1075_v11 = vadd.f32 %v8561_v53, %v990_v1 }
 0x225   :  { %2088 = vmatpush1.bf16.msra.mxu0 %v7092_v12  ;;  %2314 = vmatpush1.bf16.msra.mxu1 %v7095_v38  ;;  %v1171_v41 = vpack.c.bf16 %v1135_v36, %v1131_v6  ;;  %v7109_v6 = vld [vmem:[#allocation5 + $0x2c] ss:$16 sps:$4 sm:$0xff]   ;;  %v7104_v36 = vld [vmem:[#allocation5 + $0x20] ss:$16 sps:$4 sm:$0xff]  }
 0x226   :  { %3774 = vmatprep.subr.bf16.mxu0 %v7100_v59  ;;  %v7121_v59 = vld [vmem:[#allocation5 + $0x6c] ss:$16 sps:$4 sm:$0xff]  }
 0x228   :  { %2090 = vmatmul.mubr.bf16.vlgmr.msra.gmra.mrb[32].mxu0 %v8510_v30  ;;  %2316 = vmatmul.mubr.bf16.vlgmr.msra.gmra.mrb[32].mxu1 %v8510_v30  ;;  %v1107_v30 = vmax.f32 %v1043_v45, 0.0 }
 0x229   :  { %2099 = vmatprep.mubr.bf16.mxu0 %v1151_v60  ;;  %2325 = vmatprep.mubr.bf16.mxu1 %v1151_v60 }
 0x22a   :  { %v1159_v62 = vpack.c.bf16 %v1111_v2, %v1107_v30  ;;  %3775 = vmatpush1.bf16.msra.mxu0 %v7098_v49 }
 0x230   :  { %2100 = vmatmul.mubr.bf16.gmra.mrb[36].mxu0 %v8523_v58  ;;  %2326 = vmatmul.mubr.bf16.gmra.mrb[36].mxu1 %v8523_v58  ;;  %v1115_v58 = vmax.f32 %v1051_v40, 0.0 }
 0x231   :  { %2109 = vmatprep.mubr.bf16.mxu0 %v1155_v16  ;;  %2335 = vmatprep.mubr.bf16.mxu1 %v1155_v16 }
 0x232   :  { %v1163_v46 = vpack.c.bf16 %v1119_v29, %v1115_v58 }
 0x238   :  { %2110 = vmatmul.mubr.bf16.gmra.mrb[40].mxu0 %v8540_v25  ;;  %2336 = vmatmul.mubr.bf16.gmra.mrb[40].mxu1 %v8540_v25  ;;  %v1123_v25 = vmax.f32 %v1059_v39, 0.0 }
 0x239   :  { %2119 = vmatprep.mubr.bf16.mxu0 %v1159_v62  ;;  %2345 = vmatprep.mubr.bf16.mxu1 %v1159_v62 }
 0x23a   :  { %v1167_v5 = vpack.c.bf16 %v1127_v28, %v1123_v25 }
 0x240   :  { %2120 = vmatmul.mubr.bf16.gmra.mrb[44].mxu0 %v8556_v43  ;;  %2346 = vmatmul.mubr.bf16.gmra.mrb[44].mxu1 %v8556_v43  ;;  %v10633_v43 = vld [vmem:[#allocation32_spill] sm:$0xff] }
 0x241   :  { %2129 = vmatprep.mubr.bf16.mxu0 %v1163_v46  ;;  %2355 = vmatprep.mubr.bf16.mxu1 %v1163_v46  ;;  %v994_v44 = vmul.f32 %v8569_v10, %v10633_v43  ;;  %v7103_v46 = vld [vmem:[#allocation5 + $0xc] ss:$16 sps:$4 sm:$0xff]  }
 0x242   :  { %4000 = vmatprep.subr.bf16.mxu1 %v7103_v46  ;;  %v7116_v46 = vld [vmem:[#allocation5 + $0x60] ss:$16 sps:$4 sm:$0xff]  }
 0x243   :  { %v1079_v47 = vadd.f32 %v8561_v53, %v994_v44  ;;  %4001 = vmatpush1.bf16.msra.mxu1 %v7101_v56  ;;  %v7106_v44 = vld [vmem:[#allocation5 + $0x24] ss:$16 sps:$4 sm:$0xff]  }
 0x244   :  { %3776 = vmatprep.subr.bf16.mxu0 %v7106_v44  ;;  %4002 = vmatprep.subr.bf16.mxu1 %v7109_v6  ;;  %v7127_v44 = vld [vmem:[#allocation5 + $0x8c] ss:$16 sps:$4 sm:$0xff]  }
 0x245   :  { %v1143_v32 = vmax.f32 %v1079_v47, 0.0  ;;  %3777 = vmatpush1.bf16.msra.mxu0 %v7104_v36 }
 0x247   :  { %4003 = vmatpush1.bf16.msra.mxu1 %v7107_v20 }
 0x248   :  { %2130 = vmatmul.mubr.bf16.gmra.mrb[48].mxu0 %v8577_v13  ;;  %2356 = vmatmul.mubr.bf16.gmra.mrb[48].mxu1 %v8577_v13  ;;  %v1139_v13 = vmax.f32 %v1075_v11, 0.0 }
 0x249   :  { %2139 = vmatprep.mubr.bf16.mxu0 %v1167_v5  ;;  %2365 = vmatprep.mubr.bf16.mxu1 %v1167_v5 }
 0x24a   :  { %v1175_v21 = vpack.c.bf16 %v1143_v32, %v1139_v13 }
 0x250   :  { %2140 = vmatmul.mubr.bf16.gmra.mrb[52].mxu0 %v8590_v35  ;;  %2366 = vmatmul.mubr.bf16.gmra.mrb[52].mxu1 %v8590_v35 }
 0x251   :  { %2149 = vmatprep.mubr.bf16.mxu0 %v1171_v41  ;;  %2375 = vmatprep.mubr.bf16.mxu1 %v1171_v41 }
 0x258   :  { %2150 = vmatmul.mubr.bf16.gmra.mrb[56].mxu0 %v8603_v48  ;;  %2376 = vmatmul.mubr.bf16.gmra.mrb[56].mxu1 %v8603_v48 }
 0x259   :  { %2159 = vmatprep.mubr.bf16.mxu0 %v1175_v21  ;;  %2385 = vmatprep.mubr.bf16.mxu1 %v1175_v21  ;;  %v7112_v21 = vld [vmem:[#allocation5 + $0x44] ss:$16 sps:$4 sm:$0xff]  }
 0x25a   :  { %3778 = vmatprep.subr.bf16.mxu0 %v7112_v21 }
 0x260   :  { %2160 = vmatmul.mubr.bf16.gmra.mrb[60].mxu0 %v8607_v34  ;;  %2386 = vmatmul.mubr.bf16.gmra.mrb[60].mxu1 %v8607_v34 }
 0x2fb   :  { %v8667_v53 = vpop.f32.mrb[32].mxu0  ;;  %v8669_v10 = vpop.f32.mrb[32].mxu1 }
 0x2fc   :  { %v8671_v35 = vpop.f32.mrb[33].mxu0  ;;  %v8673_v12 = vpop.f32.mrb[33].mxu1 }
 0x2fd   :  { %10635 = vst [vmem:[#allocation15_spill] sm:$0xff] %v8673_v12  ;;  %v8675_v38 = vpop.f32.mrb[34].mxu0  ;;  %v8677_v37 = vpop.f32.mrb[34].mxu1 }
 0x2fe   :  { %v2398_v48 = vadd.f32 %v8675_v38, %v8667_v53  ;;  %v2440_v3 = vadd.f32 %v8677_v37, %v8669_v10  ;;  %v8683_v52 = vpop.f32.mrb[35].mxu0  ;;  %v8685_v34 = vpop.f32.mrb[35].mxu1 }
 0x2ff   :  { %10636 = vst [vmem:[#allocation16_spill] sm:$0xff] %v8685_v34  ;;  %v2419_v27 = vadd.f32 %v8683_v52, %v8671_v35  ;;  %v2461_v55 = vadd.f32 %v8685_v34, %v8673_v12  ;;  %v7169_v12 = vld [vmem:[#allocation5 + $0x16c] ss:$16 sps:$4 sm:$0xff]  }
 0x303   :  { %v8691_v14 = vpop.f32.mrb[36].mxu0  ;;  %v8693_v60 = vpop.f32.mrb[36].mxu1 }
 0x304   :  { %v2399_v23 = vadd.f32 %v2398_v48, %v8691_v14  ;;  %v2441_v63 = vadd.f32 %v2440_v3, %v8693_v60  ;;  %v8697_v51 = vpop.f32.mrb[37].mxu0  ;;  %v8699_v61 = vpop.f32.mrb[37].mxu1  ;;  %v7115_v48 = vld [vmem:[#allocation5 + $0x4c] ss:$16 sps:$4 sm:$0xff]  }
 0x305   :  { %10637 = vst [vmem:[#allocation17_spill] sm:$0xff] %v8699_v61  ;;  %v2420_v42 = vadd.f32 %v2419_v27, %v8697_v51  ;;  %v2462_v54 = vadd.f32 %v2461_v55, %v8699_v61  ;;  %v8703_v16 = vpop.f32.mrb[38].mxu0  ;;  %v8705_v45 = vpop.f32.mrb[38].mxu1  ;;  %4004 = vmatprep.subr.bf16.mxu1 %v7115_v48 }
 0x306   :  { %v2400_v26 = vadd.f32 %v2399_v23, %v8703_v16  ;;  %v2442_v30 = vadd.f32 %v2441_v63, %v8705_v45  ;;  %v8709_v2 = vpop.f32.mrb[39].mxu0  ;;  %v8711_v7 = vpop.f32.mrb[39].mxu1  ;;  %v7110_v63 = vld [vmem:[#allocation5 + $0x40] ss:$16 sps:$4 sm:$0xff]  }
 0x307   :  { %10638 = vst [vmem:[#allocation19_spill] sm:$0xff] %v8711_v7  ;;  %v2421_v8 = vadd.f32 %v2420_v42, %v8709_v2  ;;  %v2463_v50 = vadd.f32 %v2462_v54, %v8711_v7  ;;  %v7113_v42 = vld [vmem:[#allocation5 + $0x48] ss:$16 sps:$4 sm:$0xff]   ;;  %3779 = vmatpush1.bf16.msra.mxu0 %v7110_v63 }
 0x308   :  { %4005 = vmatpush1.bf16.msra.mxu1 %v7113_v42  ;;  %v7125_v63 = vld [vmem:[#allocation5 + $0x88] ss:$16 sps:$4 sm:$0xff]  }
 0x309   :  { %4006 = vmatprep.subr.bf16.mxu1 %v7121_v59  ;;  %v7161_v7 = vld [vmem:[#allocation5 + $0x148] ss:$16 sps:$4 sm:$0xff]  }
 0x30b   :  { %v8715_v62 = vpop.f32.mrb[40].mxu0  ;;  %v8717_v40 = vpop.f32.mrb[40].mxu1 }
 0x30c   :  { %v2401_v15 = vadd.f32 %v2400_v26, %v8715_v62  ;;  %v2443_v58 = vadd.f32 %v2442_v30, %v8717_v40  ;;  %v8721_v29 = vpop.f32.mrb[41].mxu0  ;;  %v8723_v33 = vpop.f32.mrb[41].mxu1 }
 0x30d   :  { %10639 = vst [vmem:[#allocation21_spill] sm:$0xff] %v8723_v33  ;;  %v2422_v39 = vadd.f32 %v2421_v8, %v8721_v29  ;;  %v2464_v17 = vadd.f32 %v2463_v50, %v8723_v33  ;;  %v8727_v25 = vpop.f32.mrb[42].mxu0  ;;  %v8729_v28 = vpop.f32.mrb[42].mxu1 }
 0x30e   :  { %v2402_v31 = vadd.f32 %v2401_v15, %v8727_v25  ;;  %v2444_v22 = vadd.f32 %v2443_v58, %v8729_v28  ;;  %v8733_v5 = vpop.f32.mrb[43].mxu0  ;;  %v8735_v9 = vpop.f32.mrb[43].mxu1  ;;  %v7118_v58 = vld [vmem:[#allocation5 + $0x64] ss:$16 sps:$4 sm:$0xff]  }
 0x30f   :  { %10640 = vst [vmem:[#allocation23_spill] sm:$0xff] %v8733_v5  ;;  %10641 = vst [vmem:[#allocation25_spill] sm:$0xff] %v8735_v9  ;;  %v2423_v57 = vadd.f32 %v2422_v39, %v8733_v5  ;;  %v2465_v43 = vadd.f32 %v2464_v17, %v8735_v9  ;;  %v7119_v39 = vld [vmem:[#allocation5 + $0x68] ss:$16 sps:$4 sm:$0xff]   ;;  %3780 = vmatprep.subr.bf16.mxu0 %v7118_v58 }
 0x310   :  { %3781 = vmatpush1.bf16.msra.mxu0 %v7116_v46  ;;  %4007 = vmatpush1.bf16.msra.mxu1 %v7119_v39  ;;  %v7131_v58 = vld [vmem:[#allocation5 + $0xa8] ss:$16 sps:$4 sm:$0xff]  }
 0x311   :  { %4008 = vmatprep.subr.bf16.mxu1 %v7127_v44  ;;  %v7136_v44 = vld [vmem:[#allocation5 + $0xc4] ss:$16 sps:$4 sm:$0xff]   ;;  %v7155_v9 = vld [vmem:[#allocation5 + $0x128] ss:$16 sps:$4 sm:$0xff]  }
 0x313   :  { %v8739_v1 = vpop.f32.mrb[44].mxu0  ;;  %v8741_v47 = vpop.f32.mrb[44].mxu1 }
 0x314   :  { %v2403_v41 = vadd.f32 %v2402_v31, %v8739_v1  ;;  %v2445_v11 = vadd.f32 %v2444_v22, %v8741_v47  ;;  %v8745_v13 = vpop.f32.mrb[45].mxu0  ;;  %v8747_v32 = vpop.f32.mrb[45].mxu1  ;;  %4009 = vmatpush1.bf16.msra.mxu1 %v7125_v63 }
 0x315   :  { %10642 = vst [vmem:[#allocation27_spill] sm:$0xff] %v8745_v13  ;;  %10643 = vst [vmem:[#allocation29_spill] sm:$0xff] %v8747_v32  ;;  %v2424_v3 = vadd.f32 %v2423_v57, %v8745_v13  ;;  %v2466_v27 = vadd.f32 %v2465_v43, %v8747_v32  ;;  %v8751_v55 = vpop.f32.mrb[46].mxu0  ;;  %v8753_v23 = vpop.f32.mrb[46].mxu1  ;;  %v7124_v43 = vld [vmem:[#allocation5 + $0x84] ss:$16 sps:$4 sm:$0xff]  }
 0x316   :  { %v2404_v54 = vadd.f32 %v2403_v41, %v8751_v55  ;;  %v2446_v26 = vadd.f32 %v2445_v11, %v8753_v23  ;;  %v8757_v30 = vpop.f32.mrb[47].mxu0  ;;  %v8759_v8 = vpop.f32.mrb[47].mxu1  ;;  %v7122_v11 = vld [vmem:[#allocation5 + $0x80] ss:$16 sps:$4 sm:$0xff]   ;;  %3782 = vmatprep.subr.bf16.mxu0 %v7124_v43 }
 0x317   :  { %10644 = vst [vmem:[#allocation31_spill] sm:$0xff] %v8757_v30  ;;  %10645 = vst [vmem:[#allocation33_spill] sm:$0xff] %v8759_v8  ;;  %v2425_v50 = vadd.f32 %v2424_v3, %v8757_v30  ;;  %v2467_v15 = vadd.f32 %v2466_v27, %v8759_v8  ;;  %3783 = vmatpush1.bf16.msra.mxu0 %v7122_v11  ;;  %v7152_v32 = vld [vmem:[#allocation5 + $0x120] ss:$16 sps:$4 sm:$0xff]  }
 0x31b   :  { %v8763_v17 = vpop.f32.mrb[48].mxu0  ;;  %v8765_v49 = vpop.f32.mrb[48].mxu1 }
 0x31c   :  { %v2405_v56 = vadd.f32 %v2404_v54, %v8763_v17  ;;  %v2447_v31 = vadd.f32 %v2446_v26, %v8765_v49  ;;  %v8769_v22 = vpop.f32.mrb[49].mxu0  ;;  %v8771_v57 = vpop.f32.mrb[49].mxu1  ;;  %v7130_v26 = vld [vmem:[#allocation5 + $0xa4] ss:$16 sps:$4 sm:$0xff]  }
 0x31d   :  { %10646 = vst [vmem:[#allocation35_spill] sm:$0xff] %v8769_v22  ;;  %10647 = vst [vmem:[#allocation37_spill] sm:$0xff] %v8771_v57  ;;  %v2426_v6 = vadd.f32 %v2425_v50, %v8769_v22  ;;  %v2468_v36 = vadd.f32 %v2467_v15, %v8771_v57  ;;  %v8775_v20 = vpop.f32.mrb[50].mxu0  ;;  %v8777_v41 = vpop.f32.mrb[50].mxu1  ;;  %v7133_v50 = vld [vmem:[#allocation5 + $0xac] ss:$16 sps:$4 sm:$0xff]   ;;  %3784 = vmatprep.subr.bf16.mxu0 %v7130_v26 }
 0x31e   :  { %v2406_v21 = vadd.f32 %v2405_v56, %v8775_v20  ;;  %v2448_v48 = vadd.f32 %v2447_v31, %v8777_v41  ;;  %v8781_v3 = vpop.f32.mrb[51].mxu0  ;;  %v8783_v27 = vpop.f32.mrb[51].mxu1  ;;  %v7128_v15 = vld [vmem:[#allocation5 + $0xa0] ss:$16 sps:$4 sm:$0xff]   ;;  %4010 = vmatprep.subr.bf16.mxu1 %v7133_v50 }
 0x31f   :  { %10648 = vst [vmem:[#allocation38_spill] sm:$0xff] %v8781_v3  ;;  %10649 = vst [vmem:[#allocation39_spill] sm:$0xff] %v8783_v27  ;;  %v2427_v42 = vadd.f32 %v2426_v6, %v8781_v3  ;;  %v2469_v54 = vadd.f32 %v2468_v36, %v8783_v27  ;;  %3785 = vmatpush1.bf16.msra.mxu0 %v7128_v15  ;;  %4011 = vmatpush1.bf16.msra.mxu1 %v7131_v58  ;;  %v7139_v6 = vld [vmem:[#allocation5 + $0xcc] ss:$16 sps:$4 sm:$0xff]   ;;  %v7134_v50 = vld [vmem:[#allocation5 + $0xc0] ss:$16 sps:$4 sm:$0xff]  }
 0x320   :  { %v7137_v15 = vld [vmem:[#allocation5 + $0xc8] ss:$16 sps:$4 sm:$0xff]   ;;  %3786 = vmatprep.subr.bf16.mxu0 %v7136_v44  ;;  %4012 = vmatprep.subr.bf16.mxu1 %v7139_v6  ;;  %v7142_v58 = vld [vmem:[#allocation5 + $0xe4] ss:$16 sps:$4 sm:$0xff]  }
 0x321   :  { %v7149_v27 = vld [vmem:[#allocation5 + $0x108] ss:$16 sps:$4 sm:$0xff]  }
 0x323   :  { %v8787_v59 = vpop.f32.mrb[52].mxu0  ;;  %v8789_v46 = vpop.f32.mrb[52].mxu1  ;;  %3787 = vmatpush1.bf16.msra.mxu0 %v7134_v50  ;;  %4013 = vmatpush1.bf16.msra.mxu1 %v7137_v15  ;;  %v7148_v50 = vld [vmem:[#allocation5 + $0x104] ss:$16 sps:$4 sm:$0xff]   ;;  %v7151_v15 = vld [vmem:[#allocation5 + $0x10c] ss:$16 sps:$4 sm:$0xff]  }
 0x324   :  { %v2407_v39 = vadd.f32 %v2406_v21, %v8787_v59  ;;  %v2449_v56 = vadd.f32 %v2448_v48, %v8789_v46  ;;  %v8793_v31 = vpop.f32.mrb[53].mxu0  ;;  %v8795_v43 = vpop.f32.mrb[53].mxu1  ;;  %3788 = vmatprep.subr.bf16.mxu0 %v7142_v58  ;;  %4014 = vmatprep.subr.bf16.mxu1 %v7145_v24 }
 0x325   :  { %10650 = vst [vmem:[#allocation40_spill] sm:$0xff] %v8793_v31  ;;  %10651 = vst [vmem:[#allocation45_spill] sm:$0xff] %v8795_v43  ;;  %v2428_v36 = vadd.f32 %v2427_v42, %v8793_v31  ;;  %v2470_v11 = vadd.f32 %v2469_v54, %v8795_v43  ;;  %v8799_v63 = vpop.f32.mrb[54].mxu0  ;;  %v8801_v26 = vpop.f32.mrb[54].mxu1  ;;  %v7175_v31 = vld [vmem:[#allocation5 + $0x18c] ss:$16 sps:$4 sm:$0xff]  }
 0x326   :  { %v2408_v21 = vadd.f32 %v2407_v39, %v8799_v63  ;;  %v2450_v48 = vadd.f32 %v2449_v56, %v8801_v26  ;;  %v8805_v19 = vpop.f32.mrb[55].mxu0  ;;  %v8807_v0 = vpop.f32.mrb[55].mxu1 }
 0x327   :  { %10652 = vst [vmem:[#allocation46_spill] sm:$0xff] %v8805_v19  ;;  %10653 = vst [vmem:[#allocation47_spill] sm:$0xff] %v8807_v0  ;;  %v2429_v42 = vadd.f32 %v2428_v36, %v8805_v19  ;;  %v2471_v54 = vadd.f32 %v2470_v11, %v8807_v0  ;;  %3789 = vmatpush1.bf16.msra.mxu0 %v7140_v4  ;;  %4015 = vmatpush1.bf16.msra.mxu1 %v7143_v18  ;;  %v7146_v4 = vld [vmem:[#allocation5 + $0x100] ss:$16 sps:$4 sm:$0xff]  }
 0x328   :  { %3790 = vmatprep.subr.bf16.mxu0 %v7148_v50  ;;  %4016 = vmatprep.subr.bf16.mxu1 %v7151_v15 }
 0x32b   :  { %v8811_v39 = vpop.f32.mrb[56].mxu0  ;;  %v8813_v56 = vpop.f32.mrb[56].mxu1  ;;  %3791 = vmatpush1.bf16.msra.mxu0 %v7146_v4  ;;  %4017 = vmatpush1.bf16.msra.mxu1 %v7149_v27  ;;  %v7160_v27 = vld [vmem:[#allocation5 + $0x144] ss:$16 sps:$4 sm:$0xff]   ;;  %v7163_v4 = vld [vmem:[#allocation5 + $0x14c] ss:$16 sps:$4 sm:$0xff]  }
 0x32c   :  { %v2409_v44 = vadd.f32 %v2408_v21, %v8811_v39  ;;  %v2451_v6 = vadd.f32 %v2450_v48, %v8813_v56  ;;  %v8817_v36 = vpop.f32.mrb[57].mxu0  ;;  %v8819_v11 = vpop.f32.mrb[57].mxu1 }
 0x32d   :  { %10654 = vst [vmem:[#allocation48_spill] sm:$0xff] %v8817_v36  ;;  %10655 = vst [vmem:[#allocation41_spill] sm:$0xff] %v8819_v11  ;;  %v2430_v0 = vadd.f32 %v2429_v42, %v8817_v36  ;;  %v2472_v24 = vadd.f32 %v2471_v54, %v8819_v11  ;;  %v8823_v58 = vpop.f32.mrb[58].mxu0  ;;  %v8825_v43 = vpop.f32.mrb[58].mxu1  ;;  %v7154_v54 = vld [vmem:[#allocation5 + $0x124] ss:$16 sps:$4 sm:$0xff]  }
 0x32e   :  { %v2410_v21 = vadd.f32 %v2409_v44, %v8823_v58  ;;  %v2452_v48 = vadd.f32 %v2451_v6, %v8825_v43  ;;  %v8829_v57 = vpop.f32.mrb[59].mxu0  ;;  %v8831_v8 = vpop.f32.mrb[59].mxu1  ;;  %v7157_v11 = vld [vmem:[#allocation5 + $0x12c] ss:$16 sps:$4 sm:$0xff]   ;;  %3792 = vmatprep.subr.bf16.mxu0 %v7154_v54 }
 0x32f   :  { %10656 = vst [vmem:[#allocation42_spill] sm:$0xff] %v8829_v57  ;;  %10657 = vst [vmem:[#allocation49_spill] sm:$0xff] %v8831_v8  ;;  %v2431_v18 = vadd.f32 %v2430_v0, %v8829_v57  ;;  %v2473_v42 = vadd.f32 %v2472_v24, %v8831_v8  ;;  %4018 = vmatprep.subr.bf16.mxu1 %v7157_v11  ;;  %3793 = vmatpush1.bf16.msra.mxu0 %v7152_v32  ;;  %v7158_v32 = vld [vmem:[#allocation5 + $0x140] ss:$16 sps:$4 sm:$0xff]  }
 0x330   :  { %4019 = vmatpush1.bf16.msra.mxu1 %v7155_v9  ;;  %3794 = vmatprep.subr.bf16.mxu0 %v7160_v27  ;;  %v7166_v9 = vld [vmem:[#allocation5 + $0x164] ss:$16 sps:$4 sm:$0xff]  }
 0x331   :  { %4020 = vmatprep.subr.bf16.mxu1 %v7163_v4 }
 0x333   :  { %v8835_v44 = vpop.f32.mrb[60].mxu0  ;;  %v8837_v6 = vpop.f32.mrb[60].mxu1  ;;  %3795 = vmatpush1.bf16.msra.mxu0 %v7158_v32  ;;  %v7173_v32 = vld [vmem:[#allocation5 + $0x188] ss:$16 sps:$4 sm:$0xff]  }
 0x334   :  { %v2411_v50 = vadd.f32 %v2410_v21, %v8835_v44  ;;  %v2453_v15 = vadd.f32 %v2452_v48, %v8837_v6  ;;  %v8841_v0 = vpop.f32.mrb[61].mxu0  ;;  %v8843_v24 = vpop.f32.mrb[61].mxu1  ;;  %4021 = vmatpush1.bf16.msra.mxu1 %v7161_v7  ;;  %3796 = vmatprep.subr.bf16.mxu0 %v7166_v9  ;;  %v7181_v9 = vld [vmem:[#allocation5 + $0x1ac] ss:$16 sps:$4 sm:$0xff]  }
 0x335   :  { %10658 = vst [vmem:[#allocation50_spill] sm:$0xff] %v8841_v0  ;;  %10659 = vst [vmem:[#allocation51_spill] sm:$0xff] %v8843_v24  ;;  %v2432_v8 = vadd.f32 %v2431_v18, %v8841_v0  ;;  %v2474_v11 = vadd.f32 %v2473_v42, %v8843_v24  ;;  %v8847_v54 = vpop.f32.mrb[62].mxu0  ;;  %v8849_v33 = vpop.f32.mrb[62].mxu1  ;;  %v7164_v24 = vld [vmem:[#allocation5 + $0x160] ss:$16 sps:$4 sm:$0xff]   ;;  %4022 = vmatprep.subr.bf16.mxu1 %v7169_v12 }
 0x336   :  { %v2412_v21 = vadd.f32 %v2411_v50, %v8847_v54  ;;  %v2454_v48 = vadd.f32 %v2453_v15, %v8849_v33  ;;  %v8853_v61 = vpop.f32.mrb[63].mxu0  ;;  %v8855_v34 = vpop.f32.mrb[63].mxu1  ;;  %v7167_v50 = vld [vmem:[#allocation5 + $0x168] ss:$16 sps:$4 sm:$0xff]   ;;  %v7172_v15 = vld [vmem:[#allocation5 + $0x184] ss:$16 sps:$4 sm:$0xff]  }
 0x337   :  { %10660 = vst [vmem:[#allocation52_spill] sm:$0xff] %v8853_v61  ;;  %10661 = vst [vmem:[#allocation43_spill] sm:$0xff] %v8855_v34  ;;  %v2433_v18 = vadd.f32 %v2432_v8, %v8853_v61  ;;  %v2475_v42 = vadd.f32 %v2474_v11, %v8855_v34  ;;  %3797 = vmatpush1.bf16.msra.mxu0 %v7164_v24  ;;  %v7170_v8 = vld [vmem:[#allocation5 + $0x180] ss:$16 sps:$4 sm:$0xff]   ;;  %v7178_v34 = vld [vmem:[#allocation5 + $0x1a4] ss:$16 sps:$4 sm:$0xff]  }
 0x338   :  { %v2413_v0 = vrot.slane %v2412_v21, 4  ;;  %v2455_v57 = vrot.slane %v2454_v48, 4  ;;  %4023 = vmatpush1.bf16.msra.mxu1 %v7167_v50  ;;  %3798 = vmatprep.subr.bf16.mxu0 %v7172_v15  ;;  %v7176_v12 = vld [vmem:[#allocation5 + $0x1a0] ss:$16 sps:$4 sm:$0xff]  }
 0x339   :  { %v2434_v36 = vrot.slane %v2433_v18, 4  ;;  %v2476_v19 = vrot.slane %v2475_v42, 4  ;;  %4024 = vmatprep.subr.bf16.mxu1 %v7175_v31  ;;  %v7182_v50 = vld [vmem:[#allocation5 + $0x1c0] ss:$16 sps:$4 sm:$0xff]  }
 0x33a   :  { %v2414_v27 = vadd.f32 %v2413_v0, %v2412_v21  ;;  %v2456_v4 = vadd.f32 %v2455_v57, %v2454_v48  ;;  %v7179_v57 = vld [vmem:[#allocation5 + $0x1a8] ss:$16 sps:$4 sm:$0xff]   ;;  %v7187_v48 = vld [vmem:[#allocation5 + $0x1cc] ss:$16 sps:$4 sm:$0xff]  }
 0x33b   :  { %v2435_v3 = vadd.f32 %v2434_v36, %v2433_v18  ;;  %v2477_v7 = vadd.f32 %v2476_v19, %v2475_v42  ;;  %3799 = vmatpush1.bf16.msra.mxu0 %v7170_v8  ;;  %v7184_v36 = vld [vmem:[#allocation5 + $0x1c4] ss:$16 sps:$4 sm:$0xff]  }
 0x33c   :  { %v2415_v61 = vrot.slane %v2414_v27, 2  ;;  %v2457_v11 = vrot.slane %v2456_v4, 2  ;;  %4025 = vmatpush1.bf16.msra.mxu1 %v7173_v32  ;;  %3800 = vmatprep.subr.bf16.mxu0 %v7178_v34  ;;  %v7190_v34 = vld [vmem:[#allocation5 + $0x1e4] ss:$16 sps:$4 sm:$0xff]  }
 0x33d   :  { %v2436_v22 = vrot.slane %v2435_v3, 2  ;;  %v2478_v21 = vrot.slane %v2477_v7, 2  ;;  %4026 = vmatprep.subr.bf16.mxu1 %v7181_v9 }
 0x33e   :  { %v2416_v30 = vadd.f32 %v2415_v61, %v2414_v27  ;;  %v2458_v13 = vadd.f32 %v2457_v11, %v2456_v4  ;;  %v7185_v61 = vld [vmem:[#allocation5 + $0x1c8] ss:$16 sps:$4 sm:$0xff]  }
 0x33f   :  { %v2437_v24 = vadd.f32 %v2436_v22, %v2435_v3  ;;  %3801 = vmatpush1.bf16.msra.mxu0 %v7176_v12  ;;  %v8859_v15 = vadd.f32 %v2478_v21, %v2477_v7  ;;  %v7193_v3 = vld [vmem:[#allocation5 + $0x1ec] ss:$16 sps:$4 sm:$0xff]  }
 0x340   :  { %v2417_v5 = vrot.slane %v2416_v30, 1  ;;  %v2459_v0 = vrot.slane %v2458_v13, 1  ;;  %4027 = vmatpush1.bf16.msra.mxu1 %v7179_v57  ;;  %3802 = vmatprep.subr.bf16.mxu0 %v7184_v36 }
 0x341   :  { %v2438_v42 = vrot.slane %v2437_v24, 1  ;;  %4028 = vmatprep.subr.bf16.mxu1 %v7187_v48  ;;  %v2480_v9 = vrot.slane %v8859_v15, 1 }
 0x342   :  { %v2418_v18 = vadd.f32 %v2417_v5, %v2416_v30  ;;  %v2460_v31 = vadd.f32 %v2459_v0, %v2458_v13 }
 0x343   :  { %3803 = vmatpush1.bf16.msra.mxu0 %v7182_v50 }
 0x344   :  { %v2482_v19 = vmul.f32 0.0078125, %v2418_v18  ;;  %4029 = vmatpush1.bf16.msra.mxu1 %v7185_v61  ;;  %3804 = vmatprep.subr.bf16.mxu0 %v7190_v34  ;;  %v2484_v7 = vmul.f32 0.0078125, %v2460_v31 }
 0x345   :  { %4030 = vmatprep.subr.bf16.mxu1 %v7193_v3 }
 0x346   :  { %v8862_v27 = vsub.f32 %v8667_v53, %v2482_v19  ;;  %v8865_v22 = vsub.f32 %v8675_v38, %v2482_v19  ;;  %v8868_v5 = vsub.f32 %v8691_v14, %v2482_v19  ;;  %v8871_v30 = vsub.f32 %v8703_v16, %v2482_v19  ;;  %v7188_v38 = vld [vmem:[#allocation5 + $0x1e0] ss:$16 sps:$4 sm:$0xff]  }
 0x347   :  { %v8874_v13 = vsub.f32 %v8715_v62, %v2482_v19  ;;  %v8877_v4 = vsub.f32 %v8727_v25, %v2482_v19  ;;  %v8880_v8 = vsub.f32 %v8739_v1, %v2482_v19  ;;  %v8883_v53 = vsub.f32 %v8751_v55, %v2482_v19  ;;  %v7191_v1 = vld [vmem:[#allocation5 + $0x1e8] ss:$16 sps:$4 sm:$0xff]   ;;  %3805 = vmatpush1.bf16.msra.mxu0 %v7188_v38 }
 0x348   :  { %v8886_v14 = vsub.f32 %v8763_v17, %v2482_v19  ;;  %v8889_v16 = vsub.f32 %v8775_v20, %v2482_v19  ;;  %v8892_v62 = vsub.f32 %v8787_v59, %v2482_v19  ;;  %v8895_v25 = vsub.f32 %v8799_v63, %v2482_v19  ;;  %v7196_v59 = vld [vmem:[#allocation5 + $0x204] ss:$16 sps:$4 sm:$0xff]   ;;  %4031 = vmatpush1.bf16.msra.mxu1 %v7191_v1 }
 0x349   :  { %10662 = vst [vmem:[#allocation53_spill] sm:$0xff] %v8883_v53  ;;  %v8898_v11 = vsub.f32 %v8811_v39, %v2482_v19  ;;  %v8901_v55 = vsub.f32 %v8823_v58, %v2482_v19  ;;  %v8904_v17 = vsub.f32 %v8835_v44, %v2482_v19  ;;  %v8907_v20 = vsub.f32 %v8847_v54, %v2482_v19  ;;  %v7199_v39 = vld [vmem:[#allocation5 + $0x20c] ss:$16 sps:$4 sm:$0xff]  }
 0x34a   :  { %10663 = vst [vmem:[#allocation44_spill] sm:$0xff] %v8886_v14  ;;  %10664 = vst [vmem:[#allocation54_spill] sm:$0xff] %v8889_v16  ;;  %v2550_v63 = vmul.f32 %v8862_v27, %v8862_v27  ;;  %v2554_v32 = vmul.f32 %v8865_v22, %v8865_v22  ;;  %v2558_v58 = vmul.f32 %v8868_v5, %v8868_v5  ;;  %3887 = vmatprep.subr.bf16.mxu0 %v7196_v59 }
 0x34b   :  { %10665 = vst [vmem:[#allocation55_spill] sm:$0xff] %v8892_v62  ;;  %10666 = vst [vmem:[#allocation18_spill] sm:$0xff] %v8895_v25  ;;  %v2562_v44 = vmul.f32 %v8871_v30, %v8871_v30  ;;  %v2439_v54 = vadd.f32 %v2438_v42, %v2437_v24  ;;  %v8919_v57 = vsub.f32 %v8669_v10, %v2484_v7  ;;  %4113 = vmatprep.subr.bf16.mxu1 %v7199_v39 }
 0x34c   :  { %10667 = vst [vmem:[#allocation20_spill] sm:$0xff] %v8898_v11  ;;  %10668 = vst [vmem:[#allocation22_spill] sm:$0xff] %v8901_v55  ;;  %v2614_v12 = vadd.f32 %v2554_v32, %v2550_v63  ;;  %v8922_v36 = vsub.f32 %v8677_v37, %v2484_v7  ;;  %v8925_v0 = vsub.f32 %v8693_v60, %v2484_v7 }
 0x34d   :  { %10669 = vst [vmem:[#allocation24_spill] sm:$0xff] %v8919_v57  ;;  %v8928_v21 = vsub.f32 %v8705_v45, %v2484_v7  ;;  %v8931_v48 = vsub.f32 %v8717_v40, %v2484_v7  ;;  %v8934_v24 = vsub.f32 %v8729_v28, %v2484_v7  ;;  %v8937_v18 = vsub.f32 %v8741_v47, %v2484_v7 }
 0x34e   :  { %10670 = vst [vmem:[#allocation26_spill] sm:$0xff] %v8922_v36  ;;  %10671 = vst [vmem:[#allocation28_spill] sm:$0xff] %v8925_v0  ;;  %v2615_v10 = vadd.f32 %v2614_v12, %v2558_v58  ;;  %v8940_v37 = vsub.f32 %v8753_v23, %v2484_v7  ;;  %v8943_v60 = vsub.f32 %v8765_v49, %v2484_v7  ;;  %v10681_v12 = vld [vmem:[#allocation27_spill] sm:$0xff] }
 0x34f   :  { %10672 = vst [vmem:[#allocation32_spill] sm:$0xff] %v8928_v21  ;;  %10673 = vst [vmem:[#allocation30_spill] sm:$0xff] %v8931_v48  ;;  %v8946_v50 = vsub.f32 %v8777_v41, %v2484_v7  ;;  %v8949_v45 = vsub.f32 %v8789_v46, %v2484_v7  ;;  %v8952_v40 = vsub.f32 %v8801_v26, %v2484_v7 }
 0x350   :  { %10674 = vst [vmem:[#allocation56_spill] sm:$0xff] %v8934_v24  ;;  %10675 = vst [vmem:[#allocation57_spill] sm:$0xff] %v8937_v18  ;;  %v8955_v28 = vsub.f32 %v8813_v56, %v2484_v7  ;;  %v8958_v47 = vsub.f32 %v8825_v43, %v2484_v7  ;;  %v2566_v23 = vmul.f32 %v8874_v13, %v8874_v13  ;;  %v2483_v56 = vmul.f32 0.0078125, %v2439_v54  ;;  %v10680_v54 = vld [vmem:[#allocation23_spill] sm:$0xff] }
 0x351   :  { %10676 = vst [vmem:[#allocation58_spill] sm:$0xff] %v8940_v37  ;;  %10677 = vst [vmem:[#allocation59_spill] sm:$0xff] %v8943_v60  ;;  %v2616_v49 = vadd.f32 %v2615_v10, %v2562_v44  ;;  %v8963_v19 = vsub.f32 %v8837_v6, %v2484_v7  ;;  %v8966_v41 = vsub.f32 %v8849_v33, %v2484_v7  ;;  %v10682_v10 = vld [vmem:[#allocation31_spill] sm:$0xff] }
 0x352   :  { %10678 = vst [vmem:[#allocation60_spill] sm:$0xff] %v8946_v50  ;;  %10679 = vst [vmem:[#allocation61_spill] sm:$0xff] %v8949_v45  ;;  %v2552_v46 = vmul.f32 %v8919_v57, %v8919_v57  ;;  %v2556_v26 = vmul.f32 %v8922_v36, %v8922_v36  ;;  %v2570_v43 = vmul.f32 %v8877_v4, %v8877_v4 }
 0x353   :  { %v2617_v61 = vadd.f32 %v2616_v49, %v2566_v23  ;;  %v2574_v31 = vmul.f32 %v8880_v8, %v8880_v8  ;;  %v2578_v6 = vmul.f32 %v8883_v53, %v8883_v53  ;;  %v2481_v33 = vadd.f32 %v2480_v9, %v8859_v15  ;;  %v10683_v49 = vld [vmem:[#allocation35_spill] sm:$0xff] }
 0x354   :  { %v2582_v42 = vmul.f32 %v8886_v14, %v8886_v14  ;;  %v2560_v3 = vmul.f32 %v8925_v0, %v8925_v0  ;;  %v2564_v38 = vmul.f32 %v8928_v21, %v8928_v21  ;;  %v2568_v1 = vmul.f32 %v8931_v48, %v8931_v48  ;;  %v10702_v21 = vld [vmem:[#allocation37_spill] sm:$0xff]  ;;  %v10704_v0 = vld [vmem:[#allocation39_spill] sm:$0xff] }
 0x355   :  { %v2618_v34 = vadd.f32 %v2617_v61, %v2570_v43  ;;  %v2656_v59 = vadd.f32 %v2556_v26, %v2552_v46  ;;  %v8988_v63 = vsub.f32 %v8671_v35, %v2483_v56  ;;  %v8991_v32 = vsub.f32 %v8683_v52, %v2483_v56  ;;  %v10684_v46 = vld [vmem:[#allocation38_spill] sm:$0xff]  ;;  %v10685_v26 = vld [vmem:[#allocation40_spill] sm:$0xff]  ;;  %v10707_v14 = vld [vmem:[#allocation41_spill] sm:$0xff] }
 0x356   :  { %v8994_v7 = vsub.f32 %v8697_v51, %v2483_v56  ;;  %v8997_v39 = vsub.f32 %v8709_v2, %v2483_v56  ;;  %v9000_v58 = vsub.f32 %v8721_v29, %v2483_v56  ;;  %v9003_v9 = vsub.f32 %v10680_v54, %v2483_v56  ;;  %v10686_v61 = vld [vmem:[#allocation46_spill] sm:$0xff] }
 0x357   :  { %v2619_v15 = vadd.f32 %v2618_v34, %v2574_v31  ;;  %v2657_v44 = vadd.f32 %v2656_v59, %v2560_v3  ;;  %v9006_v35 = vsub.f32 %v10681_v12, %v2483_v56  ;;  %v9009_v52 = vsub.f32 %v10682_v10, %v2483_v56  ;;  %v10687_v34 = vld [vmem:[#allocation48_spill] sm:$0xff]  ;;  %v10688_v59 = vld [vmem:[#allocation42_spill] sm:$0xff] }
 0x358   :  { %v9012_v51 = vsub.f32 %v10683_v49, %v2483_v56  ;;  %v9015_v2 = vsub.f32 %v10684_v46, %v2483_v56  ;;  %v9018_v29 = vsub.f32 %v10685_v26, %v2483_v56  ;;  %v9021_v31 = vsub.f32 %v10686_v61, %v2483_v56  ;;  %v10689_v12 = vld [vmem:[#allocation50_spill] sm:$0xff]  ;;  %v10690_v49 = vld [vmem:[#allocation52_spill] sm:$0xff] }
 0x359   :  { %v2620_v23 = vadd.f32 %v2619_v15, %v2578_v6  ;;  %v2658_v43 = vadd.f32 %v2657_v44, %v2564_v38  ;;  %v9024_v3 = vsub.f32 %v10687_v34, %v2483_v56  ;;  %v9027_v54 = vsub.f32 %v10688_v59, %v2483_v56 }
 0x35a   :  { %v2586_v6 = vmul.f32 %v8889_v16, %v8889_v16  ;;  %v9032_v10 = vsub.f32 %v10689_v12, %v2483_v56  ;;  %v9035_v46 = vsub.f32 %v10690_v49, %v2483_v56  ;;  %v2572_v38 = vmul.f32 %v8934_v24, %v8934_v24  ;;  %v10705_v16 = vld [vmem:[#allocation45_spill] sm:$0xff] }
 0x35b   :  { %v2621_v15 = vadd.f32 %v2620_v23, %v2582_v42  ;;  %v2659_v44 = vadd.f32 %v2658_v43, %v2568_v1  ;;  %v2485_v26 = vmul.f32 0.0078125, %v2481_v33  ;;  %v2590_v61 = vmul.f32 %v8892_v62, %v8892_v62 }
 0x35c   :  { %v2551_v59 = vmul.f32 %v8988_v63, %v8988_v63  ;;  %v2555_v42 = vmul.f32 %v8991_v32, %v8991_v32  ;;  %v2594_v23 = vmul.f32 %v8895_v25, %v8895_v25  ;;  %v2598_v56 = vmul.f32 %v8898_v11, %v8898_v11 }
 0x35d   :  { %v2622_v34 = vadd.f32 %v2621_v15, %v2586_v6  ;;  %v2576_v1 = vmul.f32 %v8937_v18, %v8937_v18  ;;  %v2660_v33 = vadd.f32 %v2659_v44, %v2572_v38  ;;  %v2580_v6 = vmul.f32 %v8940_v37, %v8940_v37  ;;  %v10692_v18 = vld [vmem:[#allocation16_spill] sm:$0xff] }
 0x35e   :  { %v2584_v15 = vmul.f32 %v8943_v60, %v8943_v60  ;;  %v2588_v12 = vmul.f32 %v8946_v50, %v8946_v50  ;;  %v2592_v49 = vmul.f32 %v8949_v45, %v8949_v45  ;;  %v2559_v11 = vmul.f32 %v8994_v7, %v8994_v7  ;;  %v10694_v50 = vld [vmem:[#allocation17_spill] sm:$0xff]  ;;  %v10695_v45 = vld [vmem:[#allocation19_spill] sm:$0xff] }
 0x35f   :  { %v2623_v43 = vadd.f32 %v2622_v34, %v2590_v61  ;;  %v2661_v24 = vadd.f32 %v2660_v33, %v2576_v1  ;;  %v2563_v38 = vmul.f32 %v8997_v39, %v8997_v39  ;;  %v2635_v61 = vadd.f32 %v2555_v42, %v2551_v59  ;;  %v10691_v34 = vld [vmem:[#allocation15_spill] sm:$0xff]  ;;  %v10696_v33 = vld [vmem:[#allocation21_spill] sm:$0xff] }
 0x360   :  { %v9064_v37 = vsub.f32 %v10691_v34, %v2485_v26  ;;  %v9067_v60 = vsub.f32 %v10692_v18, %v2485_v26  ;;  %v9070_v25 = vsub.f32 %v10694_v50, %v2485_v26  ;;  %v9073_v1 = vsub.f32 %v10695_v45, %v2485_v26  ;;  %v10698_v42 = vld [vmem:[#allocation25_spill] sm:$0xff] }
 0x361   :  { %v2624_v44 = vadd.f32 %v2623_v43, %v2594_v23  ;;  %v2662_v48 = vadd.f32 %v2661_v24, %v2580_v6  ;;  %v9076_v62 = vsub.f32 %v10696_v33, %v2485_v26  ;;  %v2567_v23 = vmul.f32 %v9000_v58, %v9000_v58  ;;  %v10700_v34 = vld [vmem:[#allocation29_spill] sm:$0xff] }
 0x362   :  { %10693 = vst [vmem:[#allocation23_spill] sm:$0xff] %v9067_v60  ;;  %v2636_v59 = vadd.f32 %v2635_v61, %v2559_v11  ;;  %v9081_v43 = vsub.f32 %v10698_v42, %v2485_v26  ;;  %v9084_v18 = vsub.f32 %v10700_v34, %v2485_v26  ;;  %v10701_v6 = vld [vmem:[#allocation33_spill] sm:$0xff]  ;;  %v9090_v45 = vsub.f32 %v10702_v21, %v2485_v26  ;;  %v10706_v61 = vld [vmem:[#allocation47_spill] sm:$0xff] }
 0x363   :  { %10697 = vst [vmem:[#allocation27_spill] sm:$0xff] %v9076_v62  ;;  %v2663_v24 = vadd.f32 %v2662_v48, %v2584_v15  ;;  %v9087_v50 = vsub.f32 %v10701_v6, %v2485_v26  ;;  %v9093_v33 = vsub.f32 %v10704_v0, %v2485_v26  ;;  %v2625_v36 = vadd.f32 %v2624_v44, %v2598_v56  ;;  %v10709_v15 = vld [vmem:[#allocation49_spill] sm:$0xff]  ;;  %v10711_v21 = vld [vmem:[#allocation51_spill] sm:$0xff] }
 0x364   :  { %10699 = vst [vmem:[#allocation31_spill] sm:$0xff] %v9081_v43  ;;  %10703 = vst [vmem:[#allocation35_spill] sm:$0xff] %v9090_v45  ;;  %v2637_v57 = vadd.f32 %v2636_v59, %v2563_v38  ;;  %v9096_v11 = vsub.f32 %v10705_v16, %v2485_v26  ;;  %v9099_v42 = vsub.f32 %v10706_v61, %v2485_v26  ;;  %v10713_v38 = vld [vmem:[#allocation43_spill] sm:$0xff] }
 0x365   :  { %v2664_v34 = vadd.f32 %v2663_v24, %v2588_v12  ;;  %v9102_v48 = vsub.f32 %v10707_v14, %v2485_v26  ;;  %v9105_v6 = vsub.f32 %v10709_v15, %v2485_v26  ;;  %v9108_v53 = vsub.f32 %v10711_v21, %v2485_v26 }
 0x366   :  { %v2602_v0 = vmul.f32 %v8901_v55, %v8901_v55  ;;  %v2571_v16 = vmul.f32 %v9003_v9, %v9003_v9  ;;  %v2638_v56 = vadd.f32 %v2637_v57, %v2567_v23  ;;  %v9115_v44 = vsub.f32 %v10713_v38, %v2485_v26 }
 0x367   :  { %10708 = vst [vmem:[#allocation38_spill] sm:$0xff] %v9102_v48  ;;  %10710 = vst [vmem:[#allocation40_spill] sm:$0xff] %v9105_v6  ;;  %v2596_v14 = vmul.f32 %v8952_v40, %v8952_v40  ;;  %v2665_v12 = vadd.f32 %v2664_v34, %v2592_v49  ;;  %v2575_v24 = vmul.f32 %v9006_v35, %v9006_v35 }
 0x368   :  { %10712 = vst [vmem:[#allocation46_spill] sm:$0xff] %v9108_v53  ;;  %10714 = vst [vmem:[#allocation48_spill] sm:$0xff] %v9115_v44  ;;  %v2626_v59 = vadd.f32 %v2625_v36, %v2602_v0  ;;  %v2639_v61 = vadd.f32 %v2638_v56, %v2571_v16  ;;  %v2600_v15 = vmul.f32 %v8955_v28, %v8955_v28 }
 0x369   :  { %v2666_v21 = vadd.f32 %v2665_v12, %v2596_v14  ;;  %v2553_v55 = vmul.f32 %v9064_v37, %v9064_v37  ;;  %v2557_v57 = vmul.f32 %v9067_v60, %v9067_v60  ;;  %v2606_v26 = vmul.f32 %v8904_v17, %v8904_v17 }
 0x36a   :  { %v2579_v36 = vmul.f32 %v9009_v52, %v9009_v52  ;;  %v2640_v49 = vadd.f32 %v2639_v61, %v2575_v24  ;;  %v2604_v23 = vmul.f32 %v8958_v47, %v8958_v47  ;;  %v2583_v16 = vmul.f32 %v9012_v51, %v9012_v51 }
 0x36b   :  { %v2667_v34 = vadd.f32 %v2666_v21, %v2600_v15  ;;  %v2627_v0 = vadd.f32 %v2626_v59, %v2606_v26  ;;  %v2561_v14 = vmul.f32 %v9070_v25, %v9070_v25  ;;  %v2677_v12 = vadd.f32 %v2557_v57, %v2553_v55 }
 0x36c   :  { %v2641_v56 = vadd.f32 %v2640_v49, %v2579_v36  ;;  %v2610_v60 = vmul.f32 %v8907_v20, %v8907_v20  ;;  %v2587_v24 = vmul.f32 %v9015_v2, %v9015_v2  ;;  %v2608_v15 = vmul.f32 %v8963_v19, %v8963_v19 }
 0x36d   :  { %v2668_v38 = vadd.f32 %v2667_v34, %v2604_v23  ;;  %v2565_v59 = vmul.f32 %v9073_v1, %v9073_v1  ;;  %v2678_v21 = vadd.f32 %v2677_v12, %v2561_v14  ;;  %v2591_v36 = vmul.f32 %v9018_v29, %v9018_v29 }
 0x36e   :  { %v2642_v61 = vadd.f32 %v2641_v56, %v2583_v16  ;;  %v2628_v26 = vadd.f32 %v2627_v0, %v2610_v60  ;;  %v2569_v57 = vmul.f32 %v9076_v62, %v9076_v62  ;;  %v2595_v34 = vmul.f32 %v9021_v31, %v9021_v31 }
 0x36f   :  { %v2669_v55 = vadd.f32 %v2668_v38, %v2608_v15  ;;  %v2679_v23 = vadd.f32 %v2678_v21, %v2565_v59  ;;  %v2612_v56 = vmul.f32 %v8966_v41, %v8966_v41  ;;  %v2573_v14 = vmul.f32 %v9081_v43, %v9081_v43 }
 0x370   :  { %v2643_v49 = vadd.f32 %v2642_v61, %v2587_v24  ;;  %v2629_v0 = vrot.slane %v2628_v26, 4  ;;  %v2599_v12 = vmul.f32 %v9024_v3, %v9024_v3  ;;  %v2577_v61 = vmul.f32 %v9084_v18, %v9084_v18 }
 0x371   :  { %v2680_v60 = vadd.f32 %v2679_v23, %v2569_v57  ;;  %v2670_v24 = vadd.f32 %v2669_v55, %v2612_v56  ;;  %v2603_v59 = vmul.f32 %v9027_v54, %v9027_v54  ;;  %v2607_v57 = vmul.f32 %v9032_v10, %v9032_v10 }
 0x372   :  { %v2644_v16 = vadd.f32 %v2643_v49, %v2591_v36  ;;  %v2581_v36 = vmul.f32 %v9087_v50, %v9087_v50  ;;  %v2630_v43 = vadd.f32 %v2629_v0, %v2628_v26  ;;  %v2585_v55 = vmul.f32 %v9090_v45, %v9090_v45 }
 0x373   :  { %v2681_v15 = vadd.f32 %v2680_v60, %v2573_v14  ;;  %v2671_v62 = vrot.slane %v2670_v24, 4  ;;  %v2589_v14 = vmul.f32 %v9093_v33, %v9093_v33  ;;  %v2593_v0 = vmul.f32 %v9096_v11, %v9096_v11 }
 0x374   :  { %v2645_v38 = vadd.f32 %v2644_v16, %v2595_v34  ;;  %v2611_v16 = vmul.f32 %v9035_v46, %v9035_v46 }
 0x375   :  { %v2682_v49 = vadd.f32 %v2681_v15, %v2577_v61  ;;  %v2672_v26 = vadd.f32 %v2671_v62, %v2670_v24  ;;  %v2605_v62 = vmul.f32 %v9105_v6, %v9105_v6 }
 0x376   :  { %v2646_v21 = vadd.f32 %v2645_v38, %v2599_v12  ;;  %v2631_v12 = vrot.slane %v2630_v43, 2 }
 0x377   :  { %v2683_v34 = vadd.f32 %v2682_v49, %v2581_v36  ;;  %v2673_v45 = vrot.slane %v2672_v26, 2 }
 0x378   :  { %v2647_v23 = vadd.f32 %v2646_v21, %v2603_v59  ;;  %v2597_v59 = vmul.f32 %v9099_v42, %v9099_v42  ;;  %v2632_v36 = vadd.f32 %v2631_v12, %v2630_v43  ;;  %v2613_v43 = vmul.f32 %v9115_v44, %v9115_v44 }
 0x379   :  { %v2684_v60 = vadd.f32 %v2683_v34, %v2585_v55 }
 0x37a   :  { %v2648_v56 = vadd.f32 %v2647_v23, %v2607_v57  ;;  %v2601_v57 = vmul.f32 %v9102_v48, %v9102_v48  ;;  %v2633_v34 = vrot.slane %v2632_v36, 1 }
 0x37b   :  { %v2685_v61 = vadd.f32 %v2684_v60, %v2589_v14  ;;  %v2609_v14 = vmul.f32 %v9108_v53, %v9108_v53 }
 0x37c   :  { %v2649_v38 = vadd.f32 %v2648_v56, %v2611_v16  ;;  %v2674_v56 = vadd.f32 %v2673_v45, %v2672_v26 }
 0x37d   :  { %v2686_v21 = vadd.f32 %v2685_v61, %v2593_v0 }
 0x37e   :  { %v2650_v15 = vrot.slane %v2649_v38, 4  ;;  %v2675_v61 = vrot.slane %v2674_v56, 1 }
 0x37f   :  { %v2687_v23 = vadd.f32 %v2686_v21, %v2597_v59 }
 0x380   :  { %v2651_v49 = vadd.f32 %v2650_v15, %v2649_v38  ;;  %v2634_v38 = vadd.f32 %v2633_v34, %v2632_v36  ;;  %v2676_v6 = vadd.f32 %v2675_v61, %v2674_v56  ;;  %v2396_v61 = vld [vmem:[%s10347_s7] sm:$0xf] }
 0x381   :  { %v2688_v24 = vadd.f32 %v2687_v23, %v2601_v57 }
 0x382   :  { %v2652_v55 = vrot.slane %v2651_v49, 2  ;;  %v2698_v48 = vmul.f32 0.0078125, %v2634_v38  ;;  %v2700_v26 = vmul.f32 0.0078125, %v2676_v6 }
 0x383   :  { %v2689_v60 = vadd.f32 %v2688_v24, %v2605_v62 }
 0x384   :  { %v2653_v16 = vadd.f32 %v2652_v55, %v2651_v49  ;;  %v2702_v45 = vadd.f32 1e-05, %v2698_v48  ;;  %v2704_v24 = vadd.f32 1e-05, %v2700_v26 }
 0x385   :  { %v2690_v12 = vadd.f32 %v2689_v60, %v2609_v14 }
 0x386   :  { %v2654_v0 = vrot.slane %v2653_v16, 1  ;;  %7490 = vrsqrt.f32 %v2702_v45 }
 0x387   :  { %v2691_v59 = vadd.f32 %v2690_v12, %v2613_v43  ;;  %v10715_v43 = vld [vmem:[#allocation34_spill] sm:$0xff] }
 0x388   :  { %v2655_v15 = vadd.f32 %v2654_v0, %v2653_v16 }
 0x389   :  { %v2692_v21 = vrot.slane %v2691_v59, 4 }
 0x38a   :  { %v2699_v57 = vmul.f32 0.0078125, %v2655_v15 }
 0x38b   :  { %v2693_v23 = vadd.f32 %v2692_v21, %v2691_v59  ;;  %v10716_v59 = vld [vmem:[#allocation36_spill] sm:$0xff] }
 0x38c   :  { %v2703_v55 = vadd.f32 1e-05, %v2699_v57  ;;  %v10717_v57 = vld [vmem:[#allocation12_spill] sm:$0xff] }
 0x38d   :  { %v2694_v49 = vrot.slane %v2693_v23, 2 }
 0x38e   :  { %7492 = vrsqrt.f32 %v2703_v55 }
 0x38f   :  { %v2695_v53 = vadd.f32 %v2694_v49, %v2693_v23  ;;  %7494 = vrsqrt.f32 %v2704_v24 }
 0x390   :  { %v7491_v34 = vpop.eup %7490 }
 0x391   :  { %v2696_v62 = vrot.slane %v2695_v53, 1 }
 0x393   :  { %v2697_v44 = vadd.f32 %v2696_v62, %v2695_v53 }
 0x395   :  { %v2701_v14 = vmul.f32 0.0078125, %v2697_v44  ;;  %v9192_v44 = vld [vmem:[%s10348_s8] sm:$0xf] }
 0x396   :  { %v9198_v21 = vrot.slane %v9192_v44, %v10716_v59  ;;  %v9202_v23 = vrot.slane %v9192_v44, %v10717_v57 }
 0x397   :  { %v2705_v36 = vadd.f32 1e-05, %v2701_v14 }
 0x398   :  { %v7493_v16 = vpop.eup %7492 }
 0x399   :  { %7496 = vrsqrt.f32 %v2705_v36  ;;  %v2714_v60 = vcombine.low %v7491_v34, %v7493_v16  ;;  %v7495_v56 = vpop.eup %7494 }
 0x39b   :  { %v2722_v12 = vrot.slane %v2714_v60, %v10715_v43 }
 0x3a3   :  { %v7497_v0 = vpop.eup %7496 }
 0x3a4   :  { %v2715_v48 = vcombine.low %v7495_v56, %v7497_v0 }
 0x3a6   :  { %v2729_v6 = vrot.slane %v2715_v48, %v10715_v43 }
 0x3a8   :  { %v2730_v38 = vcombine.low %v2722_v12, %v2729_v6 }
 0x3aa   :  { %v2737_v53 = vrot.slane %v2730_v38, %v10715_v43  ;;  %v7335_v43 = vld [vmem:[#allocation7 + $0xe8] ss:$16 sps:$4 sm:$0xff]  }
 0x3ac   :  { %v9194_v15 = vmul.f32 %v2737_v53, %v2396_v61  ;;  %v7194_v61 = vld [vmem:[#allocation5 + $0x200] ss:$16 sps:$4 sm:$0xff]   ;;  %v7197_v53 = vld [vmem:[#allocation5 + $0x208] ss:$16 sps:$4 sm:$0xff]  }
 0x3ae   :  { %v9206_v49 = vrot.slane %v9194_v15, %v10716_v59  ;;  %v9210_v45 = vrot.slane %v9194_v15, %v10717_v57  ;;  %v7337_v57 = vld [vmem:[#allocation7 + $0xec] ss:$16 sps:$4 sm:$0xff]   ;;  %v7332_v59 = vld [vmem:[#allocation7 + $0xe0] ss:$16 sps:$4 sm:$0xff]  }
 0x3b0   :  { %v2762_v26 = vmul.f32 %v9210_v45, %v8988_v63  ;;  %v2766_v55 = vmul.f32 %v9210_v45, %v8991_v32  ;;  %v2761_v62 = vmul.f32 %v9206_v49, %v8862_v27  ;;  %v2765_v24 = vmul.f32 %v9206_v49, %v8865_v22 }
 0x3b1   :  { %v2770_v14 = vmul.f32 %v9210_v45, %v8994_v7  ;;  %v2774_v36 = vmul.f32 %v9210_v45, %v8997_v39  ;;  %v2769_v32 = vmul.f32 %v9206_v49, %v8868_v5  ;;  %v2773_v7 = vmul.f32 %v9206_v49, %v8871_v30 }
 0x3b2   :  { %v2847_v34 = vadd.f32 %v9202_v23, %v2762_v26  ;;  %v2851_v16 = vadd.f32 %v9202_v23, %v2766_v55  ;;  %v2846_v63 = vadd.f32 %v9198_v21, %v2761_v62  ;;  %v2850_v27 = vadd.f32 %v9198_v21, %v2765_v24  ;;  %v7202_v24 = vld [vmem:[#allocation5 + $0x224] ss:$16 sps:$4 sm:$0xff]  }
 0x3b3   :  { %v2855_v60 = vadd.f32 %v9202_v23, %v2770_v14  ;;  %v2859_v22 = vadd.f32 %v9202_v23, %v2774_v36  ;;  %v2778_v5 = vmul.f32 %v9210_v45, %v9000_v58  ;;  %v2782_v26 = vmul.f32 %v9210_v45, %v9003_v9  ;;  %v7205_v14 = vld [vmem:[#allocation5 + $0x22c] ss:$16 sps:$4 sm:$0xff]   ;;  %v7200_v58 = vld [vmem:[#allocation5 + $0x220] ss:$16 sps:$4 sm:$0xff]   ;;  %v7203_v9 = vld [vmem:[#allocation5 + $0x228] ss:$16 sps:$4 sm:$0xff]  }
 0x3b4   :  { %v2911_v56 = vmax.f32 %v2847_v34, 0.0  ;;  %v2915_v39 = vmax.f32 %v2851_v16, 0.0  ;;  %v2910_v0 = vmax.f32 %v2846_v63, 0.0  ;;  %v2914_v12 = vmax.f32 %v2850_v27, 0.0  ;;  %v7208_v63 = vld [vmem:[#allocation5 + $0x244] ss:$16 sps:$4 sm:$0xff]  }
 0x3b5   :  { %v2919_v48 = vmax.f32 %v2855_v60, 0.0  ;;  %v2923_v6 = vmax.f32 %v2859_v22, 0.0  ;;  %v2854_v62 = vadd.f32 %v9198_v21, %v2769_v32  ;;  %v2858_v30 = vadd.f32 %v9198_v21, %v2773_v7  ;;  %v7211_v32 = vld [vmem:[#allocation5 + $0x24c] ss:$16 sps:$4 sm:$0xff]  }
 0x3b6   :  { %v2975_v38 = vpack.c.bf16 %v2915_v39, %v2911_v56  ;;  %v2974_v55 = vpack.c.bf16 %v2914_v12, %v2910_v0  ;;  %v2863_v34 = vadd.f32 %v9202_v23, %v2778_v5  ;;  %v2867_v16 = vadd.f32 %v9202_v23, %v2782_v26  ;;  %v7212_v26 = vld [vmem:[#allocation5 + $0x260] ss:$16 sps:$4 sm:$0xff]  }
 0x3b7   :  { %v2979_v36 = vpack.c.bf16 %v2923_v6, %v2919_v48  ;;  %v2918_v27 = vmax.f32 %v2854_v62, 0.0  ;;  %v2922_v60 = vmax.f32 %v2858_v30, 0.0  ;;  %v2777_v22 = vmul.f32 %v9206_v49, %v8874_v13  ;;  %v7206_v48 = vld [vmem:[#allocation5 + $0x240] ss:$16 sps:$4 sm:$0xff]   ;;  %v7209_v6 = vld [vmem:[#allocation5 + $0x248] ss:$16 sps:$4 sm:$0xff]  }
 0x3b8   :  { %3806 = vmatprep.mubr.bf16.mxu0 %v2975_v38  ;;  %4032 = vmatprep.mubr.bf16.mxu1 %v2975_v38  ;;  %v2781_v7 = vmul.f32 %v9206_v49, %v8877_v4  ;;  %v2927_v56 = vmax.f32 %v2863_v34, 0.0  ;;  %v2931_v39 = vmax.f32 %v2867_v16, 0.0  ;;  %v2786_v0 = vmul.f32 %v9210_v45, %v9006_v35  ;;  %v7220_v62 = vld [vmem:[#allocation5 + $0x284] ss:$16 sps:$4 sm:$0xff]   ;;  %v7223_v30 = vld [vmem:[#allocation5 + $0x28c] ss:$16 sps:$4 sm:$0xff]  }
 0x3b9   :  { %3807 = vmatmul.mubr.bf16.vlgmr.msra.gmra.mrb[64].mxu0 %v2974_v55  ;;  %4033 = vmatmul.mubr.bf16.vlgmr.msra.gmra.mrb[64].mxu1 %v2974_v55  ;;  %v2790_v12 = vmul.f32 %v9210_v45, %v9009_v52  ;;  %v2978_v13 = vpack.c.bf16 %v2922_v60, %v2918_v27  ;;  %v2862_v38 = vadd.f32 %v9198_v21, %v2777_v22  ;;  %v7215_v55 = vld [vmem:[#allocation5 + $0x268] ss:$16 sps:$4 sm:$0xff]   ;;  %v7218_v27 = vld [vmem:[#allocation5 + $0x280] ss:$16 sps:$4 sm:$0xff]  }
 0x3ba   :  { %3888 = vmatpush1.bf16.msra.mxu0 %v7194_v61  ;;  %4114 = vmatpush1.bf16.msra.mxu1 %v7197_v53  ;;  %v2866_v4 = vadd.f32 %v9198_v21, %v2781_v7  ;;  %v7214_v61 = vld [vmem:[#allocation5 + $0x264] ss:$16 sps:$4 sm:$0xff]   ;;  %v7217_v53 = vld [vmem:[#allocation5 + $0x26c] ss:$16 sps:$4 sm:$0xff]   ;;  %v2983_v5 = vpack.c.bf16 %v2931_v39, %v2927_v56  ;;  %v2871_v35 = vadd.f32 %v9202_v23, %v2786_v0  ;;  %v7221_v60 = vld [vmem:[#allocation5 + $0x288] ss:$16 sps:$4 sm:$0xff]  }
 0x3bb   :  { %3816 = vmatprep.mubr.bf16.mxu0 %v2979_v36  ;;  %4042 = vmatprep.mubr.bf16.mxu1 %v2979_v36  ;;  %v2875_v52 = vadd.f32 %v9202_v23, %v2790_v12  ;;  %v2785_v36 = vmul.f32 %v9206_v49, %v8880_v8  ;;  %v10718_v34 = vld [vmem:[#allocation53_spill] sm:$0xff]  ;;  %v7226_v0 = vld [vmem:[#allocation5 + $0x2a4] ss:$16 sps:$4 sm:$0xff]  }
 0x3bc   :  { %3889 = vmatprep.subr.bf16.mxu0 %v7202_v24  ;;  %4115 = vmatprep.subr.bf16.mxu1 %v7205_v14  ;;  %v2926_v24 = vmax.f32 %v2862_v38, 0.0  ;;  %v2930_v14 = vmax.f32 %v2866_v4, 0.0  ;;  %v2789_v16 = vmul.f32 %v9206_v49, %v10718_v34  ;;  %v10719_v56 = vld [vmem:[#allocation13_spill] sm:$0xff]  ;;  %v10720_v4 = vld [vmem:[#allocation44_spill] sm:$0xff]  ;;  %v2806_v34 = vmul.f32 %v9210_v45, %v9021_v31 }
 0x3bd   :  { %v2870_v22 = vadd.f32 %v9198_v21, %v2785_v36  ;;  %v9266_v39 = vrot.slane %v9194_v15, %v10719_v56  ;;  %v7227_v38 = vld [vmem:[#allocation5 + $0x2a8] ss:$16 sps:$4 sm:$0xff]   ;;  %v7241_v31 = vld [vmem:[#allocation5 + $0x2ec] ss:$16 sps:$4 sm:$0xff]  }
 0x3be   :  { %3890 = vmatpush1.bf16.msra.mxu0 %v7200_v58  ;;  %4116 = vmatpush1.bf16.msra.mxu1 %v7203_v9  ;;  %v2935_v58 = vmax.f32 %v2871_v35, 0.0  ;;  %v2939_v9 = vmax.f32 %v2875_v52, 0.0  ;;  %v2982_v8 = vpack.c.bf16 %v2930_v14, %v2926_v24  ;;  %v2874_v7 = vadd.f32 %v9198_v21, %v2789_v16  ;;  %v10723_v16 = vld [vmem:[#allocation26_spill] sm:$0xff] }
 0x3bf   :  { %3891 = vmatprep.subr.bf16.mxu0 %v7208_v63  ;;  %4117 = vmatprep.subr.bf16.mxu1 %v7211_v32  ;;  %v2794_v63 = vmul.f32 %v9210_v45, %v9012_v51  ;;  %v2798_v32 = vmul.f32 %v9210_v45, %v9015_v2  ;;  %v7229_v51 = vld [vmem:[#allocation5 + $0x2ac] ss:$16 sps:$4 sm:$0xff]   ;;  %v2934_v35 = vmax.f32 %v2870_v22, 0.0  ;;  %v7238_v22 = vld [vmem:[#allocation5 + $0x2e4] ss:$16 sps:$4 sm:$0xff]  }
 0x3c0   :  { %v2987_v2 = vpack.c.bf16 %v2939_v9, %v2935_v58  ;;  %v2938_v52 = vmax.f32 %v2874_v7, 0.0  ;;  %v2767_v58 = vmul.f32 %v9266_v39, %v10723_v16  ;;  %v7230_v9 = vld [vmem:[#allocation5 + $0x2c0] ss:$16 sps:$4 sm:$0xff]  }
 0x3c1   :  { %3817 = vmatmul.mubr.bf16.gmra.mrb[68].mxu0 %v2978_v13  ;;  %4043 = vmatmul.mubr.bf16.gmra.mrb[68].mxu1 %v2978_v13  ;;  %v2879_v12 = vadd.f32 %v9202_v23, %v2794_v63  ;;  %v7224_v13 = vld [vmem:[#allocation5 + $0x2a0] ss:$16 sps:$4 sm:$0xff]   ;;  %v7233_v63 = vld [vmem:[#allocation5 + $0x2c8] ss:$16 sps:$4 sm:$0xff]  }
 0x3c2   :  { %3892 = vmatpush1.bf16.msra.mxu0 %v7206_v48  ;;  %4118 = vmatpush1.bf16.msra.mxu1 %v7209_v6  ;;  %v2883_v48 = vadd.f32 %v9202_v23, %v2798_v32  ;;  %v9272_v6 = vrot.slane %v9192_v44, %v10719_v56 }
 0x3c3   :  { %3826 = vmatprep.mubr.bf16.mxu0 %v2983_v5  ;;  %4052 = vmatprep.mubr.bf16.mxu1 %v2983_v5  ;;  %v7235_v5 = vld [vmem:[#allocation5 + $0x2cc] ss:$16 sps:$4 sm:$0xff]   ;;  %v2943_v14 = vmax.f32 %v2879_v12, 0.0  ;;  %v10725_v12 = vld [vmem:[#allocation32_spill] sm:$0xff] }
 0x3c4   :  { %3893 = vmatprep.subr.bf16.mxu0 %v7214_v61  ;;  %4119 = vmatprep.subr.bf16.mxu1 %v7217_v53  ;;  %v2793_v61 = vmul.f32 %v9206_v49, %v10720_v4  ;;  %v7232_v53 = vld [vmem:[#allocation5 + $0x2c4] ss:$16 sps:$4 sm:$0xff]   ;;  %v2947_v36 = vmax.f32 %v2883_v48, 0.0  ;;  %v2775_v48 = vmul.f32 %v9266_v39, %v10725_v12  ;;  %v10726_v4 = vld [vmem:[#allocation55_spill] sm:$0xff] }
 0x3c6   :  { %3894 = vmatpush1.bf16.msra.mxu0 %v7212_v26  ;;  %4120 = vmatpush1.bf16.msra.mxu1 %v7215_v55  ;;  %v10721_v26 = vld [vmem:[#allocation54_spill] sm:$0xff]  ;;  %v2878_v32 = vadd.f32 %v9198_v21, %v2793_v61  ;;  %v2801_v61 = vmul.f32 %v9206_v49, %v10726_v4 }
 0x3c7   :  { %3895 = vmatprep.subr.bf16.mxu0 %v7220_v62  ;;  %4121 = vmatprep.subr.bf16.mxu1 %v7223_v30  ;;  %v2797_v55 = vmul.f32 %v9206_v49, %v10721_v26  ;;  %v2802_v62 = vmul.f32 %v9210_v45, %v9018_v29  ;;  %v10722_v30 = vld [vmem:[#allocation24_spill] sm:$0xff]  ;;  %v2986_v29 = vpack.c.bf16 %v2938_v52, %v2934_v35  ;;  %v7239_v35 = vld [vmem:[#allocation5 + $0x2e8] ss:$16 sps:$4 sm:$0xff]   ;;  %v10727_v26 = vld [vmem:[#allocation18_spill] sm:$0xff] }
 0x3c8   :  { %v2763_v24 = vmul.f32 %v9266_v39, %v10722_v30  ;;  %v2942_v52 = vmax.f32 %v2878_v32, 0.0  ;;  %v2860_v30 = vadd.f32 %v9272_v6, %v2775_v48  ;;  %v10731_v4 = vld [vmem:[#allocation58_spill] sm:$0xff] }
 0x3c9   :  { %3827 = vmatmul.mubr.bf16.gmra.mrb[72].mxu0 %v2982_v8  ;;  %4053 = vmatmul.mubr.bf16.gmra.mrb[72].mxu1 %v2982_v8  ;;  %v2852_v8 = vadd.f32 %v9272_v6, %v2767_v58  ;;  %v2887_v7 = vadd.f32 %v9202_v23, %v2802_v62  ;;  %v10728_v58 = vld [vmem:[#allocation30_spill] sm:$0xff] }
 0x3ca   :  { %3896 = vmatpush1.bf16.msra.mxu0 %v7218_v27  ;;  %4122 = vmatpush1.bf16.msra.mxu1 %v7221_v60  ;;  %v2848_v27 = vadd.f32 %v9272_v6, %v2763_v24  ;;  %v2882_v60 = vadd.f32 %v9198_v21, %v2797_v55  ;;  %v2805_v55 = vmul.f32 %v9206_v49, %v10727_v26  ;;  %v7244_v24 = vld [vmem:[#allocation5 + $0x304] ss:$16 sps:$4 sm:$0xff]  }
 0x3cb   :  { %3836 = vmatprep.mubr.bf16.mxu0 %v2987_v2  ;;  %4062 = vmatprep.mubr.bf16.mxu1 %v2987_v2 }
 0x3cc   :  { %3897 = vmatprep.subr.bf16.mxu0 %v7226_v0  ;;  %4123 = vmatprep.subr.bf16.mxu1 %v7229_v51  ;;  %v2912_v0 = vmax.f32 %v2848_v27, 0.0  ;;  %v10724_v51 = vld [vmem:[#allocation28_spill] sm:$0xff]  ;;  %v2924_v27 = vmax.f32 %v2860_v30, 0.0 }
 0x3cd   :  { %v2771_v2 = vmul.f32 %v9266_v39, %v10724_v51  ;;  %v2951_v51 = vmax.f32 %v2887_v7, 0.0 }
 0x3ce   :  { %3898 = vmatpush1.bf16.msra.mxu0 %v7224_v13  ;;  %4124 = vmatpush1.bf16.msra.mxu1 %v7227_v38  ;;  %v2991_v13 = vpack.c.bf16 %v2947_v36, %v2943_v14  ;;  %v2891_v38 = vadd.f32 %v9202_v23, %v2806_v34  ;;  %v7247_v14 = vld [vmem:[#allocation5 + $0x30c] ss:$16 sps:$4 sm:$0xff]   ;;  %v2946_v36 = vmax.f32 %v2882_v60, 0.0  ;;  %v2810_v34 = vmul.f32 %v9210_v45, %v9024_v3 }
 0x3cf   :  { %3899 = vmatprep.subr.bf16.mxu0 %v7232_v53  ;;  %4125 = vmatprep.subr.bf16.mxu1 %v7235_v5  ;;  %v2916_v53 = vmax.f32 %v2852_v8, 0.0  ;;  %v7236_v5 = vld [vmem:[#allocation5 + $0x2e0] ss:$16 sps:$4 sm:$0xff]   ;;  %v2856_v62 = vadd.f32 %v9272_v6, %v2771_v2  ;;  %v9313_v2 = vadd.f32 %v9198_v21, %v2801_v61  ;;  %v2791_v61 = vmul.f32 %v9266_v39, %v10731_v4 }
 0x3d0   :  { %v2955_v60 = vmax.f32 %v2891_v38, 0.0  ;;  %v2990_v48 = vpack.c.bf16 %v2946_v36, %v2942_v52  ;;  %v7248_v36 = vld [vmem:[#allocation5 + $0x320] ss:$16 sps:$4 sm:$0xff]  }
 0x3d1   :  { %3837 = vmatmul.mubr.bf16.gmra.mrb[76].mxu0 %v2986_v29  ;;  %4063 = vmatmul.mubr.bf16.gmra.mrb[76].mxu1 %v2986_v29  ;;  %v9304_v16 = vpack.c.bf16 %v2916_v53, %v2912_v0  ;;  %v2920_v32 = vmax.f32 %v2856_v62, 0.0  ;;  %v10729_v29 = vld [vmem:[#allocation56_spill] sm:$0xff] }
 0x3d2   :  { %3900 = vmatpush1.bf16.msra.mxu0 %v7230_v9  ;;  %4126 = vmatpush1.bf16.msra.mxu1 %v7233_v63  ;;  %v2779_v9 = vmul.f32 %v9266_v39, %v10728_v58  ;;  %v2814_v63 = vmul.f32 %v9210_v45, %v9027_v54  ;;  %v2783_v8 = vmul.f32 %v9266_v39, %v10729_v29  ;;  %v7242_v0 = vld [vmem:[#allocation5 + $0x300] ss:$16 sps:$4 sm:$0xff]   ;;  %v7250_v53 = vld [vmem:[#allocation5 + $0x324] ss:$16 sps:$4 sm:$0xff]   ;;  %v7251_v58 = vld [vmem:[#allocation5 + $0x328] ss:$16 sps:$4 sm:$0xff]  }
 0x3d3   :  { %3846 = vmatprep.mubr.bf16.mxu0 %v2991_v13  ;;  %4072 = vmatprep.mubr.bf16.mxu1 %v2991_v13  ;;  %v9317_v12 = vpack.c.bf16 %v2924_v27, %v2920_v32  ;;  %v10730_v13 = vld [vmem:[#allocation57_spill] sm:$0xff]  ;;  %v2995_v52 = vpack.c.bf16 %v2955_v60, %v2951_v51  ;;  %v7256_v29 = vld [vmem:[#allocation5 + $0x344] ss:$16 sps:$4 sm:$0xff]  }
 0x3d4   :  { %3901 = vmatprep.subr.bf16.mxu0 %v7238_v22  ;;  %4127 = vmatprep.subr.bf16.mxu1 %v7241_v31  ;;  %v2864_v3 = vadd.f32 %v9272_v6, %v2779_v9  ;;  %v7245_v22 = vld [vmem:[#allocation5 + $0x308] ss:$16 sps:$4 sm:$0xff]   ;;  %v2890_v31 = vadd.f32 %v9198_v21, %v2805_v55  ;;  %v2868_v54 = vadd.f32 %v9272_v6, %v2783_v8  ;;  %v10732_v55 = vld [vmem:[#allocation20_spill] sm:$0xff]  ;;  %v2950_v9 = vmax.f32 %v9313_v2, 0.0  ;;  %v7259_v8 = vld [vmem:[#allocation5 + $0x34c] ss:$16 sps:$4 sm:$0xff]  }
 0x3d5   :  { %v2787_v38 = vmul.f32 %v9266_v39, %v10730_v13  ;;  %v2899_v26 = vadd.f32 %v9202_v23, %v2814_v63  ;;  %v2809_v62 = vmul.f32 %v9206_v49, %v10732_v55  ;;  %v10733_v63 = vld [vmem:[#allocation59_spill] sm:$0xff]  ;;  %v10734_v51 = vld [vmem:[#allocation22_spill] sm:$0xff] }
 0x3d6   :  { %3902 = vmatpush1.bf16.msra.mxu0 %v7236_v5  ;;  %4128 = vmatpush1.bf16.msra.mxu1 %v7239_v35  ;;  %v2928_v7 = vmax.f32 %v2864_v3, 0.0  ;;  %v7253_v5 = vld [vmem:[#allocation5 + $0x32c] ss:$16 sps:$4 sm:$0xff]   ;;  %v2895_v35 = vadd.f32 %v9202_v23, %v2810_v34  ;;  %v2932_v30 = vmax.f32 %v2868_v54, 0.0  ;;  %v2954_v34 = vmax.f32 %v2890_v31, 0.0  ;;  %v10736_v55 = vld [vmem:[#allocation14_spill] sm:$0xff] }
 0x3d7   :  { %3903 = vmatprep.subr.bf16.mxu0 %v7244_v24  ;;  %4129 = vmatprep.subr.bf16.mxu1 %v7247_v14  ;;  %v2872_v24 = vadd.f32 %v9272_v6, %v2787_v38  ;;  %v2876_v14 = vadd.f32 %v9272_v6, %v2791_v61  ;;  %v2795_v27 = vmul.f32 %v9266_v39, %v10733_v63  ;;  %v2963_v31 = vmax.f32 %v2899_v26, 0.0  ;;  %v10737_v26 = vld [vmem:[#allocation61_spill] sm:$0xff] }
 0x3d8   :  { %v9331_v32 = vpack.c.bf16 %v2932_v30, %v2928_v7  ;;  %v2813_v60 = vmul.f32 %v9206_v49, %v10734_v51  ;;  %v2959_v2 = vmax.f32 %v2895_v35, 0.0  ;;  %v9343_v13 = vadd.f32 %v9198_v21, %v2809_v62 }
 0x3d9   :  { %3847 = vmatmul.mubr.bf16.gmra.mrb[80].mxu0 %v2990_v48  ;;  %4073 = vmatmul.mubr.bf16.gmra.mrb[80].mxu1 %v2990_v48  ;;  %v2936_v3 = vmax.f32 %v2872_v24, 0.0  ;;  %v2818_v48 = vmul.f32 %v9210_v45, %v9032_v10  ;;  %v2880_v7 = vadd.f32 %v9272_v6, %v2795_v27  ;;  %v2822_v38 = vmul.f32 %v9210_v45, %v9035_v46  ;;  %v7257_v10 = vld [vmem:[#allocation5 + $0x348] ss:$16 sps:$4 sm:$0xff]  }
 0x3da   :  { %3904 = vmatpush1.bf16.msra.mxu0 %v7242_v0  ;;  %4130 = vmatpush1.bf16.msra.mxu1 %v7245_v22  ;;  %v2940_v0 = vmax.f32 %v2876_v14, 0.0  ;;  %v10735_v22 = vld [vmem:[#allocation60_spill] sm:$0xff]  ;;  %v2803_v62 = vmul.f32 %v9266_v39, %v10737_v26  ;;  %v2807_v30 = vmul.f32 %v9266_v39, %v8952_v40  ;;  %v9360_v46 = vrot.slane %v9194_v15, %v10736_v55 }
 0x3db   :  { %3856 = vmatprep.mubr.bf16.mxu0 %v2995_v52  ;;  %4082 = vmatprep.mubr.bf16.mxu1 %v2995_v52  ;;  %v2799_v54 = vmul.f32 %v9266_v39, %v10735_v22  ;;  %v2944_v35 = vmax.f32 %v2880_v7, 0.0  ;;  %v2994_v45 = vpack.c.bf16 %v2954_v34, %v2950_v9  ;;  %v2999_v24 = vpack.c.bf16 %v2963_v31, %v2959_v2  ;;  %v7262_v14 = vld [vmem:[#allocation5 + $0x364] ss:$16 sps:$4 sm:$0xff]   ;;  %v7260_v34 = vld [vmem:[#allocation5 + $0x360] ss:$16 sps:$4 sm:$0xff]  }
 0x3dc   :  { %3905 = vmatprep.subr.bf16.mxu0 %v7250_v53  ;;  %4131 = vmatprep.subr.bf16.mxu1 %v7253_v5  ;;  %v9347_v4 = vpack.c.bf16 %v2940_v0, %v2936_v3  ;;  %v9352_v53 = vrot.slane %v9192_v44, %v10736_v55  ;;  %v7254_v5 = vld [vmem:[#allocation5 + $0x340] ss:$16 sps:$4 sm:$0xff]   ;;  %v2898_v44 = vadd.f32 %v9198_v21, %v2813_v60  ;;  %v2958_v40 = vmax.f32 %v9343_v13, 0.0  ;;  %v7271_v22 = vld [vmem:[#allocation5 + $0x38c] ss:$16 sps:$4 sm:$0xff]  }
 0x3dd   :  { %v2884_v61 = vadd.f32 %v9272_v6, %v2799_v54  ;;  %v2888_v63 = vadd.f32 %v9272_v6, %v2803_v62  ;;  %v2892_v27 = vadd.f32 %v9272_v6, %v2807_v30  ;;  %v2907_v15 = vadd.f32 %v9202_v23, %v2822_v38  ;;  %v10738_v38 = vld [vmem:[#allocation23_spill] sm:$0xff] }
 0x3de   :  { %3906 = vmatpush1.bf16.msra.mxu0 %v7248_v36  ;;  %4132 = vmatpush1.bf16.msra.mxu1 %v7251_v58  ;;  %v7265_v36 = vld [vmem:[#allocation5 + $0x36c] ss:$16 sps:$4 sm:$0xff]   ;;  %v2903_v58 = vadd.f32 %v9202_v23, %v2818_v48  ;;  %v2811_v9 = vmul.f32 %v9266_v39, %v8955_v28  ;;  %v2817_v51 = vmul.f32 %v9206_v49, %v8904_v17  ;;  %v7268_v23 = vld [vmem:[#allocation5 + $0x384] ss:$16 sps:$4 sm:$0xff]   ;;  %v2962_v54 = vmax.f32 %v2898_v44, 0.0 }
 0x3df   :  { %3907 = vmatprep.subr.bf16.mxu0 %v7256_v29  ;;  %4133 = vmatprep.subr.bf16.mxu1 %v7259_v8  ;;  %v2948_v52 = vmax.f32 %v2884_v61, 0.0  ;;  %v7263_v8 = vld [vmem:[#allocation5 + $0x368] ss:$16 sps:$4 sm:$0xff]   ;;  %v2952_v60 = vmax.f32 %v2888_v63, 0.0  ;;  %v2956_v3 = vmax.f32 %v2892_v27, 0.0  ;;  %v2815_v0 = vmul.f32 %v9266_v39, %v8958_v47 }
 0x3e0   :  { %v2821_v28 = vmul.f32 %v9206_v49, %v8907_v20  ;;  %v2764_v2 = vmul.f32 %v9360_v46, %v9064_v37  ;;  %v2896_v31 = vadd.f32 %v9272_v6, %v2811_v9  ;;  %v2967_v17 = vmax.f32 %v2903_v58, 0.0  ;;  %v7266_v49 = vld [vmem:[#allocation5 + $0x380] ss:$16 sps:$4 sm:$0xff]   ;;  %v7277_v44 = vld [vmem:[#allocation5 + $0x3ac] ss:$16 sps:$4 sm:$0xff]  }
 0x3e1   :  { %3857 = vmatmul.mubr.bf16.gmra.mrb[84].mxu0 %v2994_v45  ;;  %4083 = vmatmul.mubr.bf16.gmra.mrb[84].mxu1 %v2994_v45  ;;  %v9368_v29 = vpack.c.bf16 %v2948_v52, %v2944_v35  ;;  %v9381_v48 = vpack.c.bf16 %v2956_v3, %v2952_v60  ;;  %v2900_v47 = vadd.f32 %v9272_v6, %v2815_v0  ;;  %v2971_v13 = vmax.f32 %v2907_v15, 0.0  ;;  %v7274_v45 = vld [vmem:[#allocation5 + $0x3a4] ss:$16 sps:$4 sm:$0xff]   ;;  %v7272_v58 = vld [vmem:[#allocation5 + $0x3a0] ss:$16 sps:$4 sm:$0xff]  }
 0x3e2   :  { %3908 = vmatpush1.bf16.msra.mxu0 %v7254_v5  ;;  %4134 = vmatpush1.bf16.msra.mxu1 %v7257_v10  ;;  %v2819_v7 = vmul.f32 %v9266_v39, %v8963_v19  ;;  %v2768_v61 = vmul.f32 %v9360_v46, %v10738_v38  ;;  %v2960_v20 = vmax.f32 %v2896_v31, 0.0  ;;  %v2823_v37 = vmul.f32 %v9266_v39, %v8966_v41  ;;  %v7269_v5 = vld [vmem:[#allocation5 + $0x388] ss:$16 sps:$4 sm:$0xff]   ;;  %v7278_v60 = vld [vmem:[#allocation5 + $0x3c0] ss:$16 sps:$4 sm:$0xff]  }
 0x3e3   :  { %3866 = vmatprep.mubr.bf16.mxu0 %v2999_v24  ;;  %4092 = vmatprep.mubr.bf16.mxu1 %v2999_v24  ;;  %v2902_v10 = vadd.f32 %v9198_v21, %v2817_v51  ;;  %v2964_v35 = vmax.f32 %v2900_v47, 0.0  ;;  %v2998_v19 = vpack.c.bf16 %v2962_v54, %v2958_v40  ;;  %v2906_v62 = vadd.f32 %v9198_v21, %v2821_v28  ;;  %v7275_v63 = vld [vmem:[#allocation5 + $0x3a8] ss:$16 sps:$4 sm:$0xff]   ;;  %v7280_v21 = vld [vmem:[#allocation5 + $0x3c4] ss:$16 sps:$4 sm:$0xff]  }
 0x3e4   :  { %3909 = vmatprep.subr.bf16.mxu0 %v7262_v14  ;;  %4135 = vmatprep.subr.bf16.mxu1 %v7265_v36  ;;  %v2904_v26 = vadd.f32 %v9272_v6, %v2819_v7  ;;  %v2908_v30 = vadd.f32 %v9272_v6, %v2823_v37  ;;  %v3003_v39 = vpack.c.bf16 %v2971_v13, %v2967_v17  ;;  %v7283_v6 = vld [vmem:[#allocation5 + $0x3cc] ss:$16 sps:$4 sm:$0xff]   ;;  %v7281_v3 = vld [vmem:[#allocation5 + $0x3c8] ss:$16 sps:$4 sm:$0xff]  }
 0x3e5   :  { %v9394_v52 = vpack.c.bf16 %v2964_v35, %v2960_v20  ;;  %v2849_v24 = vadd.f32 %v9352_v53, %v2764_v2  ;;  %v2853_v14 = vadd.f32 %v9352_v53, %v2768_v61  ;;  %v2966_v27 = vmax.f32 %v2902_v10, 0.0  ;;  %v7287_v2 = vld [vmem:[#allocation5 + $0x3e8] ss:$16 sps:$4 sm:$0xff]  }
 0x3e6   :  { %3910 = vmatpush1.bf16.msra.mxu0 %v7260_v34  ;;  %4136 = vmatpush1.bf16.msra.mxu1 %v7263_v8  ;;  %v2968_v41 = vmax.f32 %v2904_v26, 0.0  ;;  %v2972_v36 = vmax.f32 %v2908_v30, 0.0  ;;  %v2970_v40 = vmax.f32 %v2906_v62, 0.0  ;;  %v2772_v9 = vmul.f32 %v9360_v46, %v9070_v25  ;;  %v10739_v47 = vld [vmem:[#allocation27_spill] sm:$0xff] }
 0x3e7   :  { %3911 = vmatprep.subr.bf16.mxu0 %v7268_v23  ;;  %4137 = vmatprep.subr.bf16.mxu1 %v7271_v22  ;;  %v2776_v34 = vmul.f32 %v9360_v46, %v9073_v1  ;;  %v2913_v8 = vmax.f32 %v2849_v24, 0.0  ;;  %v2917_v51 = vmax.f32 %v2853_v14, 0.0  ;;  %v7286_v23 = vld [vmem:[#allocation5 + $0x3e4] ss:$16 sps:$4 sm:$0xff]   ;;  %v7289_v22 = vld [vmem:[#allocation5 + $0x3ec] ss:$16 sps:$4 sm:$0xff]   ;;  %v2780_v7 = vmul.f32 %v9360_v46, %v10739_v47 }
 0x3e8   :  { %v9398_v15 = vpack.c.bf16 %v2972_v36, %v2968_v41  ;;  %v3002_v0 = vpack.c.bf16 %v2970_v40, %v2966_v27  ;;  %v2857_v54 = vadd.f32 %v9352_v53, %v2772_v9  ;;  %v7284_v1 = vld [vmem:[#allocation5 + $0x3e0] ss:$16 sps:$4 sm:$0xff]   ;;  %v10740_v13 = vld [vmem:[#allocation31_spill] sm:$0xff]  ;;  %v2788_v10 = vmul.f32 %v9360_v46, %v9084_v18 }
 0x3e9   :  { %3867 = vmatmul.mubr.bf16.gmra.mrb[88].mxu0 %v2998_v19  ;;  %4093 = vmatmul.mubr.bf16.gmra.mrb[88].mxu1 %v2998_v19  ;;  %v2861_v28 = vadd.f32 %v9352_v53, %v2776_v34  ;;  %v2977_v25 = vpack.c.bf16 %v2917_v51, %v2913_v8  ;;  %v2784_v38 = vmul.f32 %v9360_v46, %v10740_v13 }
 0x3ea   :  { %3912 = vmatpush1.bf16.msra.mxu0 %v7266_v49  ;;  %4138 = vmatpush1.bf16.msra.mxu1 %v7269_v5  ;;  %v2921_v31 = vmax.f32 %v2857_v54, 0.0  ;;  %v2865_v20 = vadd.f32 %v9352_v53, %v2780_v7  ;;  %v2792_v35 = vmul.f32 %v9360_v46, %v9087_v50  ;;  %v2873_v19 = vadd.f32 %v9352_v53, %v2788_v10 }
 0x3eb   :  { %3876 = vmatprep.mubr.bf16.mxu0 %v3003_v39  ;;  %4102 = vmatprep.mubr.bf16.mxu1 %v3003_v39  ;;  %v2925_v17 = vmax.f32 %v2861_v28, 0.0  ;;  %v2869_v37 = vadd.f32 %v9352_v53, %v2784_v38  ;;  %v2800_v18 = vmul.f32 %v9360_v46, %v9093_v33  ;;  %v2804_v14 = vmul.f32 %v9360_v46, %v9096_v11  ;;  %v10743_v11 = vld [vmem:[#allocation40_spill] sm:$0xff] }
 0x3ec   :  { %3913 = vmatprep.subr.bf16.mxu0 %v7274_v45  ;;  %4139 = vmatprep.subr.bf16.mxu1 %v7277_v44  ;;  %v2929_v49 = vmax.f32 %v2865_v20, 0.0  ;;  %v2877_v62 = vadd.f32 %v9352_v53, %v2792_v35  ;;  %v10741_v45 = vld [vmem:[#allocation35_spill] sm:$0xff]  ;;  %v2808_v36 = vmul.f32 %v9360_v46, %v9099_v42  ;;  %v2816_v40 = vmul.f32 %v9360_v46, %v10743_v11 }
 0x3ed   :  { %v2981_v61 = vpack.c.bf16 %v2925_v17, %v2921_v31  ;;  %v2933_v5 = vmax.f32 %v2869_v37, 0.0  ;;  %v2796_v44 = vmul.f32 %v9360_v46, %v10741_v45  ;;  %v2885_v39 = vadd.f32 %v9352_v53, %v2800_v18 }
 0x3ee   :  { %3914 = vmatpush1.bf16.msra.mxu0 %v7272_v58  ;;  %4140 = vmatpush1.bf16.msra.mxu1 %v7275_v63  ;;  %v2941_v30 = vmax.f32 %v2877_v62, 0.0  ;;  %v2889_v58 = vadd.f32 %v9352_v53, %v2804_v14  ;;  %v2893_v63 = vadd.f32 %v9352_v53, %v2808_v36  ;;  %v2901_v34 = vadd.f32 %v9352_v53, %v2816_v40  ;;  %v7292_v36 = vld [vmem:[#allocation7 + $0x4] ss:$16 sps:$4 sm:$0xff]  }
 0x3ef   :  { %3915 = vmatprep.subr.bf16.mxu0 %v7280_v21  ;;  %4141 = vmatprep.subr.bf16.mxu1 %v7283_v6  ;;  %v2985_v26 = vpack.c.bf16 %v2933_v5, %v2929_v49  ;;  %v2881_v41 = vadd.f32 %v9352_v53, %v2796_v44  ;;  %v2949_v24 = vmax.f32 %v2885_v39, 0.0  ;;  %v10742_v6 = vld [vmem:[#allocation38_spill] sm:$0xff] }
 0x3f0   :  { %v2957_v21 = vmax.f32 %v2893_v63, 0.0  ;;  %v2812_v27 = vmul.f32 %v9360_v46, %v10742_v6  ;;  %v7290_v6 = vld [vmem:[#allocation7] ss:$16 sps:$4 sm:$0xff]  }
 0x3f1   :  { %3877 = vmatmul.mubr.bf16.gmra.mrb[92].mxu0 %v3002_v0  ;;  %4103 = vmatmul.mubr.bf16.gmra.mrb[92].mxu1 %v3002_v0 }
 0x3f2   :  { %3916 = vmatpush1.bf16.msra.mxu0 %v7278_v60  ;;  %4142 = vmatpush1.bf16.msra.mxu1 %v7281_v3  ;;  %v2897_v9 = vadd.f32 %v9352_v53, %v2812_v27  ;;  %v2965_v60 = vmax.f32 %v2901_v34, 0.0  ;;  %v10745_v3 = vld [vmem:[#allocation46_spill] sm:$0xff]  ;;  %v7293_v27 = vld [vmem:[#allocation7 + $0x8] ss:$16 sps:$4 sm:$0xff]  }
 0x3f3   :  { %3919 = vmatprep.mubr.bf16.mxu0 %v2977_v25  ;;  %4145 = vmatprep.mubr.bf16.mxu1 %v2977_v25  ;;  %v2820_v0 = vmul.f32 %v9360_v46, %v10745_v3  ;;  %v7299_v3 = vld [vmem:[#allocation7 + $0x28] ss:$16 sps:$4 sm:$0xff]  }
 0x3f4   :  { %3917 = vmatprep.subr.bf16.mxu0 %v7286_v23  ;;  %4143 = vmatprep.subr.bf16.mxu1 %v7289_v22  ;;  %v2961_v51 = vmax.f32 %v2897_v9, 0.0 }
 0x3f5   :  { %v2905_v54 = vadd.f32 %v9352_v53, %v2820_v0 }
 0x3f6   :  { %3918 = vmatpush1.bf16.msra.mxu0 %v7284_v1  ;;  %4144 = vmatpush1.bf16.msra.mxu1 %v7287_v2  ;;  %v3001_v22 = vpack.c.bf16 %v2965_v60, %v2961_v51  ;;  %v7301_v51 = vld [vmem:[#allocation7 + $0x2c] ss:$16 sps:$4 sm:$0xff]   ;;  %v7296_v60 = vld [vmem:[#allocation7 + $0x20] ss:$16 sps:$4 sm:$0xff]  }
 0x3f7   :  { %5626 = vmatprep.subr.bf16.mxu0 %v7292_v36  ;;  %v7313_v36 = vld [vmem:[#allocation7 + $0x6c] ss:$16 sps:$4 sm:$0xff]  }
 0x3f9   :  { %3920 = vmatmul.mubr.bf16.vlgmr.msra.gmra.mrb[64].mxu0 %v9304_v16  ;;  %4146 = vmatmul.mubr.bf16.vlgmr.msra.gmra.mrb[64].mxu1 %v9304_v16  ;;  %v2937_v16 = vmax.f32 %v2873_v19, 0.0 }
 0x3fa   :  { %3929 = vmatprep.mubr.bf16.mxu0 %v2981_v61  ;;  %4155 = vmatprep.mubr.bf16.mxu1 %v2981_v61 }
 0x3fb   :  { %v2989_v50 = vpack.c.bf16 %v2941_v30, %v2937_v16  ;;  %5627 = vmatpush1.bf16.msra.mxu0 %v7290_v6 }
 0x401   :  { %3930 = vmatmul.mubr.bf16.gmra.mrb[68].mxu0 %v9317_v12  ;;  %4156 = vmatmul.mubr.bf16.gmra.mrb[68].mxu1 %v9317_v12  ;;  %v2945_v12 = vmax.f32 %v2881_v41, 0.0 }
 0x402   :  { %3939 = vmatprep.mubr.bf16.mxu0 %v2985_v26  ;;  %4165 = vmatprep.mubr.bf16.mxu1 %v2985_v26 }
 0x403   :  { %v2993_v33 = vpack.c.bf16 %v2949_v24, %v2945_v12 }
 0x409   :  { %3940 = vmatmul.mubr.bf16.gmra.mrb[72].mxu0 %v9331_v32  ;;  %4166 = vmatmul.mubr.bf16.gmra.mrb[72].mxu1 %v9331_v32  ;;  %v2953_v32 = vmax.f32 %v2889_v58, 0.0 }
 0x40a   :  { %3949 = vmatprep.mubr.bf16.mxu0 %v2989_v50  ;;  %4175 = vmatprep.mubr.bf16.mxu1 %v2989_v50 }
 0x40b   :  { %v2997_v42 = vpack.c.bf16 %v2957_v21, %v2953_v32 }
 0x411   :  { %3950 = vmatmul.mubr.bf16.gmra.mrb[76].mxu0 %v9347_v4  ;;  %4176 = vmatmul.mubr.bf16.gmra.mrb[76].mxu1 %v9347_v4  ;;  %v10744_v4 = vld [vmem:[#allocation48_spill] sm:$0xff] }
 0x412   :  { %3959 = vmatprep.mubr.bf16.mxu0 %v2993_v33  ;;  %4185 = vmatprep.mubr.bf16.mxu1 %v2993_v33  ;;  %v2824_v8 = vmul.f32 %v9360_v46, %v10744_v4  ;;  %v7295_v33 = vld [vmem:[#allocation7 + $0xc] ss:$16 sps:$4 sm:$0xff]  }
 0x413   :  { %5852 = vmatprep.subr.bf16.mxu1 %v7295_v33  ;;  %v7308_v33 = vld [vmem:[#allocation7 + $0x60] ss:$16 sps:$4 sm:$0xff]  }
 0x414   :  { %v2909_v23 = vadd.f32 %v9352_v53, %v2824_v8  ;;  %5853 = vmatpush1.bf16.msra.mxu1 %v7293_v27  ;;  %v7298_v8 = vld [vmem:[#allocation7 + $0x24] ss:$16 sps:$4 sm:$0xff]  }
 0x415   :  { %5628 = vmatprep.subr.bf16.mxu0 %v7298_v8  ;;  %5854 = vmatprep.subr.bf16.mxu1 %v7301_v51  ;;  %v7319_v8 = vld [vmem:[#allocation7 + $0x8c] ss:$16 sps:$4 sm:$0xff]  }
 0x416   :  { %v2973_v28 = vmax.f32 %v2909_v23, 0.0  ;;  %5629 = vmatpush1.bf16.msra.mxu0 %v7296_v60 }
 0x418   :  { %5855 = vmatpush1.bf16.msra.mxu1 %v7299_v3 }
 0x419   :  { %3960 = vmatmul.mubr.bf16.gmra.mrb[80].mxu0 %v9368_v29  ;;  %4186 = vmatmul.mubr.bf16.gmra.mrb[80].mxu1 %v9368_v29  ;;  %v2969_v29 = vmax.f32 %v2905_v54, 0.0 }
 0x41a   :  { %3969 = vmatprep.mubr.bf16.mxu0 %v2997_v42  ;;  %4195 = vmatprep.mubr.bf16.mxu1 %v2997_v42 }
 0x41b   :  { %v3005_v25 = vpack.c.bf16 %v2973_v28, %v2969_v29 }
 0x421   :  { %3970 = vmatmul.mubr.bf16.gmra.mrb[84].mxu0 %v9381_v48  ;;  %4196 = vmatmul.mubr.bf16.gmra.mrb[84].mxu1 %v9381_v48 }
 0x422   :  { %3979 = vmatprep.mubr.bf16.mxu0 %v3001_v22  ;;  %4205 = vmatprep.mubr.bf16.mxu1 %v3001_v22 }
 0x429   :  { %3980 = vmatmul.mubr.bf16.gmra.mrb[88].mxu0 %v9394_v52  ;;  %4206 = vmatmul.mubr.bf16.gmra.mrb[88].mxu1 %v9394_v52 }
 0x42a   :  { %3989 = vmatprep.mubr.bf16.mxu0 %v3005_v25  ;;  %4215 = vmatprep.mubr.bf16.mxu1 %v3005_v25  ;;  %v7304_v25 = vld [vmem:[#allocation7 + $0x44] ss:$16 sps:$4 sm:$0xff]  }
 0x42b   :  { %5630 = vmatprep.subr.bf16.mxu0 %v7304_v25 }
 0x431   :  { %3990 = vmatmul.mubr.bf16.gmra.mrb[92].mxu0 %v9398_v15  ;;  %4216 = vmatmul.mubr.bf16.gmra.mrb[92].mxu1 %v9398_v15 }
 0x4cc   :  { %v9458_v53 = vpop.f32.mrb[64].mxu0  ;;  %v9460_v46 = vpop.f32.mrb[64].mxu1 }
 0x4cd   :  { %v9462_v48 = vpop.f32.mrb[65].mxu0  ;;  %v9464_v1 = vpop.f32.mrb[65].mxu1 }
 0x4ce   :  { %10746 = vst [vmem:[#allocation42_spill] sm:$0xff] %v9464_v1  ;;  %v9466_v2 = vpop.f32.mrb[66].mxu0  ;;  %v9468_v31 = vpop.f32.mrb[66].mxu1 }
 0x4cf   :  { %v4228_v52 = vadd.f32 %v9466_v2, %v9458_v53  ;;  %v4270_v17 = vadd.f32 %v9468_v31, %v9460_v46  ;;  %v9474_v47 = vpop.f32.mrb[67].mxu0  ;;  %v9476_v15 = vpop.f32.mrb[67].mxu1 }
 0x4d0   :  { %10747 = vst [vmem:[#allocation50_spill] sm:$0xff] %v9476_v15  ;;  %v4249_v7 = vadd.f32 %v9474_v47, %v9462_v48  ;;  %v4291_v13 = vadd.f32 %v9476_v15, %v9464_v1  ;;  %v7361_v1 = vld [vmem:[#allocation7 + $0x16c] ss:$16 sps:$4 sm:$0xff]  }
 0x4d4   :  { %v9482_v38 = vpop.f32.mrb[68].mxu0  ;;  %v9484_v61 = vpop.f32.mrb[68].mxu1 }
 0x4d5   :  { %v4229_v20 = vadd.f32 %v4228_v52, %v9482_v38  ;;  %v4271_v37 = vadd.f32 %v4270_v17, %v9484_v61  ;;  %v9488_v49 = vpop.f32.mrb[69].mxu0  ;;  %v9490_v5 = vpop.f32.mrb[69].mxu1  ;;  %v7307_v52 = vld [vmem:[#allocation7 + $0x4c] ss:$16 sps:$4 sm:$0xff]  }
 0x4d6   :  { %10748 = vst [vmem:[#allocation52_spill] sm:$0xff] %v9490_v5  ;;  %v4250_v10 = vadd.f32 %v4249_v7, %v9488_v49  ;;  %v4292_v35 = vadd.f32 %v4291_v13, %v9490_v5  ;;  %v9494_v26 = vpop.f32.mrb[70].mxu0  ;;  %v9496_v19 = vpop.f32.mrb[70].mxu1  ;;  %5856 = vmatprep.subr.bf16.mxu1 %v7307_v52 }
 0x4d7   :  { %v4230_v62 = vadd.f32 %v4229_v20, %v9494_v26  ;;  %v4272_v16 = vadd.f32 %v4271_v37, %v9496_v19  ;;  %v9500_v30 = vpop.f32.mrb[71].mxu0  ;;  %v9502_v45 = vpop.f32.mrb[71].mxu1  ;;  %v7302_v37 = vld [vmem:[#allocation7 + $0x40] ss:$16 sps:$4 sm:$0xff]  }
 0x4d8   :  { %10749 = vst [vmem:[#allocation15_spill] sm:$0xff] %v9502_v45  ;;  %v4251_v44 = vadd.f32 %v4250_v10, %v9500_v30  ;;  %v4293_v18 = vadd.f32 %v4292_v35, %v9502_v45  ;;  %v7305_v10 = vld [vmem:[#allocation7 + $0x48] ss:$16 sps:$4 sm:$0xff]   ;;  %5631 = vmatpush1.bf16.msra.mxu0 %v7302_v37 }
 0x4d9   :  { %5857 = vmatpush1.bf16.msra.mxu1 %v7305_v10  ;;  %v7317_v37 = vld [vmem:[#allocation7 + $0x88] ss:$16 sps:$4 sm:$0xff]  }
 0x4da   :  { %5858 = vmatprep.subr.bf16.mxu1 %v7313_v36  ;;  %v7353_v45 = vld [vmem:[#allocation7 + $0x148] ss:$16 sps:$4 sm:$0xff]  }
 0x4dc   :  { %v9506_v50 = vpop.f32.mrb[72].mxu0  ;;  %v9508_v41 = vpop.f32.mrb[72].mxu1 }
 0x4dd   :  { %v4231_v39 = vadd.f32 %v4230_v62, %v9506_v50  ;;  %v4273_v12 = vadd.f32 %v4272_v16, %v9508_v41  ;;  %v9512_v24 = vpop.f32.mrb[73].mxu0  ;;  %v9514_v14 = vpop.f32.mrb[73].mxu1 }
 0x4de   :  { %10750 = vst [vmem:[#allocation16_spill] sm:$0xff] %v9514_v14  ;;  %v4252_v58 = vadd.f32 %v4251_v44, %v9512_v24  ;;  %v4294_v63 = vadd.f32 %v4293_v18, %v9514_v14  ;;  %v9518_v32 = vpop.f32.mrb[74].mxu0  ;;  %v9520_v21 = vpop.f32.mrb[74].mxu1 }
 0x4df   :  { %v4232_v11 = vadd.f32 %v4231_v39, %v9518_v32  ;;  %v4274_v40 = vadd.f32 %v4273_v12, %v9520_v21  ;;  %v9524_v42 = vpop.f32.mrb[75].mxu0  ;;  %v9526_v9 = vpop.f32.mrb[75].mxu1  ;;  %v7310_v12 = vld [vmem:[#allocation7 + $0x64] ss:$16 sps:$4 sm:$0xff]  }
 0x4e0   :  { %10751 = vst [vmem:[#allocation17_spill] sm:$0xff] %v9524_v42  ;;  %10752 = vst [vmem:[#allocation19_spill] sm:$0xff] %v9526_v9  ;;  %v4253_v34 = vadd.f32 %v4252_v58, %v9524_v42  ;;  %v4295_v4 = vadd.f32 %v4294_v63, %v9526_v9  ;;  %v7311_v58 = vld [vmem:[#allocation7 + $0x68] ss:$16 sps:$4 sm:$0xff]   ;;  %5632 = vmatprep.subr.bf16.mxu0 %v7310_v12 }
 0x4e1   :  { %5633 = vmatpush1.bf16.msra.mxu0 %v7308_v33  ;;  %5859 = vmatpush1.bf16.msra.mxu1 %v7311_v58  ;;  %v7323_v12 = vld [vmem:[#allocation7 + $0xa8] ss:$16 sps:$4 sm:$0xff]  }
 0x4e2   :  { %5860 = vmatprep.subr.bf16.mxu1 %v7319_v8  ;;  %v7328_v8 = vld [vmem:[#allocation7 + $0xc4] ss:$16 sps:$4 sm:$0xff]   ;;  %v7347_v9 = vld [vmem:[#allocation7 + $0x128] ss:$16 sps:$4 sm:$0xff]  }
 0x4e4   :  { %v9530_v0 = vpop.f32.mrb[76].mxu0  ;;  %v9532_v23 = vpop.f32.mrb[76].mxu1 }
 0x4e5   :  { %v4233_v22 = vadd.f32 %v4232_v11, %v9530_v0  ;;  %v4275_v54 = vadd.f32 %v4274_v40, %v9532_v23  ;;  %v9536_v29 = vpop.f32.mrb[77].mxu0  ;;  %v9538_v28 = vpop.f32.mrb[77].mxu1  ;;  %5861 = vmatpush1.bf16.msra.mxu1 %v7317_v37 }
 0x4e6   :  { %10753 = vst [vmem:[#allocation21_spill] sm:$0xff] %v9536_v29  ;;  %10754 = vst [vmem:[#allocation25_spill] sm:$0xff] %v9538_v28  ;;  %v4254_v17 = vadd.f32 %v4253_v34, %v9536_v29  ;;  %v4296_v7 = vadd.f32 %v4295_v4, %v9538_v28  ;;  %v9542_v13 = vpop.f32.mrb[78].mxu0  ;;  %v9544_v20 = vpop.f32.mrb[78].mxu1  ;;  %v7316_v4 = vld [vmem:[#allocation7 + $0x84] ss:$16 sps:$4 sm:$0xff]  }
 0x4e7   :  { %v4234_v35 = vadd.f32 %v4233_v22, %v9542_v13  ;;  %v4276_v62 = vadd.f32 %v4275_v54, %v9544_v20  ;;  %v9548_v16 = vpop.f32.mrb[79].mxu0  ;;  %v9550_v44 = vpop.f32.mrb[79].mxu1  ;;  %v7314_v54 = vld [vmem:[#allocation7 + $0x80] ss:$16 sps:$4 sm:$0xff]   ;;  %5634 = vmatprep.subr.bf16.mxu0 %v7316_v4 }
 0x4e8   :  { %10755 = vst [vmem:[#allocation29_spill] sm:$0xff] %v9548_v16  ;;  %10756 = vst [vmem:[#allocation33_spill] sm:$0xff] %v9550_v44  ;;  %v4255_v18 = vadd.f32 %v4254_v17, %v9548_v16  ;;  %v4297_v39 = vadd.f32 %v4296_v7, %v9550_v44  ;;  %5635 = vmatpush1.bf16.msra.mxu0 %v7314_v54  ;;  %v7344_v28 = vld [vmem:[#allocation7 + $0x120] ss:$16 sps:$4 sm:$0xff]  }
 0x4ec   :  { %v9554_v63 = vpop.f32.mrb[80].mxu0  ;;  %v9556_v6 = vpop.f32.mrb[80].mxu1 }
 0x4ed   :  { %v4235_v27 = vadd.f32 %v4234_v35, %v9554_v63  ;;  %v4277_v11 = vadd.f32 %v4276_v62, %v9556_v6  ;;  %v9560_v40 = vpop.f32.mrb[81].mxu0  ;;  %v9562_v34 = vpop.f32.mrb[81].mxu1  ;;  %v7322_v62 = vld [vmem:[#allocation7 + $0xa4] ss:$16 sps:$4 sm:$0xff]  }
 0x4ee   :  { %10757 = vst [vmem:[#allocation37_spill] sm:$0xff] %v9560_v40  ;;  %10758 = vst [vmem:[#allocation39_spill] sm:$0xff] %v9562_v34  ;;  %v4256_v51 = vadd.f32 %v4255_v18, %v9560_v40  ;;  %v4298_v60 = vadd.f32 %v4297_v39, %v9562_v34  ;;  %v9566_v3 = vpop.f32.mrb[82].mxu0  ;;  %v9568_v22 = vpop.f32.mrb[82].mxu1  ;;  %v7325_v18 = vld [vmem:[#allocation7 + $0xac] ss:$16 sps:$4 sm:$0xff]   ;;  %5636 = vmatprep.subr.bf16.mxu0 %v7322_v62 }
 0x4ef   :  { %v4236_v25 = vadd.f32 %v4235_v27, %v9566_v3  ;;  %v4278_v52 = vadd.f32 %v4277_v11, %v9568_v22  ;;  %v9572_v17 = vpop.f32.mrb[83].mxu0  ;;  %v9574_v7 = vpop.f32.mrb[83].mxu1  ;;  %v7320_v39 = vld [vmem:[#allocation7 + $0xa0] ss:$16 sps:$4 sm:$0xff]   ;;  %5862 = vmatprep.subr.bf16.mxu1 %v7325_v18 }
 0x4f0   :  { %10759 = vst [vmem:[#allocation45_spill] sm:$0xff] %v9572_v17  ;;  %10760 = vst [vmem:[#allocation47_spill] sm:$0xff] %v9574_v7  ;;  %v4257_v10 = vadd.f32 %v4256_v51, %v9572_v17  ;;  %v4299_v35 = vadd.f32 %v4298_v60, %v9574_v7  ;;  %5637 = vmatpush1.bf16.msra.mxu0 %v7320_v39  ;;  %5863 = vmatpush1.bf16.msra.mxu1 %v7323_v12  ;;  %v7331_v51 = vld [vmem:[#allocation7 + $0xcc] ss:$16 sps:$4 sm:$0xff]   ;;  %v7326_v18 = vld [vmem:[#allocation7 + $0xc0] ss:$16 sps:$4 sm:$0xff]  }
 0x4f1   :  { %v7329_v39 = vld [vmem:[#allocation7 + $0xc8] ss:$16 sps:$4 sm:$0xff]   ;;  %5638 = vmatprep.subr.bf16.mxu0 %v7328_v8  ;;  %5864 = vmatprep.subr.bf16.mxu1 %v7331_v51  ;;  %v7334_v12 = vld [vmem:[#allocation7 + $0xe4] ss:$16 sps:$4 sm:$0xff]  }
 0x4f2   :  { %v7341_v7 = vld [vmem:[#allocation7 + $0x108] ss:$16 sps:$4 sm:$0xff]  }
 0x4f4   :  { %v9578_v36 = vpop.f32.mrb[84].mxu0  ;;  %v9580_v33 = vpop.f32.mrb[84].mxu1  ;;  %5639 = vmatpush1.bf16.msra.mxu0 %v7326_v18  ;;  %5865 = vmatpush1.bf16.msra.mxu1 %v7329_v39  ;;  %v7340_v18 = vld [vmem:[#allocation7 + $0x104] ss:$16 sps:$4 sm:$0xff]   ;;  %v7343_v39 = vld [vmem:[#allocation7 + $0x10c] ss:$16 sps:$4 sm:$0xff]  }
 0x4f5   :  { %v4237_v58 = vadd.f32 %v4236_v25, %v9578_v36  ;;  %v4279_v27 = vadd.f32 %v4278_v52, %v9580_v33  ;;  %v9584_v11 = vpop.f32.mrb[85].mxu0  ;;  %v9586_v4 = vpop.f32.mrb[85].mxu1  ;;  %5640 = vmatprep.subr.bf16.mxu0 %v7334_v12  ;;  %5866 = vmatprep.subr.bf16.mxu1 %v7337_v57 }
 0x4f6   :  { %10761 = vst [vmem:[#allocation41_spill] sm:$0xff] %v9584_v11  ;;  %10762 = vst [vmem:[#allocation49_spill] sm:$0xff] %v9586_v4  ;;  %v4258_v60 = vadd.f32 %v4257_v10, %v9584_v11  ;;  %v4300_v54 = vadd.f32 %v4299_v35, %v9586_v4  ;;  %v9590_v37 = vpop.f32.mrb[86].mxu0  ;;  %v9592_v62 = vpop.f32.mrb[86].mxu1  ;;  %v7367_v11 = vld [vmem:[#allocation7 + $0x18c] ss:$16 sps:$4 sm:$0xff]  }
 0x4f7   :  { %v4238_v25 = vadd.f32 %v4237_v58, %v9590_v37  ;;  %v4280_v52 = vadd.f32 %v4279_v27, %v9592_v62  ;;  %v9596_v55 = vpop.f32.mrb[87].mxu0  ;;  %v9598_v56 = vpop.f32.mrb[87].mxu1 }
 0x4f8   :  { %10763 = vst [vmem:[#allocation51_spill] sm:$0xff] %v9596_v55  ;;  %10764 = vst [vmem:[#allocation43_spill] sm:$0xff] %v9598_v56  ;;  %v4259_v10 = vadd.f32 %v4258_v60, %v9596_v55  ;;  %v4301_v35 = vadd.f32 %v4300_v54, %v9598_v56  ;;  %5641 = vmatpush1.bf16.msra.mxu0 %v7332_v59  ;;  %5867 = vmatpush1.bf16.msra.mxu1 %v7335_v43  ;;  %v7338_v59 = vld [vmem:[#allocation7 + $0x100] ss:$16 sps:$4 sm:$0xff]  }
 0x4f9   :  { %5642 = vmatprep.subr.bf16.mxu0 %v7340_v18  ;;  %5868 = vmatprep.subr.bf16.mxu1 %v7343_v39 }
 0x4fc   :  { %v9602_v58 = vpop.f32.mrb[88].mxu0  ;;  %v9604_v27 = vpop.f32.mrb[88].mxu1  ;;  %5643 = vmatpush1.bf16.msra.mxu0 %v7338_v59  ;;  %5869 = vmatpush1.bf16.msra.mxu1 %v7341_v7  ;;  %v7352_v7 = vld [vmem:[#allocation7 + $0x144] ss:$16 sps:$4 sm:$0xff]   ;;  %v7355_v59 = vld [vmem:[#allocation7 + $0x14c] ss:$16 sps:$4 sm:$0xff]  }
 0x4fd   :  { %v4239_v8 = vadd.f32 %v4238_v25, %v9602_v58  ;;  %v4281_v51 = vadd.f32 %v4280_v52, %v9604_v27  ;;  %v9608_v60 = vpop.f32.mrb[89].mxu0  ;;  %v9610_v54 = vpop.f32.mrb[89].mxu1 }
 0x4fe   :  { %10765 = vst [vmem:[#allocation53_spill] sm:$0xff] %v9608_v60  ;;  %10766 = vst [vmem:[#allocation44_spill] sm:$0xff] %v9610_v54  ;;  %v4260_v56 = vadd.f32 %v4259_v10, %v9608_v60  ;;  %v4302_v57 = vadd.f32 %v4301_v35, %v9610_v54  ;;  %v9614_v12 = vpop.f32.mrb[90].mxu0  ;;  %v9616_v4 = vpop.f32.mrb[90].mxu1  ;;  %v7346_v35 = vld [vmem:[#allocation7 + $0x124] ss:$16 sps:$4 sm:$0xff]  }
 0x4ff   :  { %v4240_v25 = vadd.f32 %v4239_v8, %v9614_v12  ;;  %v4282_v52 = vadd.f32 %v4281_v51, %v9616_v4  ;;  %v9620_v34 = vpop.f32.mrb[91].mxu0  ;;  %v9622_v44 = vpop.f32.mrb[91].mxu1  ;;  %v7349_v54 = vld [vmem:[#allocation7 + $0x12c] ss:$16 sps:$4 sm:$0xff]   ;;  %5644 = vmatprep.subr.bf16.mxu0 %v7346_v35 }
 0x500   :  { %10767 = vst [vmem:[#allocation54_spill] sm:$0xff] %v9620_v34  ;;  %10768 = vst [vmem:[#allocation24_spill] sm:$0xff] %v9622_v44  ;;  %v4261_v43 = vadd.f32 %v4260_v56, %v9620_v34  ;;  %v4303_v10 = vadd.f32 %v4302_v57, %v9622_v44  ;;  %5870 = vmatprep.subr.bf16.mxu1 %v7349_v54  ;;  %5645 = vmatpush1.bf16.msra.mxu0 %v7344_v28  ;;  %v7350_v28 = vld [vmem:[#allocation7 + $0x140] ss:$16 sps:$4 sm:$0xff]  }
 0x501   :  { %5871 = vmatpush1.bf16.msra.mxu1 %v7347_v9  ;;  %5646 = vmatprep.subr.bf16.mxu0 %v7352_v7  ;;  %v7358_v9 = vld [vmem:[#allocation7 + $0x164] ss:$16 sps:$4 sm:$0xff]  }
 0x502   :  { %5872 = vmatprep.subr.bf16.mxu1 %v7355_v59 }
 0x504   :  { %v9626_v8 = vpop.f32.mrb[92].mxu0  ;;  %v9628_v51 = vpop.f32.mrb[92].mxu1  ;;  %5647 = vmatpush1.bf16.msra.mxu0 %v7350_v28  ;;  %v7365_v28 = vld [vmem:[#allocation7 + $0x188] ss:$16 sps:$4 sm:$0xff]  }
 0x505   :  { %v4241_v18 = vadd.f32 %v4240_v25, %v9626_v8  ;;  %v4283_v39 = vadd.f32 %v4282_v52, %v9628_v51  ;;  %v9632_v56 = vpop.f32.mrb[93].mxu0  ;;  %v9634_v57 = vpop.f32.mrb[93].mxu1  ;;  %5873 = vmatpush1.bf16.msra.mxu1 %v7353_v45  ;;  %5648 = vmatprep.subr.bf16.mxu0 %v7358_v9  ;;  %v7373_v9 = vld [vmem:[#allocation7 + $0x1ac] ss:$16 sps:$4 sm:$0xff]  }
 0x506   :  { %10769 = vst [vmem:[#allocation26_spill] sm:$0xff] %v9632_v56  ;;  %10770 = vst [vmem:[#allocation28_spill] sm:$0xff] %v9634_v57  ;;  %v4262_v44 = vadd.f32 %v4261_v43, %v9632_v56  ;;  %v4304_v54 = vadd.f32 %v4303_v10, %v9634_v57  ;;  %v9638_v35 = vpop.f32.mrb[94].mxu0  ;;  %v9640_v14 = vpop.f32.mrb[94].mxu1  ;;  %v7356_v57 = vld [vmem:[#allocation7 + $0x160] ss:$16 sps:$4 sm:$0xff]   ;;  %5874 = vmatprep.subr.bf16.mxu1 %v7361_v1 }
 0x507   :  { %v4242_v25 = vadd.f32 %v4241_v18, %v9638_v35  ;;  %v4284_v52 = vadd.f32 %v4283_v39, %v9640_v14  ;;  %v9644_v5 = vpop.f32.mrb[95].mxu0  ;;  %v9646_v15 = vpop.f32.mrb[95].mxu1  ;;  %v7359_v18 = vld [vmem:[#allocation7 + $0x168] ss:$16 sps:$4 sm:$0xff]   ;;  %v7364_v39 = vld [vmem:[#allocation7 + $0x184] ss:$16 sps:$4 sm:$0xff]  }
 0x508   :  { %10771 = vst [vmem:[#allocation32_spill] sm:$0xff] %v9644_v5  ;;  %10772 = vst [vmem:[#allocation55_spill] sm:$0xff] %v9646_v15  ;;  %v4263_v43 = vadd.f32 %v4262_v44, %v9644_v5  ;;  %v4305_v10 = vadd.f32 %v4304_v54, %v9646_v15  ;;  %5649 = vmatpush1.bf16.msra.mxu0 %v7356_v57  ;;  %v7362_v44 = vld [vmem:[#allocation7 + $0x180] ss:$16 sps:$4 sm:$0xff]   ;;  %v7370_v15 = vld [vmem:[#allocation7 + $0x1a4] ss:$16 sps:$4 sm:$0xff]  }
 0x509   :  { %v4243_v56 = vrot.slane %v4242_v25, 4  ;;  %v4285_v34 = vrot.slane %v4284_v52, 4  ;;  %5875 = vmatpush1.bf16.msra.mxu1 %v7359_v18  ;;  %5650 = vmatprep.subr.bf16.mxu0 %v7364_v39  ;;  %v7368_v1 = vld [vmem:[#allocation7 + $0x1a0] ss:$16 sps:$4 sm:$0xff]  }
 0x50a   :  { %v4264_v60 = vrot.slane %v4263_v43, 4  ;;  %v4306_v55 = vrot.slane %v4305_v10, 4  ;;  %5876 = vmatprep.subr.bf16.mxu1 %v7367_v11  ;;  %v7374_v18 = vld [vmem:[#allocation7 + $0x1c0] ss:$16 sps:$4 sm:$0xff]  }
 0x50b   :  { %v4244_v7 = vadd.f32 %v4243_v56, %v4242_v25  ;;  %v4286_v59 = vadd.f32 %v4285_v34, %v4284_v52  ;;  %v7371_v34 = vld [vmem:[#allocation7 + $0x1a8] ss:$16 sps:$4 sm:$0xff]   ;;  %v7379_v52 = vld [vmem:[#allocation7 + $0x1cc] ss:$16 sps:$4 sm:$0xff]  }
 0x50c   :  { %v4265_v17 = vadd.f32 %v4264_v60, %v4263_v43  ;;  %v4307_v45 = vadd.f32 %v4306_v55, %v4305_v10  ;;  %5651 = vmatpush1.bf16.msra.mxu0 %v7362_v44  ;;  %v7376_v60 = vld [vmem:[#allocation7 + $0x1c4] ss:$16 sps:$4 sm:$0xff]  }
 0x50d   :  { %v4245_v5 = vrot.slane %v4244_v7, 2  ;;  %v4287_v54 = vrot.slane %v4286_v59, 2  ;;  %5877 = vmatpush1.bf16.msra.mxu1 %v7365_v28  ;;  %5652 = vmatprep.subr.bf16.mxu0 %v7370_v15  ;;  %v7382_v15 = vld [vmem:[#allocation7 + $0x1e4] ss:$16 sps:$4 sm:$0xff]  }
 0x50e   :  { %v4266_v40 = vrot.slane %v4265_v17, 2  ;;  %v4308_v25 = vrot.slane %v4307_v45, 2  ;;  %5878 = vmatprep.subr.bf16.mxu1 %v7373_v9 }
 0x50f   :  { %v4246_v16 = vadd.f32 %v4245_v5, %v4244_v7  ;;  %v4288_v29 = vadd.f32 %v4287_v54, %v4286_v59  ;;  %v7377_v5 = vld [vmem:[#allocation7 + $0x1c8] ss:$16 sps:$4 sm:$0xff]  }
 0x510   :  { %v4267_v57 = vadd.f32 %v4266_v40, %v4265_v17  ;;  %5653 = vmatpush1.bf16.msra.mxu0 %v7368_v1  ;;  %v9650_v39 = vadd.f32 %v4308_v25, %v4307_v45  ;;  %v7385_v17 = vld [vmem:[#allocation7 + $0x1ec] ss:$16 sps:$4 sm:$0xff]  }
 0x511   :  { %v4247_v42 = vrot.slane %v4246_v16, 1  ;;  %v4289_v56 = vrot.slane %v4288_v29, 1  ;;  %5879 = vmatpush1.bf16.msra.mxu1 %v7371_v34  ;;  %5654 = vmatprep.subr.bf16.mxu0 %v7376_v60 }
 0x512   :  { %v4268_v10 = vrot.slane %v4267_v57, 1  ;;  %5880 = vmatprep.subr.bf16.mxu1 %v7379_v52  ;;  %v4310_v9 = vrot.slane %v9650_v39, 1 }
 0x513   :  { %v4248_v43 = vadd.f32 %v4247_v42, %v4246_v16  ;;  %v4290_v11 = vadd.f32 %v4289_v56, %v4288_v29 }
 0x514   :  { %5655 = vmatpush1.bf16.msra.mxu0 %v7374_v18 }
 0x515   :  { %v4312_v55 = vmul.f32 0.0078125, %v4248_v43  ;;  %5881 = vmatpush1.bf16.msra.mxu1 %v7377_v5  ;;  %5656 = vmatprep.subr.bf16.mxu0 %v7382_v15  ;;  %v4314_v45 = vmul.f32 0.0078125, %v4290_v11 }
 0x516   :  { %5882 = vmatprep.subr.bf16.mxu1 %v7385_v17 }
 0x517   :  { %v9653_v7 = vsub.f32 %v9458_v53, %v4312_v55  ;;  %v9656_v40 = vsub.f32 %v9466_v2, %v4312_v55  ;;  %v9659_v42 = vsub.f32 %v9482_v38, %v4312_v55  ;;  %v9662_v16 = vsub.f32 %v9494_v26, %v4312_v55  ;;  %v7380_v2 = vld [vmem:[#allocation7 + $0x1e0] ss:$16 sps:$4 sm:$0xff]  }
 0x518   :  { %v9665_v29 = vsub.f32 %v9506_v50, %v4312_v55  ;;  %v9668_v59 = vsub.f32 %v9518_v32, %v4312_v55  ;;  %v9671_v44 = vsub.f32 %v9530_v0, %v4312_v55  ;;  %v9674_v53 = vsub.f32 %v9542_v13, %v4312_v55  ;;  %v7383_v0 = vld [vmem:[#allocation7 + $0x1e8] ss:$16 sps:$4 sm:$0xff]   ;;  %5657 = vmatpush1.bf16.msra.mxu0 %v7380_v2 }
 0x519   :  { %v9677_v38 = vsub.f32 %v9554_v63, %v4312_v55  ;;  %v9680_v26 = vsub.f32 %v9566_v3, %v4312_v55  ;;  %v9683_v50 = vsub.f32 %v9578_v36, %v4312_v55  ;;  %v9686_v32 = vsub.f32 %v9590_v37, %v4312_v55  ;;  %v7388_v36 = vld [vmem:[#allocation7 + $0x204] ss:$16 sps:$4 sm:$0xff]   ;;  %5883 = vmatpush1.bf16.msra.mxu1 %v7383_v0 }
 0x51a   :  { %10773 = vst [vmem:[#allocation18_spill] sm:$0xff] %v9674_v53  ;;  %v9689_v54 = vsub.f32 %v9602_v58, %v4312_v55  ;;  %v9692_v13 = vsub.f32 %v9614_v12, %v4312_v55  ;;  %v9695_v63 = vsub.f32 %v9626_v8, %v4312_v55  ;;  %v9698_v3 = vsub.f32 %v9638_v35, %v4312_v55  ;;  %v7391_v58 = vld [vmem:[#allocation7 + $0x20c] ss:$16 sps:$4 sm:$0xff]  }
 0x51b   :  { %10774 = vst [vmem:[#allocation30_spill] sm:$0xff] %v9677_v38  ;;  %10775 = vst [vmem:[#allocation56_spill] sm:$0xff] %v9680_v26  ;;  %v4380_v37 = vmul.f32 %v9653_v7, %v9653_v7  ;;  %v4384_v28 = vmul.f32 %v9656_v40, %v9656_v40  ;;  %v4388_v12 = vmul.f32 %v9659_v42, %v9659_v42  ;;  %5739 = vmatprep.subr.bf16.mxu0 %v7388_v36 }
 0x51c   :  { %10776 = vst [vmem:[#allocation57_spill] sm:$0xff] %v9683_v50  ;;  %10777 = vst [vmem:[#allocation58_spill] sm:$0xff] %v9686_v32  ;;  %v4392_v8 = vmul.f32 %v9662_v16, %v9662_v16  ;;  %v4269_v35 = vadd.f32 %v4268_v10, %v4267_v57  ;;  %v9710_v34 = vsub.f32 %v9460_v46, %v4314_v45  ;;  %5965 = vmatprep.subr.bf16.mxu1 %v7391_v58 }
 0x51d   :  { %10778 = vst [vmem:[#allocation20_spill] sm:$0xff] %v9689_v54  ;;  %10779 = vst [vmem:[#allocation59_spill] sm:$0xff] %v9692_v13  ;;  %v4444_v1 = vadd.f32 %v4384_v28, %v4380_v37  ;;  %v9713_v60 = vsub.f32 %v9468_v31, %v4314_v45  ;;  %v9716_v56 = vsub.f32 %v9484_v61, %v4314_v45 }
 0x51e   :  { %10780 = vst [vmem:[#allocation22_spill] sm:$0xff] %v9710_v34  ;;  %v9719_v25 = vsub.f32 %v9496_v19, %v4314_v45  ;;  %v9722_v52 = vsub.f32 %v9508_v41, %v4314_v45  ;;  %v9725_v57 = vsub.f32 %v9520_v21, %v4314_v45  ;;  %v9728_v43 = vsub.f32 %v9532_v23, %v4314_v45 }
 0x51f   :  { %10781 = vst [vmem:[#allocation60_spill] sm:$0xff] %v9713_v60  ;;  %10782 = vst [vmem:[#allocation61_spill] sm:$0xff] %v9716_v56  ;;  %v4445_v46 = vadd.f32 %v4444_v1, %v4388_v12  ;;  %v9731_v31 = vsub.f32 %v9544_v20, %v4314_v45  ;;  %v9734_v61 = vsub.f32 %v9556_v6, %v4314_v45  ;;  %v10792_v1 = vld [vmem:[#allocation21_spill] sm:$0xff] }
 0x520   :  { %10783 = vst [vmem:[#allocation23_spill] sm:$0xff] %v9719_v25  ;;  %10784 = vst [vmem:[#allocation27_spill] sm:$0xff] %v9722_v52  ;;  %v9737_v18 = vsub.f32 %v9568_v22, %v4314_v45  ;;  %v9740_v19 = vsub.f32 %v9580_v33, %v4314_v45  ;;  %v9743_v41 = vsub.f32 %v9592_v62, %v4314_v45 }
 0x521   :  { %10785 = vst [vmem:[#allocation31_spill] sm:$0xff] %v9725_v57  ;;  %10786 = vst [vmem:[#allocation35_spill] sm:$0xff] %v9728_v43  ;;  %v9746_v21 = vsub.f32 %v9604_v27, %v4314_v45  ;;  %v9749_v23 = vsub.f32 %v9616_v4, %v4314_v45  ;;  %v4396_v20 = vmul.f32 %v9665_v29, %v9665_v29  ;;  %v4313_v27 = vmul.f32 0.0078125, %v4269_v35  ;;  %v10791_v35 = vld [vmem:[#allocation17_spill] sm:$0xff] }
 0x522   :  { %10787 = vst [vmem:[#allocation38_spill] sm:$0xff] %v9731_v31  ;;  %10788 = vst [vmem:[#allocation40_spill] sm:$0xff] %v9734_v61  ;;  %v4446_v6 = vadd.f32 %v4445_v46, %v4392_v8  ;;  %v9754_v55 = vsub.f32 %v9628_v51, %v4314_v45  ;;  %v9757_v22 = vsub.f32 %v9640_v14, %v4314_v45  ;;  %v10793_v46 = vld [vmem:[#allocation29_spill] sm:$0xff] }
 0x523   :  { %10789 = vst [vmem:[#allocation48_spill] sm:$0xff] %v9737_v18  ;;  %10790 = vst [vmem:[#allocation46_spill] sm:$0xff] %v9740_v19  ;;  %v4382_v33 = vmul.f32 %v9710_v34, %v9710_v34  ;;  %v4386_v62 = vmul.f32 %v9713_v60, %v9713_v60  ;;  %v4400_v4 = vmul.f32 %v9668_v59, %v9668_v59 }
 0x524   :  { %v4447_v5 = vadd.f32 %v4446_v6, %v4396_v20  ;;  %v4404_v11 = vmul.f32 %v9671_v44, %v9671_v44  ;;  %v4408_v51 = vmul.f32 %v9674_v53, %v9674_v53  ;;  %v4311_v14 = vadd.f32 %v4310_v9, %v9650_v39  ;;  %v10794_v6 = vld [vmem:[#allocation37_spill] sm:$0xff] }
 0x525   :  { %v4412_v10 = vmul.f32 %v9677_v38, %v9677_v38  ;;  %v4390_v17 = vmul.f32 %v9716_v56, %v9716_v56  ;;  %v4394_v2 = vmul.f32 %v9719_v25, %v9719_v25  ;;  %v4398_v0 = vmul.f32 %v9722_v52, %v9722_v52  ;;  %v10813_v25 = vld [vmem:[#allocation39_spill] sm:$0xff]  ;;  %v10818_v38 = vld [vmem:[#allocation44_spill] sm:$0xff] }
 0x526   :  { %v4448_v15 = vadd.f32 %v4447_v5, %v4400_v4  ;;  %v4486_v36 = vadd.f32 %v4386_v62, %v4382_v33  ;;  %v9779_v37 = vsub.f32 %v9462_v48, %v4313_v27  ;;  %v9782_v28 = vsub.f32 %v9474_v47, %v4313_v27  ;;  %v10795_v33 = vld [vmem:[#allocation45_spill] sm:$0xff]  ;;  %v10797_v5 = vld [vmem:[#allocation51_spill] sm:$0xff] }
 0x527   :  { %v9785_v45 = vsub.f32 %v9488_v49, %v4313_v27  ;;  %v9788_v58 = vsub.f32 %v9500_v30, %v4313_v27  ;;  %v9791_v12 = vsub.f32 %v9512_v24, %v4313_v27  ;;  %v9794_v9 = vsub.f32 %v10791_v35, %v4313_v27  ;;  %v10796_v62 = vld [vmem:[#allocation41_spill] sm:$0xff]  ;;  %v10815_v56 = vld [vmem:[#allocation47_spill] sm:$0xff] }
 0x528   :  { %v4449_v39 = vadd.f32 %v4448_v15, %v4404_v11  ;;  %v4487_v8 = vadd.f32 %v4486_v36, %v4390_v17  ;;  %v9797_v48 = vsub.f32 %v10792_v1, %v4313_v27  ;;  %v9800_v47 = vsub.f32 %v10793_v46, %v4313_v27  ;;  %v10798_v15 = vld [vmem:[#allocation53_spill] sm:$0xff]  ;;  %v10799_v36 = vld [vmem:[#allocation54_spill] sm:$0xff] }
 0x529   :  { %v9803_v49 = vsub.f32 %v10794_v6, %v4313_v27  ;;  %v9806_v30 = vsub.f32 %v10795_v33, %v4313_v27  ;;  %v9809_v24 = vsub.f32 %v10796_v62, %v4313_v27  ;;  %v9812_v11 = vsub.f32 %v10797_v5, %v4313_v27  ;;  %v10800_v1 = vld [vmem:[#allocation26_spill] sm:$0xff]  ;;  %v10801_v6 = vld [vmem:[#allocation32_spill] sm:$0xff] }
 0x52a   :  { %v4450_v20 = vadd.f32 %v4449_v39, %v4408_v51  ;;  %v4488_v4 = vadd.f32 %v4487_v8, %v4394_v2  ;;  %v9815_v17 = vsub.f32 %v10798_v15, %v4313_v27  ;;  %v9818_v35 = vsub.f32 %v10799_v36, %v4313_v27 }
 0x52b   :  { %v4416_v51 = vmul.f32 %v9680_v26, %v9680_v26  ;;  %v9823_v46 = vsub.f32 %v10800_v1, %v4313_v27  ;;  %v9826_v33 = vsub.f32 %v10801_v6, %v4313_v27  ;;  %v4402_v2 = vmul.f32 %v9725_v57, %v9725_v57  ;;  %v10816_v26 = vld [vmem:[#allocation49_spill] sm:$0xff] }
 0x52c   :  { %v4451_v39 = vadd.f32 %v4450_v20, %v4412_v10  ;;  %v4489_v8 = vadd.f32 %v4488_v4, %v4398_v0  ;;  %v4315_v62 = vmul.f32 0.0078125, %v4311_v14  ;;  %v4420_v5 = vmul.f32 %v9683_v50, %v9683_v50 }
 0x52d   :  { %v4381_v36 = vmul.f32 %v9779_v37, %v9779_v37  ;;  %v4385_v10 = vmul.f32 %v9782_v28, %v9782_v28  ;;  %v4424_v20 = vmul.f32 %v9686_v32, %v9686_v32  ;;  %v4428_v27 = vmul.f32 %v9689_v54, %v9689_v54 }
 0x52e   :  { %v4452_v15 = vadd.f32 %v4451_v39, %v4416_v51  ;;  %v4406_v0 = vmul.f32 %v9728_v43, %v9728_v43  ;;  %v4490_v14 = vadd.f32 %v4489_v8, %v4402_v2  ;;  %v4410_v51 = vmul.f32 %v9731_v31, %v9731_v31  ;;  %v10803_v43 = vld [vmem:[#allocation50_spill] sm:$0xff] }
 0x52f   :  { %v4414_v39 = vmul.f32 %v9734_v61, %v9734_v61  ;;  %v4418_v1 = vmul.f32 %v9737_v18, %v9737_v18  ;;  %v4422_v6 = vmul.f32 %v9740_v19, %v9740_v19  ;;  %v4389_v54 = vmul.f32 %v9785_v45, %v9785_v45  ;;  %v10805_v18 = vld [vmem:[#allocation52_spill] sm:$0xff]  ;;  %v10806_v19 = vld [vmem:[#allocation15_spill] sm:$0xff] }
 0x530   :  { %v4453_v4 = vadd.f32 %v4452_v15, %v4420_v5  ;;  %v4491_v57 = vadd.f32 %v4490_v14, %v4406_v0  ;;  %v4393_v2 = vmul.f32 %v9788_v58, %v9788_v58  ;;  %v4465_v5 = vadd.f32 %v4385_v10, %v4381_v36  ;;  %v10802_v15 = vld [vmem:[#allocation42_spill] sm:$0xff]  ;;  %v10807_v14 = vld [vmem:[#allocation16_spill] sm:$0xff]  ;;  %v10809_v10 = vld [vmem:[#allocation19_spill] sm:$0xff] }
 0x531   :  { %v9855_v31 = vsub.f32 %v10802_v15, %v4315_v62  ;;  %v9858_v61 = vsub.f32 %v10803_v43, %v4315_v62  ;;  %v9861_v32 = vsub.f32 %v10805_v18, %v4315_v62  ;;  %v9864_v0 = vsub.f32 %v10806_v19, %v4315_v62  ;;  %v10811_v15 = vld [vmem:[#allocation25_spill] sm:$0xff] }
 0x532   :  { %v4454_v8 = vadd.f32 %v4453_v4, %v4424_v20  ;;  %v4492_v52 = vadd.f32 %v4491_v57, %v4410_v51  ;;  %v9867_v50 = vsub.f32 %v10807_v14, %v4315_v62  ;;  %v4397_v20 = vmul.f32 %v9791_v12, %v9791_v12  ;;  %v10812_v51 = vld [vmem:[#allocation33_spill] sm:$0xff] }
 0x533   :  { %10804 = vst [vmem:[#allocation17_spill] sm:$0xff] %v9858_v61  ;;  %v4466_v36 = vadd.f32 %v4465_v5, %v4389_v54  ;;  %v9872_v4 = vsub.f32 %v10809_v10, %v4315_v62  ;;  %v9875_v43 = vsub.f32 %v10811_v15, %v4315_v62  ;;  %v9878_v18 = vsub.f32 %v10812_v51, %v4315_v62  ;;  %v10817_v5 = vld [vmem:[#allocation43_spill] sm:$0xff] }
 0x534   :  { %10808 = vst [vmem:[#allocation21_spill] sm:$0xff] %v9867_v50  ;;  %v4493_v57 = vadd.f32 %v4492_v52, %v4414_v39  ;;  %v9881_v19 = vsub.f32 %v10813_v25, %v4315_v62  ;;  %v9884_v14 = vsub.f32 %v10815_v56, %v4315_v62  ;;  %v4455_v60 = vadd.f32 %v4454_v8, %v4428_v27  ;;  %v10820_v39 = vld [vmem:[#allocation24_spill] sm:$0xff] }
 0x535   :  { %10810 = vst [vmem:[#allocation29_spill] sm:$0xff] %v9872_v4  ;;  %v4467_v34 = vadd.f32 %v4466_v36, %v4393_v2  ;;  %v9887_v54 = vsub.f32 %v10816_v26, %v4315_v62  ;;  %v9890_v10 = vsub.f32 %v10817_v5, %v4315_v62  ;;  %v9893_v52 = vsub.f32 %v10818_v38, %v4315_v62  ;;  %v10822_v25 = vld [vmem:[#allocation28_spill] sm:$0xff]  ;;  %v10824_v2 = vld [vmem:[#allocation55_spill] sm:$0xff] }
 0x536   :  { %10814 = vst [vmem:[#allocation37_spill] sm:$0xff] %v9881_v19  ;;  %v4494_v15 = vadd.f32 %v4493_v57, %v4418_v1  ;;  %v9896_v51 = vsub.f32 %v10820_v39, %v4315_v62  ;;  %v9899_v53 = vsub.f32 %v10822_v25, %v4315_v62  ;;  %v4432_v56 = vmul.f32 %v9692_v13, %v9692_v13 }
 0x537   :  { %10819 = vst [vmem:[#allocation45_spill] sm:$0xff] %v9893_v52  ;;  %v4401_v26 = vmul.f32 %v9794_v9, %v9794_v9  ;;  %v4468_v27 = vadd.f32 %v4467_v34, %v4397_v20  ;;  %v9906_v8 = vsub.f32 %v10824_v2, %v4315_v62  ;;  %v4426_v38 = vmul.f32 %v9743_v41, %v9743_v41 }
 0x538   :  { %10821 = vst [vmem:[#allocation41_spill] sm:$0xff] %v9896_v51  ;;  %10823 = vst [vmem:[#allocation51_spill] sm:$0xff] %v9899_v53  ;;  %v4495_v1 = vadd.f32 %v4494_v15, %v4422_v6  ;;  %v4456_v36 = vadd.f32 %v4455_v60, %v4432_v56  ;;  %v4405_v57 = vmul.f32 %v9797_v48, %v9797_v48 }
 0x539   :  { %10825 = vst [vmem:[#allocation53_spill] sm:$0xff] %v9906_v8  ;;  %v4469_v5 = vadd.f32 %v4468_v27, %v4401_v26  ;;  %v4430_v39 = vmul.f32 %v9746_v21, %v9746_v21  ;;  %v4383_v13 = vmul.f32 %v9855_v31, %v9855_v31  ;;  %v4387_v34 = vmul.f32 %v9858_v61, %v9858_v61 }
 0x53a   :  { %v4496_v25 = vadd.f32 %v4495_v1, %v4426_v38  ;;  %v4436_v62 = vmul.f32 %v9695_v63, %v9695_v63  ;;  %v4409_v60 = vmul.f32 %v9800_v47, %v9800_v47  ;;  %v4434_v20 = vmul.f32 %v9749_v23, %v9749_v23 }
 0x53b   :  { %v4470_v6 = vadd.f32 %v4469_v5, %v4405_v57  ;;  %v4413_v26 = vmul.f32 %v9803_v49, %v9803_v49  ;;  %v4391_v38 = vmul.f32 %v9861_v32, %v9861_v32  ;;  %v4507_v1 = vadd.f32 %v4387_v34, %v4383_v13 }
 0x53c   :  { %v4497_v15 = vadd.f32 %v4496_v25, %v4430_v39  ;;  %v4457_v56 = vadd.f32 %v4456_v36, %v4436_v62  ;;  %v4440_v61 = vmul.f32 %v9698_v3, %v9698_v3  ;;  %v4417_v57 = vmul.f32 %v9806_v30, %v9806_v30 }
 0x53d   :  { %v4471_v27 = vadd.f32 %v4470_v6, %v4409_v60  ;;  %v4438_v39 = vmul.f32 %v9754_v55, %v9754_v55  ;;  %v4395_v36 = vmul.f32 %v9864_v0, %v9864_v0  ;;  %v4508_v25 = vadd.f32 %v4507_v1, %v4391_v38 }
 0x53e   :  { %v4498_v2 = vadd.f32 %v4497_v15, %v4434_v20  ;;  %v4458_v62 = vadd.f32 %v4457_v56, %v4440_v61  ;;  %v4421_v60 = vmul.f32 %v9809_v24, %v9809_v24  ;;  %v4399_v34 = vmul.f32 %v9867_v50, %v9867_v50 }
 0x53f   :  { %v4472_v5 = vadd.f32 %v4471_v27, %v4413_v26  ;;  %v4509_v20 = vadd.f32 %v4508_v25, %v4395_v36  ;;  %v4425_v15 = vmul.f32 %v9812_v11, %v9812_v11  ;;  %v4442_v27 = vmul.f32 %v9757_v22, %v9757_v22 }
 0x540   :  { %v4499_v13 = vadd.f32 %v4498_v2, %v4438_v39  ;;  %v4403_v38 = vmul.f32 %v9872_v4, %v9872_v4  ;;  %v4459_v56 = vrot.slane %v4458_v62, 4  ;;  %v4429_v1 = vmul.f32 %v9815_v17, %v9815_v17 }
 0x541   :  { %v4473_v6 = vadd.f32 %v4472_v5, %v4417_v57  ;;  %v4510_v61 = vadd.f32 %v4509_v20, %v4399_v34  ;;  %v4407_v5 = vmul.f32 %v9875_v43, %v9875_v43  ;;  %v4433_v36 = vmul.f32 %v9818_v35, %v9818_v35 }
 0x542   :  { %v4500_v57 = vadd.f32 %v4499_v13, %v4442_v27  ;;  %v4460_v4 = vadd.f32 %v4459_v56, %v4458_v62  ;;  %v4437_v34 = vmul.f32 %v9823_v46, %v9823_v46  ;;  %v4415_v13 = vmul.f32 %v9881_v19, %v9881_v19 }
 0x543   :  { %v4474_v26 = vadd.f32 %v4473_v6, %v4421_v60  ;;  %v4511_v39 = vadd.f32 %v4510_v61, %v4403_v38  ;;  %v4411_v60 = vmul.f32 %v9878_v18, %v9878_v18  ;;  %v4419_v38 = vmul.f32 %v9884_v14, %v9884_v14 }
 0x544   :  { %v4501_v50 = vrot.slane %v4500_v57, 4  ;;  %v4423_v56 = vmul.f32 %v9887_v54, %v9887_v54 }
 0x545   :  { %v4475_v2 = vadd.f32 %v4474_v26, %v4425_v15  ;;  %v4512_v6 = vadd.f32 %v4511_v39, %v4407_v5  ;;  %v4441_v26 = vmul.f32 %v9826_v33, %v9826_v33 }
 0x546   :  { %v4502_v62 = vadd.f32 %v4501_v50, %v4500_v57  ;;  %v4435_v50 = vmul.f32 %v9896_v51, %v9896_v51 }
 0x547   :  { %v4476_v25 = vadd.f32 %v4475_v2, %v4429_v1  ;;  %v4513_v15 = vadd.f32 %v4512_v6, %v4411_v60  ;;  %v4461_v1 = vrot.slane %v4460_v4, 2 }
 0x548   :  { %v4503_v19 = vrot.slane %v4502_v62, 2 }
 0x549   :  { %v4477_v20 = vadd.f32 %v4476_v25, %v4433_v36  ;;  %v4514_v61 = vadd.f32 %v4513_v15, %v4415_v13  ;;  %v4427_v36 = vmul.f32 %v9890_v10, %v9890_v10  ;;  %v4462_v60 = vadd.f32 %v4461_v1, %v4460_v4 }
 0x54a   :  { %v4443_v4 = vmul.f32 %v9906_v8, %v9906_v8 }
 0x54b   :  { %v4478_v27 = vadd.f32 %v4477_v20, %v4437_v34  ;;  %v4515_v5 = vadd.f32 %v4514_v61, %v4419_v38  ;;  %v4431_v34 = vmul.f32 %v9893_v52, %v9893_v52  ;;  %v4463_v15 = vrot.slane %v4462_v60, 1 }
 0x54c   :  { %v4439_v38 = vmul.f32 %v9899_v53, %v9899_v53 }
 0x54d   :  { %v4479_v2 = vadd.f32 %v4478_v27, %v4441_v26  ;;  %v4516_v25 = vadd.f32 %v4515_v5, %v4423_v56  ;;  %v4504_v27 = vadd.f32 %v4503_v19, %v4502_v62 }
 0x54f   :  { %v4480_v39 = vrot.slane %v4479_v2, 4  ;;  %v4517_v20 = vadd.f32 %v4516_v25, %v4427_v36  ;;  %v4505_v5 = vrot.slane %v4504_v27, 1 }
 0x551   :  { %v4481_v6 = vadd.f32 %v4480_v39, %v4479_v2  ;;  %v4518_v57 = vadd.f32 %v4517_v20, %v4431_v34  ;;  %v4464_v2 = vadd.f32 %v4463_v15, %v4462_v60  ;;  %v4506_v51 = vadd.f32 %v4505_v5, %v4504_v27  ;;  %v4226_v5 = vld [vmem:[%s10349_s9] sm:$0xf] }
 0x553   :  { %v4482_v13 = vrot.slane %v4481_v6, 2  ;;  %v4519_v61 = vadd.f32 %v4518_v57, %v4435_v50  ;;  %v4528_v52 = vmul.f32 0.0078125, %v4464_v2  ;;  %v4530_v62 = vmul.f32 0.0078125, %v4506_v51 }
 0x555   :  { %v4483_v26 = vadd.f32 %v4482_v13, %v4481_v6  ;;  %v4520_v1 = vadd.f32 %v4519_v61, %v4439_v38  ;;  %v4532_v19 = vadd.f32 1e-05, %v4528_v52  ;;  %v4534_v57 = vadd.f32 1e-05, %v4530_v62 }
 0x557   :  { %v4484_v56 = vrot.slane %v4483_v26, 1  ;;  %v4521_v36 = vadd.f32 %v4520_v1, %v4443_v4  ;;  %7498 = vrsqrt.f32 %v4532_v19  ;;  %v10826_v4 = vld [vmem:[#allocation34_spill] sm:$0xff] }
 0x559   :  { %v4485_v39 = vadd.f32 %v4484_v56, %v4483_v26  ;;  %v4522_v25 = vrot.slane %v4521_v36, 4 }
 0x55b   :  { %v4529_v34 = vmul.f32 0.0078125, %v4485_v39  ;;  %v4523_v20 = vadd.f32 %v4522_v25, %v4521_v36  ;;  %v10827_v36 = vld [vmem:[#allocation36_spill] sm:$0xff] }
 0x55d   :  { %v4524_v6 = vrot.slane %v4523_v20, 2  ;;  %v4533_v13 = vadd.f32 1e-05, %v4529_v34  ;;  %v10828_v34 = vld [vmem:[#allocation12_spill] sm:$0xff] }
 0x55f   :  { %v4525_v53 = vadd.f32 %v4524_v6, %v4523_v20  ;;  %7500 = vrsqrt.f32 %v4533_v13 }
 0x560   :  { %7502 = vrsqrt.f32 %v4534_v57 }
 0x561   :  { %v4526_v50 = vrot.slane %v4525_v53, 1  ;;  %v7499_v15 = vpop.eup %7498 }
 0x563   :  { %v4527_v8 = vadd.f32 %v4526_v50, %v4525_v53 }
 0x565   :  { %v4531_v38 = vmul.f32 0.0078125, %v4527_v8  ;;  %v9983_v8 = vld [vmem:[%s10350_s10] sm:$0xf] }
 0x566   :  { %v9989_v25 = vrot.slane %v9983_v8, %v10827_v36  ;;  %v9993_v20 = vrot.slane %v9983_v8, %v10828_v34 }
 0x567   :  { %v4535_v60 = vadd.f32 1e-05, %v4531_v38 }
 0x569   :  { %7504 = vrsqrt.f32 %v4535_v60  ;;  %v7501_v26 = vpop.eup %7500 }
 0x56a   :  { %v4544_v61 = vcombine.low %v7499_v15, %v7501_v26  ;;  %v7503_v27 = vpop.eup %7502 }
 0x56c   :  { %v4552_v1 = vrot.slane %v4544_v61, %v10826_v4 }
 0x573   :  { %v7505_v56 = vpop.eup %7504 }
 0x574   :  { %v4545_v52 = vcombine.low %v7503_v27, %v7505_v56 }
 0x576   :  { %v4559_v51 = vrot.slane %v4545_v52, %v10826_v4 }
 0x578   :  { %v4560_v2 = vcombine.low %v4552_v1, %v4559_v51 }
 0x57a   :  { %v4567_v53 = vrot.slane %v4560_v2, %v10826_v4  ;;  %v7386_v2 = vld [vmem:[#allocation7 + $0x200] ss:$16 sps:$4 sm:$0xff]  }
 0x57c   :  { %v9985_v39 = vmul.f32 %v4567_v53, %v4226_v5  ;;  %v7389_v5 = vld [vmem:[#allocation7 + $0x208] ss:$16 sps:$4 sm:$0xff]  }
 0x57e   :  { %v9997_v6 = vrot.slane %v9985_v39, %v10827_v36  ;;  %v10001_v19 = vrot.slane %v9985_v39, %v10828_v34 }
 0x580   :  { %v4592_v62 = vmul.f32 %v10001_v19, %v9779_v37  ;;  %v4596_v13 = vmul.f32 %v10001_v19, %v9782_v28  ;;  %v4591_v50 = vmul.f32 %v9997_v6, %v9653_v7  ;;  %v4595_v57 = vmul.f32 %v9997_v6, %v9656_v40 }
 0x581   :  { %v4600_v38 = vmul.f32 %v10001_v19, %v9785_v45  ;;  %v4604_v60 = vmul.f32 %v10001_v19, %v9788_v58  ;;  %v4599_v28 = vmul.f32 %v9997_v6, %v9659_v42  ;;  %v4603_v45 = vmul.f32 %v9997_v6, %v9662_v16 }
 0x582   :  { %v4677_v15 = vadd.f32 %v9993_v20, %v4592_v62  ;;  %v4681_v26 = vadd.f32 %v9993_v20, %v4596_v13  ;;  %v4676_v37 = vadd.f32 %v9989_v25, %v4591_v50  ;;  %v4680_v7 = vadd.f32 %v9989_v25, %v4595_v57  ;;  %v7394_v50 = vld [vmem:[#allocation7 + $0x224] ss:$16 sps:$4 sm:$0xff]   ;;  %v7397_v57 = vld [vmem:[#allocation7 + $0x22c] ss:$16 sps:$4 sm:$0xff]  }
 0x583   :  { %v4685_v61 = vadd.f32 %v9993_v20, %v4600_v38  ;;  %v4689_v40 = vadd.f32 %v9993_v20, %v4604_v60  ;;  %v4608_v42 = vmul.f32 %v10001_v19, %v9791_v12  ;;  %v4612_v53 = vmul.f32 %v10001_v19, %v9794_v9  ;;  %v7392_v12 = vld [vmem:[#allocation7 + $0x220] ss:$16 sps:$4 sm:$0xff]   ;;  %v7395_v9 = vld [vmem:[#allocation7 + $0x228] ss:$16 sps:$4 sm:$0xff]  }
 0x584   :  { %v4741_v27 = vmax.f32 %v4677_v15, 0.0  ;;  %v4745_v58 = vmax.f32 %v4681_v26, 0.0  ;;  %v4740_v56 = vmax.f32 %v4676_v37, 0.0  ;;  %v4744_v4 = vmax.f32 %v4680_v7, 0.0  ;;  %v7400_v26 = vld [vmem:[#allocation7 + $0x244] ss:$16 sps:$4 sm:$0xff]  }
 0x585   :  { %v4749_v1 = vmax.f32 %v4685_v61, 0.0  ;;  %v4753_v52 = vmax.f32 %v4689_v40, 0.0  ;;  %v4684_v13 = vadd.f32 %v9989_v25, %v4599_v28  ;;  %v4688_v16 = vadd.f32 %v9989_v25, %v4603_v45  ;;  %v7403_v37 = vld [vmem:[#allocation7 + $0x24c] ss:$16 sps:$4 sm:$0xff]  }
 0x586   :  { %v4805_v51 = vpack.c.bf16 %v4745_v58, %v4741_v27  ;;  %v4804_v62 = vpack.c.bf16 %v4744_v4, %v4740_v56  ;;  %v4693_v60 = vadd.f32 %v9993_v20, %v4608_v42  ;;  %v4697_v15 = vadd.f32 %v9993_v20, %v4612_v53  ;;  %v7398_v4 = vld [vmem:[#allocation7 + $0x240] ss:$16 sps:$4 sm:$0xff]   ;;  %v7407_v53 = vld [vmem:[#allocation7 + $0x268] ss:$16 sps:$4 sm:$0xff]  }
 0x587   :  { %v4809_v38 = vpack.c.bf16 %v4753_v52, %v4749_v1  ;;  %v4748_v28 = vmax.f32 %v4684_v13, 0.0  ;;  %v4752_v7 = vmax.f32 %v4688_v16, 0.0  ;;  %v4607_v61 = vmul.f32 %v9997_v6, %v9665_v29  ;;  %v7401_v1 = vld [vmem:[#allocation7 + $0x248] ss:$16 sps:$4 sm:$0xff]   ;;  %v7404_v42 = vld [vmem:[#allocation7 + $0x260] ss:$16 sps:$4 sm:$0xff]  }
 0x588   :  { %5658 = vmatprep.mubr.bf16.mxu0 %v4805_v51  ;;  %5884 = vmatprep.mubr.bf16.mxu1 %v4805_v51  ;;  %v4611_v40 = vmul.f32 %v9997_v6, %v9668_v59  ;;  %v4757_v45 = vmax.f32 %v4693_v60, 0.0  ;;  %v4761_v27 = vmax.f32 %v4697_v15, 0.0  ;;  %v4616_v58 = vmul.f32 %v10001_v19, %v9797_v48  ;;  %v7406_v51 = vld [vmem:[#allocation7 + $0x264] ss:$16 sps:$4 sm:$0xff]   ;;  %v7415_v13 = vld [vmem:[#allocation7 + $0x28c] ss:$16 sps:$4 sm:$0xff]  }
 0x589   :  { %5659 = vmatmul.mubr.bf16.vlgmr.msra.gmra.mrb[96].mxu0 %v4804_v62  ;;  %5885 = vmatmul.mubr.bf16.vlgmr.msra.gmra.mrb[96].mxu1 %v4804_v62  ;;  %v4620_v56 = vmul.f32 %v10001_v19, %v9800_v47  ;;  %v4808_v29 = vpack.c.bf16 %v4752_v7, %v4748_v28  ;;  %v4692_v52 = vadd.f32 %v9989_v25, %v4607_v61  ;;  %v7412_v62 = vld [vmem:[#allocation7 + $0x284] ss:$16 sps:$4 sm:$0xff]   ;;  %v7413_v28 = vld [vmem:[#allocation7 + $0x288] ss:$16 sps:$4 sm:$0xff]  }
 0x58a   :  { %5740 = vmatpush1.bf16.msra.mxu0 %v7386_v2  ;;  %5966 = vmatpush1.bf16.msra.mxu1 %v7389_v5  ;;  %v4696_v59 = vadd.f32 %v9989_v25, %v4611_v40  ;;  %v7409_v2 = vld [vmem:[#allocation7 + $0x26c] ss:$16 sps:$4 sm:$0xff]   ;;  %v4813_v5 = vpack.c.bf16 %v4761_v27, %v4757_v45  ;;  %v4701_v48 = vadd.f32 %v9993_v20, %v4616_v58  ;;  %v7418_v27 = vld [vmem:[#allocation7 + $0x2a4] ss:$16 sps:$4 sm:$0xff]  }
 0x58b   :  { %5668 = vmatprep.mubr.bf16.mxu0 %v4809_v38  ;;  %5894 = vmatprep.mubr.bf16.mxu1 %v4809_v38  ;;  %v4705_v47 = vadd.f32 %v9993_v20, %v4620_v56  ;;  %v4756_v16 = vmax.f32 %v4692_v52, 0.0  ;;  %v10829_v38 = vld [vmem:[#allocation18_spill] sm:$0xff]  ;;  %v10830_v40 = vld [vmem:[#allocation13_spill] sm:$0xff] }
 0x58c   :  { %5741 = vmatprep.subr.bf16.mxu0 %v7394_v50  ;;  %5967 = vmatprep.subr.bf16.mxu1 %v7397_v57  ;;  %v4760_v50 = vmax.f32 %v4696_v59, 0.0  ;;  %v4615_v57 = vmul.f32 %v9997_v6, %v9671_v44  ;;  %v4619_v60 = vmul.f32 %v9997_v6, %v10829_v38  ;;  %v4765_v15 = vmax.f32 %v4701_v48, 0.0  ;;  %v10831_v52 = vld [vmem:[#allocation30_spill] sm:$0xff]  ;;  %v10834_v38 = vld [vmem:[#allocation60_spill] sm:$0xff] }
 0x58d   :  { %v10057_v45 = vrot.slane %v9985_v39, %v10830_v40  ;;  %v4623_v59 = vmul.f32 %v9997_v6, %v10831_v52 }
 0x58e   :  { %5742 = vmatpush1.bf16.msra.mxu0 %v7392_v12  ;;  %5968 = vmatpush1.bf16.msra.mxu1 %v7395_v9  ;;  %v4769_v12 = vmax.f32 %v4705_v47, 0.0  ;;  %v4624_v9 = vmul.f32 %v10001_v19, %v9803_v49  ;;  %v4812_v44 = vpack.c.bf16 %v4760_v50, %v4756_v16  ;;  %v4700_v7 = vadd.f32 %v9989_v25, %v4615_v57  ;;  %v7421_v49 = vld [vmem:[#allocation7 + $0x2ac] ss:$16 sps:$4 sm:$0xff]   ;;  %v10832_v47 = vld [vmem:[#allocation56_spill] sm:$0xff] }
 0x58f   :  { %5743 = vmatprep.subr.bf16.mxu0 %v7400_v26  ;;  %5969 = vmatprep.subr.bf16.mxu1 %v7403_v37  ;;  %v4628_v26 = vmul.f32 %v10001_v19, %v9806_v30  ;;  %v7410_v37 = vld [vmem:[#allocation7 + $0x280] ss:$16 sps:$4 sm:$0xff]   ;;  %v4704_v61 = vadd.f32 %v9989_v25, %v4619_v60  ;;  %v4636_v57 = vmul.f32 %v10001_v19, %v9812_v11  ;;  %v7433_v11 = vld [vmem:[#allocation7 + $0x2ec] ss:$16 sps:$4 sm:$0xff]  }
 0x590   :  { %v4817_v30 = vpack.c.bf16 %v4769_v12, %v4765_v15  ;;  %v4709_v58 = vadd.f32 %v9993_v20, %v4624_v9  ;;  %v4597_v60 = vmul.f32 %v10057_v45, %v10834_v38  ;;  %v7422_v15 = vld [vmem:[#allocation7 + $0x2c0] ss:$16 sps:$4 sm:$0xff]   ;;  %v7425_v12 = vld [vmem:[#allocation7 + $0x2c8] ss:$16 sps:$4 sm:$0xff]   ;;  %v4708_v9 = vadd.f32 %v9989_v25, %v4623_v59 }
 0x591   :  { %5669 = vmatmul.mubr.bf16.gmra.mrb[100].mxu0 %v4808_v29  ;;  %5895 = vmatmul.mubr.bf16.gmra.mrb[100].mxu1 %v4808_v29  ;;  %v4713_v56 = vadd.f32 %v9993_v20, %v4628_v26  ;;  %v7419_v29 = vld [vmem:[#allocation7 + $0x2a8] ss:$16 sps:$4 sm:$0xff]   ;;  %v4768_v48 = vmax.f32 %v4704_v61, 0.0 }
 0x592   :  { %5744 = vmatpush1.bf16.msra.mxu0 %v7398_v4  ;;  %5970 = vmatpush1.bf16.msra.mxu1 %v7401_v1  ;;  %v10063_v4 = vrot.slane %v9983_v8, %v10830_v40  ;;  %v7416_v1 = vld [vmem:[#allocation7 + $0x2a0] ss:$16 sps:$4 sm:$0xff]   ;;  %v4773_v16 = vmax.f32 %v4709_v58, 0.0  ;;  %v10839_v38 = vld [vmem:[#allocation27_spill] sm:$0xff] }
 0x593   :  { %5678 = vmatprep.mubr.bf16.mxu0 %v4813_v5  ;;  %5904 = vmatprep.mubr.bf16.mxu1 %v4813_v5  ;;  %v4764_v5 = vmax.f32 %v4700_v7, 0.0  ;;  %v4777_v50 = vmax.f32 %v4713_v56, 0.0 }
 0x594   :  { %5745 = vmatprep.subr.bf16.mxu0 %v7406_v51  ;;  %5971 = vmatprep.subr.bf16.mxu1 %v7409_v2  ;;  %v7424_v51 = vld [vmem:[#allocation7 + $0x2c4] ss:$16 sps:$4 sm:$0xff]   ;;  %v7427_v2 = vld [vmem:[#allocation7 + $0x2cc] ss:$16 sps:$4 sm:$0xff]  }
 0x595   :  { %v4821_v56 = vpack.c.bf16 %v4777_v50, %v4773_v16  ;;  %v4640_v50 = vmul.f32 %v10001_v19, %v9815_v17 }
 0x596   :  { %5746 = vmatpush1.bf16.msra.mxu0 %v7404_v42  ;;  %5972 = vmatpush1.bf16.msra.mxu1 %v7407_v53  ;;  %v4627_v42 = vmul.f32 %v9997_v6, %v10832_v47  ;;  %v4632_v53 = vmul.f32 %v10001_v19, %v9809_v24  ;;  %v4816_v24 = vpack.c.bf16 %v4768_v48, %v4764_v5  ;;  %v4772_v5 = vmax.f32 %v4708_v9, 0.0  ;;  %v10838_v48 = vld [vmem:[#allocation58_spill] sm:$0xff] }
 0x597   :  { %5747 = vmatprep.subr.bf16.mxu0 %v7412_v62  ;;  %5973 = vmatprep.subr.bf16.mxu1 %v7415_v13  ;;  %v10833_v62 = vld [vmem:[#allocation22_spill] sm:$0xff]  ;;  %v4635_v47 = vmul.f32 %v9997_v6, %v10838_v48  ;;  %v10843_v48 = vld [vmem:[#allocation20_spill] sm:$0xff] }
 0x598   :  { %v4593_v13 = vmul.f32 %v10057_v45, %v10833_v62  ;;  %v4717_v7 = vadd.f32 %v9993_v20, %v4632_v53  ;;  %v7436_v62 = vld [vmem:[#allocation7 + $0x304] ss:$16 sps:$4 sm:$0xff]  }
 0x599   :  { %5679 = vmatmul.mubr.bf16.gmra.mrb[104].mxu0 %v4812_v44  ;;  %5905 = vmatmul.mubr.bf16.gmra.mrb[104].mxu1 %v4812_v44  ;;  %v7430_v44 = vld [vmem:[#allocation7 + $0x2e4] ss:$16 sps:$4 sm:$0xff]  }
 0x59a   :  { %5748 = vmatpush1.bf16.msra.mxu0 %v7410_v37  ;;  %5974 = vmatpush1.bf16.msra.mxu1 %v7413_v28  ;;  %v4678_v26 = vadd.f32 %v10063_v4, %v4593_v13  ;;  %v4712_v37 = vadd.f32 %v9989_v25, %v4627_v42  ;;  %v4682_v28 = vadd.f32 %v10063_v4, %v4597_v60  ;;  %v7439_v13 = vld [vmem:[#allocation7 + $0x30c] ss:$16 sps:$4 sm:$0xff]  }
 0x59b   :  { %5688 = vmatprep.mubr.bf16.mxu0 %v4817_v30  ;;  %5914 = vmatprep.mubr.bf16.mxu1 %v4817_v30  ;;  %v10836_v30 = vld [vmem:[#allocation23_spill] sm:$0xff]  ;;  %v4609_v60 = vmul.f32 %v10057_v45, %v10839_v38 }
 0x59c   :  { %5749 = vmatprep.subr.bf16.mxu0 %v7418_v27  ;;  %5975 = vmatprep.subr.bf16.mxu1 %v7421_v49  ;;  %v4742_v61 = vmax.f32 %v4678_v26, 0.0  ;;  %v10835_v27 = vld [vmem:[#allocation61_spill] sm:$0xff]  ;;  %v4605_v58 = vmul.f32 %v10057_v45, %v10836_v30  ;;  %v4746_v59 = vmax.f32 %v4682_v28, 0.0  ;;  %v4776_v16 = vmax.f32 %v4712_v37, 0.0  ;;  %v10840_v26 = vld [vmem:[#allocation31_spill] sm:$0xff] }
 0x59d   :  { %v4601_v49 = vmul.f32 %v10057_v45, %v10835_v27  ;;  %v4781_v28 = vmax.f32 %v4717_v7, 0.0  ;;  %v4694_v17 = vadd.f32 %v10063_v4, %v4609_v60 }
 0x59e   :  { %5750 = vmatpush1.bf16.msra.mxu0 %v7416_v1  ;;  %5976 = vmatpush1.bf16.msra.mxu1 %v7419_v29  ;;  %v4721_v1 = vadd.f32 %v9993_v20, %v4636_v57  ;;  %v10837_v29 = vld [vmem:[#allocation57_spill] sm:$0xff]  ;;  %v4690_v53 = vadd.f32 %v10063_v4, %v4605_v58  ;;  %v10095_v57 = vpack.c.bf16 %v4746_v59, %v4742_v61  ;;  %v7434_v61 = vld [vmem:[#allocation7 + $0x300] ss:$16 sps:$4 sm:$0xff]   ;;  %v10841_v58 = vld [vmem:[#allocation35_spill] sm:$0xff] }
 0x59f   :  { %5751 = vmatprep.subr.bf16.mxu0 %v7424_v51  ;;  %5977 = vmatprep.subr.bf16.mxu1 %v7427_v2  ;;  %v4631_v52 = vmul.f32 %v9997_v6, %v10837_v29  ;;  %v7428_v51 = vld [vmem:[#allocation7 + $0x2e0] ss:$16 sps:$4 sm:$0xff]   ;;  %v7431_v2 = vld [vmem:[#allocation7 + $0x2e8] ss:$16 sps:$4 sm:$0xff]   ;;  %v4686_v42 = vadd.f32 %v10063_v4, %v4601_v49  ;;  %v4820_v30 = vpack.c.bf16 %v4776_v16, %v4772_v5  ;;  %v4758_v7 = vmax.f32 %v4694_v17, 0.0 }
 0x5a0   :  { %v4754_v9 = vmax.f32 %v4690_v53, 0.0  ;;  %v4785_v37 = vmax.f32 %v4721_v1, 0.0  ;;  %v10842_v1 = vld [vmem:[#allocation38_spill] sm:$0xff]  ;;  %v7445_v59 = vld [vmem:[#allocation7 + $0x32c] ss:$16 sps:$4 sm:$0xff]  }
 0x5a1   :  { %5689 = vmatmul.mubr.bf16.gmra.mrb[108].mxu0 %v4816_v24  ;;  %5915 = vmatmul.mubr.bf16.gmra.mrb[108].mxu1 %v4816_v24  ;;  %v4613_v24 = vmul.f32 %v10057_v45, %v10840_v26  ;;  %v10104_v27 = vadd.f32 %v9989_v25, %v4631_v52  ;;  %v4621_v29 = vmul.f32 %v10057_v45, %v10842_v1  ;;  %v7442_v52 = vld [vmem:[#allocation7 + $0x324] ss:$16 sps:$4 sm:$0xff]   ;;  %v7443_v16 = vld [vmem:[#allocation7 + $0x328] ss:$16 sps:$4 sm:$0xff]   ;;  %v7451_v26 = vld [vmem:[#allocation7 + $0x34c] ss:$16 sps:$4 sm:$0xff]  }
 0x5a2   :  { %5752 = vmatpush1.bf16.msra.mxu0 %v7422_v15  ;;  %5978 = vmatpush1.bf16.msra.mxu1 %v7425_v12  ;;  %v4644_v15 = vmul.f32 %v10001_v19, %v9818_v35  ;;  %v4750_v12 = vmax.f32 %v4686_v42, 0.0  ;;  %v4825_v5 = vpack.c.bf16 %v4785_v37, %v4781_v28 }
 0x5a3   :  { %5698 = vmatprep.mubr.bf16.mxu0 %v4821_v56  ;;  %5924 = vmatprep.mubr.bf16.mxu1 %v4821_v56  ;;  %v4698_v35 = vadd.f32 %v10063_v4, %v4613_v24  ;;  %v4617_v56 = vmul.f32 %v10057_v45, %v10841_v58  ;;  %v4780_v38 = vmax.f32 %v10104_v27, 0.0  ;;  %v10845_v24 = vld [vmem:[#allocation59_spill] sm:$0xff]  ;;  %v4652_v58 = vmul.f32 %v10001_v19, %v9826_v33 }
 0x5a4   :  { %5753 = vmatprep.subr.bf16.mxu0 %v7430_v44  ;;  %5979 = vmatprep.subr.bf16.mxu1 %v7433_v11  ;;  %v7437_v44 = vld [vmem:[#allocation7 + $0x308] ss:$16 sps:$4 sm:$0xff]   ;;  %v4720_v11 = vadd.f32 %v9989_v25, %v4635_v47  ;;  %v10108_v49 = vpack.c.bf16 %v4754_v9, %v4750_v12  ;;  %v4639_v47 = vmul.f32 %v9997_v6, %v10843_v48  ;;  %v7448_v9 = vld [vmem:[#allocation7 + $0x344] ss:$16 sps:$4 sm:$0xff]  }
 0x5a5   :  { %v4762_v42 = vmax.f32 %v4698_v35, 0.0  ;;  %v4702_v53 = vadd.f32 %v10063_v4, %v4617_v56  ;;  %v4643_v28 = vmul.f32 %v9997_v6, %v10845_v24  ;;  %v4648_v35 = vmul.f32 %v10001_v19, %v9823_v46  ;;  %v7449_v46 = vld [vmem:[#allocation7 + $0x348] ss:$16 sps:$4 sm:$0xff]  }
 0x5a6   :  { %5754 = vmatpush1.bf16.msra.mxu0 %v7428_v51  ;;  %5980 = vmatpush1.bf16.msra.mxu1 %v7431_v2  ;;  %v4725_v51 = vadd.f32 %v9993_v20, %v4640_v50  ;;  %v4729_v2 = vadd.f32 %v9993_v20, %v4644_v15  ;;  %v4784_v50 = vmax.f32 %v4720_v11, 0.0  ;;  %v10844_v15 = vld [vmem:[#allocation40_spill] sm:$0xff] }
 0x5a7   :  { %5755 = vmatprep.subr.bf16.mxu0 %v7436_v62  ;;  %5981 = vmatprep.subr.bf16.mxu1 %v7439_v13  ;;  %v4706_v62 = vadd.f32 %v10063_v4, %v4621_v29  ;;  %v7440_v13 = vld [vmem:[#allocation7 + $0x320] ss:$16 sps:$4 sm:$0xff]   ;;  %v10122_v60 = vpack.c.bf16 %v4762_v42, %v4758_v7  ;;  %v4625_v12 = vmul.f32 %v10057_v45, %v10844_v15  ;;  %v4766_v37 = vmax.f32 %v4702_v53, 0.0  ;;  %v7454_v53 = vld [vmem:[#allocation7 + $0x364] ss:$16 sps:$4 sm:$0xff]  }
 0x5a8   :  { %v4789_v27 = vmax.f32 %v4725_v51, 0.0  ;;  %v4793_v11 = vmax.f32 %v4729_v2, 0.0  ;;  %v10134_v7 = vadd.f32 %v9989_v25, %v4639_v47  ;;  %v10847_v29 = vld [vmem:[#allocation14_spill] sm:$0xff]  ;;  %v4637_v47 = vmul.f32 %v10057_v45, %v9743_v41 }
 0x5a9   :  { %5699 = vmatmul.mubr.bf16.gmra.mrb[112].mxu0 %v4820_v30  ;;  %5925 = vmatmul.mubr.bf16.gmra.mrb[112].mxu1 %v4820_v30  ;;  %v4770_v17 = vmax.f32 %v4706_v62, 0.0  ;;  %v4710_v30 = vadd.f32 %v10063_v4, %v4625_v12  ;;  %v10848_v2 = vld [vmem:[#allocation46_spill] sm:$0xff]  ;;  %v10151_v33 = vrot.slane %v9985_v39, %v10847_v29  ;;  %v4824_v19 = vpack.c.bf16 %v4784_v50, %v4780_v38  ;;  %v7457_v62 = vld [vmem:[#allocation7 + $0x36c] ss:$16 sps:$4 sm:$0xff]  }
 0x5aa   :  { %5756 = vmatpush1.bf16.msra.mxu0 %v7434_v61  ;;  %5982 = vmatpush1.bf16.msra.mxu1 %v7437_v44  ;;  %v10846_v61 = vld [vmem:[#allocation48_spill] sm:$0xff]  ;;  %v4633_v48 = vmul.f32 %v10057_v45, %v10848_v2  ;;  %v4722_v15 = vadd.f32 %v10063_v4, %v4637_v47  ;;  %v4788_v41 = vmax.f32 %v10134_v7, 0.0  ;;  %v4737_v39 = vadd.f32 %v9993_v20, %v4652_v58  ;;  %v10849_v7 = vld [vmem:[#allocation17_spill] sm:$0xff] }
 0x5ab   :  { %5708 = vmatprep.mubr.bf16.mxu0 %v4825_v5  ;;  %5934 = vmatprep.mubr.bf16.mxu1 %v4825_v5  ;;  %v4629_v44 = vmul.f32 %v10057_v45, %v10846_v61  ;;  %v10138_v56 = vpack.c.bf16 %v4770_v17, %v4766_v37  ;;  %v4774_v51 = vmax.f32 %v4710_v30, 0.0  ;;  %v4829_v5 = vpack.c.bf16 %v4793_v11, %v4789_v27  ;;  %v7452_v50 = vld [vmem:[#allocation7 + $0x360] ss:$16 sps:$4 sm:$0xff]   ;;  %v7463_v17 = vld [vmem:[#allocation7 + $0x38c] ss:$16 sps:$4 sm:$0xff]  }
 0x5ac   :  { %5757 = vmatprep.subr.bf16.mxu0 %v7442_v52  ;;  %5983 = vmatprep.subr.bf16.mxu1 %v7445_v59  ;;  %v10143_v52 = vrot.slane %v9983_v8, %v10847_v29  ;;  %v7446_v59 = vld [vmem:[#allocation7 + $0x340] ss:$16 sps:$4 sm:$0xff]   ;;  %v4728_v8 = vadd.f32 %v9989_v25, %v4643_v28  ;;  %v4641_v38 = vmul.f32 %v10057_v45, %v9746_v21  ;;  %v4786_v28 = vmax.f32 %v4722_v15, 0.0  ;;  %v7466_v47 = vld [vmem:[#allocation7 + $0x3a4] ss:$16 sps:$4 sm:$0xff]  }
 0x5ad   :  { %v4714_v1 = vadd.f32 %v10063_v4, %v4629_v44  ;;  %v4645_v37 = vmul.f32 %v10057_v45, %v9749_v23  ;;  %v4651_v21 = vmul.f32 %v9997_v6, %v9698_v3  ;;  %v4594_v44 = vmul.f32 %v10151_v33, %v9855_v31 }
 0x5ae   :  { %5758 = vmatpush1.bf16.msra.mxu0 %v7440_v13  ;;  %5984 = vmatpush1.bf16.msra.mxu1 %v7443_v16  ;;  %v4733_v13 = vadd.f32 %v9993_v20, %v4648_v35  ;;  %v4718_v16 = vadd.f32 %v10063_v4, %v4633_v48  ;;  %v7460_v20 = vld [vmem:[#allocation7 + $0x384] ss:$16 sps:$4 sm:$0xff]   ;;  %v4792_v61 = vmax.f32 %v4728_v8, 0.0  ;;  %v4726_v27 = vadd.f32 %v10063_v4, %v4641_v38 }
 0x5af   :  { %5759 = vmatprep.subr.bf16.mxu0 %v7448_v9  ;;  %5985 = vmatprep.subr.bf16.mxu1 %v7451_v26  ;;  %v4778_v42 = vmax.f32 %v4714_v1, 0.0  ;;  %v7455_v9 = vld [vmem:[#allocation7 + $0x368] ss:$16 sps:$4 sm:$0xff]   ;;  %v4647_v26 = vmul.f32 %v9997_v6, %v9695_v63  ;;  %v4730_v23 = vadd.f32 %v10063_v4, %v4645_v37  ;;  %v4649_v35 = vmul.f32 %v10057_v45, %v9754_v55  ;;  %v7458_v6 = vld [vmem:[#allocation7 + $0x380] ss:$16 sps:$4 sm:$0xff]  }
 0x5b0   :  { %v4782_v24 = vmax.f32 %v4718_v16, 0.0  ;;  %v4797_v63 = vmax.f32 %v4733_v13, 0.0  ;;  %v4801_v30 = vmax.f32 %v4737_v39, 0.0  ;;  %v4598_v58 = vmul.f32 %v10151_v33, %v10849_v7  ;;  %v7461_v1 = vld [vmem:[#allocation7 + $0x388] ss:$16 sps:$4 sm:$0xff]  }
 0x5b1   :  { %5709 = vmatmul.mubr.bf16.gmra.mrb[116].mxu0 %v4824_v19  ;;  %5935 = vmatmul.mubr.bf16.gmra.mrb[116].mxu1 %v4824_v19  ;;  %v10159_v12 = vpack.c.bf16 %v4778_v42, %v4774_v51  ;;  %v4790_v3 = vmax.f32 %v4726_v27, 0.0  ;;  %v4653_v31 = vmul.f32 %v10057_v45, %v9757_v22  ;;  %v4734_v51 = vadd.f32 %v10063_v4, %v4649_v35  ;;  %v7469_v19 = vld [vmem:[#allocation7 + $0x3ac] ss:$16 sps:$4 sm:$0xff]   ;;  %v7467_v13 = vld [vmem:[#allocation7 + $0x3a8] ss:$16 sps:$4 sm:$0xff]  }
 0x5b2   :  { %5760 = vmatpush1.bf16.msra.mxu0 %v7446_v59  ;;  %5986 = vmatpush1.bf16.msra.mxu1 %v7449_v46  ;;  %v10172_v11 = vpack.c.bf16 %v4786_v28, %v4782_v24  ;;  %v4732_v59 = vadd.f32 %v9989_v25, %v4647_v26  ;;  %v4794_v46 = vmax.f32 %v4730_v23, 0.0  ;;  %v4828_v55 = vpack.c.bf16 %v4792_v61, %v4788_v41  ;;  %v7470_v26 = vld [vmem:[#allocation7 + $0x3c0] ss:$16 sps:$4 sm:$0xff]   ;;  %v7473_v24 = vld [vmem:[#allocation7 + $0x3c8] ss:$16 sps:$4 sm:$0xff]  }
 0x5b3   :  { %5718 = vmatprep.mubr.bf16.mxu0 %v4829_v5  ;;  %5944 = vmatprep.mubr.bf16.mxu1 %v4829_v5  ;;  %v4736_v2 = vadd.f32 %v9989_v25, %v4651_v21  ;;  %v4738_v48 = vadd.f32 %v10063_v4, %v4653_v31  ;;  %v4798_v22 = vmax.f32 %v4734_v51, 0.0  ;;  %v4833_v45 = vpack.c.bf16 %v4801_v30, %v4797_v63  ;;  %v7472_v25 = vld [vmem:[#allocation7 + $0x3c4] ss:$16 sps:$4 sm:$0xff]   ;;  %v7475_v4 = vld [vmem:[#allocation7 + $0x3cc] ss:$16 sps:$4 sm:$0xff]  }
 0x5b4   :  { %5761 = vmatprep.subr.bf16.mxu0 %v7454_v53  ;;  %5987 = vmatprep.subr.bf16.mxu1 %v7457_v62  ;;  %v10185_v8 = vpack.c.bf16 %v4794_v46, %v4790_v3  ;;  %v4679_v42 = vadd.f32 %v10143_v52, %v4594_v44  ;;  %v4683_v5 = vadd.f32 %v10143_v52, %v4598_v58  ;;  %v7464_v62 = vld [vmem:[#allocation7 + $0x3a0] ss:$16 sps:$4 sm:$0xff]   ;;  %v4796_v16 = vmax.f32 %v4732_v59, 0.0  ;;  %v7478_v37 = vld [vmem:[#allocation7 + $0x3e4] ss:$16 sps:$4 sm:$0xff]   ;;  %v10850_v63 = vld [vmem:[#allocation21_spill] sm:$0xff] }
 0x5b5   :  { %v4802_v53 = vmax.f32 %v4738_v48, 0.0  ;;  %v4800_v15 = vmax.f32 %v4736_v2, 0.0  ;;  %v4602_v39 = vmul.f32 %v10151_v33, %v9861_v32  ;;  %v4606_v38 = vmul.f32 %v10151_v33, %v9864_v0  ;;  %v7476_v0 = vld [vmem:[#allocation7 + $0x3e0] ss:$16 sps:$4 sm:$0xff]   ;;  %v7479_v21 = vld [vmem:[#allocation7 + $0x3e8] ss:$16 sps:$4 sm:$0xff]  }
 0x5b6   :  { %5762 = vmatpush1.bf16.msra.mxu0 %v7452_v50  ;;  %5988 = vmatpush1.bf16.msra.mxu1 %v7455_v9  ;;  %v4743_v50 = vmax.f32 %v4679_v42, 0.0  ;;  %v4747_v9 = vmax.f32 %v4683_v5, 0.0  ;;  %v4610_v23 = vmul.f32 %v10151_v33, %v10850_v63  ;;  %v10851_v35 = vld [vmem:[#allocation29_spill] sm:$0xff]  ;;  %v4622_v59 = vmul.f32 %v10151_v33, %v9878_v18 }
 0x5b7   :  { %5763 = vmatprep.subr.bf16.mxu0 %v7460_v20  ;;  %5989 = vmatprep.subr.bf16.mxu1 %v7463_v17  ;;  %v10189_v41 = vpack.c.bf16 %v4802_v53, %v4798_v22  ;;  %v4832_v28 = vpack.c.bf16 %v4800_v15, %v4796_v16  ;;  %v7481_v20 = vld [vmem:[#allocation7 + $0x3ec] ss:$16 sps:$4 sm:$0xff]   ;;  %v4687_v17 = vadd.f32 %v10143_v52, %v4602_v39 }
 0x5b8   :  { %v4691_v61 = vadd.f32 %v10143_v52, %v4606_v38  ;;  %v4807_v32 = vpack.c.bf16 %v4747_v9, %v4743_v50  ;;  %v4614_v30 = vmul.f32 %v10151_v33, %v10851_v35  ;;  %v4695_v58 = vadd.f32 %v10143_v52, %v4610_v23  ;;  %v10852_v48 = vld [vmem:[#allocation37_spill] sm:$0xff] }
 0x5b9   :  { %5719 = vmatmul.mubr.bf16.gmra.mrb[120].mxu0 %v4828_v55  ;;  %5945 = vmatmul.mubr.bf16.gmra.mrb[120].mxu1 %v4828_v55  ;;  %v4751_v44 = vmax.f32 %v4687_v17, 0.0  ;;  %v4707_v55 = vadd.f32 %v10143_v52, %v4622_v59  ;;  %v4634_v42 = vmul.f32 %v10151_v33, %v9887_v54  ;;  %v4638_v5 = vmul.f32 %v10151_v33, %v9890_v10  ;;  %v10854_v54 = vld [vmem:[#allocation41_spill] sm:$0xff] }
 0x5ba   :  { %5764 = vmatpush1.bf16.msra.mxu0 %v7458_v6  ;;  %5990 = vmatpush1.bf16.msra.mxu1 %v7461_v1  ;;  %v4755_v27 = vmax.f32 %v4691_v61, 0.0  ;;  %v4699_v3 = vadd.f32 %v10143_v52, %v4614_v30  ;;  %v4759_v31 = vmax.f32 %v4695_v58, 0.0  ;;  %v4618_v1 = vmul.f32 %v10151_v33, %v9875_v43 }
 0x5bb   :  { %5728 = vmatprep.mubr.bf16.mxu0 %v4833_v45  ;;  %5954 = vmatprep.mubr.bf16.mxu1 %v4833_v45  ;;  %v4771_v2 = vmax.f32 %v4707_v55, 0.0  ;;  %v4630_v43 = vmul.f32 %v10151_v33, %v9884_v14  ;;  %v4719_v53 = vadd.f32 %v10143_v52, %v4634_v42  ;;  %v4646_v16 = vmul.f32 %v10151_v33, %v10854_v54 }
 0x5bc   :  { %5765 = vmatprep.subr.bf16.mxu0 %v7466_v47  ;;  %5991 = vmatprep.subr.bf16.mxu1 %v7469_v19  ;;  %v4811_v7 = vpack.c.bf16 %v4755_v27, %v4751_v44  ;;  %v4763_v6 = vmax.f32 %v4699_v3, 0.0  ;;  %v4703_v51 = vadd.f32 %v10143_v52, %v4618_v1  ;;  %v4626_v47 = vmul.f32 %v10151_v33, %v10852_v48 }
 0x5bd   :  { %v4715_v22 = vadd.f32 %v10143_v52, %v4630_v43  ;;  %v4731_v39 = vadd.f32 %v10143_v52, %v4646_v16 }
 0x5be   :  { %5766 = vmatpush1.bf16.msra.mxu0 %v7464_v62  ;;  %5992 = vmatpush1.bf16.msra.mxu1 %v7467_v13  ;;  %v4815_v46 = vpack.c.bf16 %v4763_v6, %v4759_v31  ;;  %v4711_v19 = vadd.f32 %v10143_v52, %v4626_v47  ;;  %v4723_v62 = vadd.f32 %v10143_v52, %v4638_v5 }
 0x5bf   :  { %5767 = vmatprep.subr.bf16.mxu0 %v7472_v25  ;;  %5993 = vmatprep.subr.bf16.mxu1 %v7475_v4  ;;  %v4779_v45 = vmax.f32 %v4715_v22, 0.0  ;;  %v10853_v25 = vld [vmem:[#allocation45_spill] sm:$0xff]  ;;  %v4795_v9 = vmax.f32 %v4731_v39, 0.0 }
 0x5c0   :  { %v4787_v13 = vmax.f32 %v4723_v62, 0.0  ;;  %v4642_v4 = vmul.f32 %v10151_v33, %v10853_v25 }
 0x5c1   :  { %5729 = vmatmul.mubr.bf16.gmra.mrb[124].mxu0 %v4832_v28  ;;  %5955 = vmatmul.mubr.bf16.gmra.mrb[124].mxu1 %v4832_v28 }
 0x5c2   :  { %5768 = vmatpush1.bf16.msra.mxu0 %v7470_v26  ;;  %5994 = vmatpush1.bf16.msra.mxu1 %v7473_v24  ;;  %v4727_v15 = vadd.f32 %v10143_v52, %v4642_v4  ;;  %v10856_v26 = vld [vmem:[#allocation51_spill] sm:$0xff] }
 0x5c3   :  { %5771 = vmatprep.mubr.bf16.mxu0 %v4807_v32  ;;  %5997 = vmatprep.mubr.bf16.mxu1 %v4807_v32  ;;  %v4650_v24 = vmul.f32 %v10151_v33, %v10856_v26 }
 0x5c4   :  { %5769 = vmatprep.subr.bf16.mxu0 %v7478_v37  ;;  %5995 = vmatprep.subr.bf16.mxu1 %v7481_v20  ;;  %v4791_v50 = vmax.f32 %v4727_v15, 0.0 }
 0x5c5   :  { %v4735_v20 = vadd.f32 %v10143_v52, %v4650_v24 }
 0x5c6   :  { %5770 = vmatpush1.bf16.msra.mxu0 %v7476_v0  ;;  %5996 = vmatpush1.bf16.msra.mxu1 %v7479_v21  ;;  %v4831_v37 = vpack.c.bf16 %v4795_v9, %v4791_v50 }
 0x5c9   :  { %5772 = vmatmul.mubr.bf16.vlgmr.msra.gmra.mrb[96].mxu0 %v10095_v57  ;;  %5998 = vmatmul.mubr.bf16.vlgmr.msra.gmra.mrb[96].mxu1 %v10095_v57  ;;  %v4767_v57 = vmax.f32 %v4703_v51, 0.0 }
 0x5ca   :  { %5781 = vmatprep.mubr.bf16.mxu0 %v4811_v7  ;;  %6007 = vmatprep.mubr.bf16.mxu1 %v4811_v7 }
 0x5cb   :  { %v4819_v18 = vpack.c.bf16 %v4771_v2, %v4767_v57 }
 0x5d1   :  { %5782 = vmatmul.mubr.bf16.gmra.mrb[100].mxu0 %v10108_v49  ;;  %6008 = vmatmul.mubr.bf16.gmra.mrb[100].mxu1 %v10108_v49  ;;  %v4775_v49 = vmax.f32 %v4711_v19, 0.0 }
 0x5d2   :  { %5791 = vmatprep.mubr.bf16.mxu0 %v4815_v46  ;;  %6017 = vmatprep.mubr.bf16.mxu1 %v4815_v46 }
 0x5d3   :  { %v4823_v14 = vpack.c.bf16 %v4779_v45, %v4775_v49 }
 0x5d9   :  { %5792 = vmatmul.mubr.bf16.gmra.mrb[104].mxu0 %v10122_v60  ;;  %6018 = vmatmul.mubr.bf16.gmra.mrb[104].mxu1 %v10122_v60  ;;  %v4783_v60 = vmax.f32 %v4719_v53, 0.0 }
 0x5da   :  { %5801 = vmatprep.mubr.bf16.mxu0 %v4819_v18  ;;  %6027 = vmatprep.mubr.bf16.mxu1 %v4819_v18 }
 0x5db   :  { %v4827_v10 = vpack.c.bf16 %v4787_v13, %v4783_v60 }
 0x5e1   :  { %5802 = vmatmul.mubr.bf16.gmra.mrb[108].mxu0 %v10138_v56  ;;  %6028 = vmatmul.mubr.bf16.gmra.mrb[108].mxu1 %v10138_v56  ;;  %v10855_v56 = vld [vmem:[#allocation53_spill] sm:$0xff] }
 0x5e2   :  { %5811 = vmatprep.mubr.bf16.mxu0 %v4823_v14  ;;  %6037 = vmatprep.mubr.bf16.mxu1 %v4823_v14  ;;  %v4654_v38 = vmul.f32 %v10151_v33, %v10855_v56 }
 0x5e4   :  { %v4739_v28 = vadd.f32 %v10143_v52, %v4654_v38  ;;  %v4964_v52 = vld [vmem:[%s10351_s11] sm:$0xf]  ;;  %s7607_s11 = smov [#allocation8]  }
 0x5e5   :  { %v10253_v33 = vrot.slane %v4964_v52, %v10827_v36  ;;  %v10259_v32 = vrot.slane %v4964_v52, %v10828_v34  ;;  %s6147_s27 = sshll.u32 %s7607_s11, 4  ;;  %s6148_s27 = int_to_ptr.vmem [resolvable:$true] %s6147_s27 }
 0x5e6   :  { %v4803_v17 = vmax.f32 %v4739_v28, 0.0  ;;  %s7572_s28 = scalar_lea.vmem %s6148_s27, 8192  ;;  %p7577_p11 = scmp.lt.s32.totalorder %s6148_s27, %s6148_s27 }
 0x5e7   :  { %p7573_p10 = scmp.ne.s32.totalorder %s6148_s27, %s7572_s28  ;;  %p7578_p12 = scmp.lt.s32.totalorder %s7572_s28, %s7572_s28 }
 0x5e9   :  { %5812 = vmatmul.mubr.bf16.gmra.mrb[112].mxu0 %v10159_v12  ;;  %6038 = vmatmul.mubr.bf16.gmra.mrb[112].mxu1 %v10159_v12  ;;  %v4799_v12 = vmax.f32 %v4735_v20, 0.0  ;;  %p7579_p13 = por %p7578_p12, %p7577_p11 }
 0x5ea   :  { %5821 = vmatprep.mubr.bf16.mxu0 %v4827_v10  ;;  %6047 = vmatprep.mubr.bf16.mxu1 %v4827_v10 }
 0x5eb   :  { %v4835_v61 = vpack.c.bf16 %v4803_v17, %v4799_v12  ;;  %p7580_p0 = pnand %p7579_p13, %p7573_p10 }
 0x5f1   :  { %5822 = vmatmul.mubr.bf16.gmra.mrb[116].mxu0 %v10172_v11  ;;  %6048 = vmatmul.mubr.bf16.gmra.mrb[116].mxu1 %v10172_v11  ;;  %v10256_v11 = vrot.slane %v4964_v52, %v10830_v40 }
 0x5f2   :  { %5831 = vmatprep.mubr.bf16.mxu0 %v4831_v37  ;;  %6057 = vmatprep.mubr.bf16.mxu1 %v4831_v37 }
 0x5f9   :  { %5832 = vmatmul.mubr.bf16.gmra.mrb[120].mxu0 %v10185_v8  ;;  %6058 = vmatmul.mubr.bf16.gmra.mrb[120].mxu1 %v10185_v8  ;;  %v10262_v8 = vrot.slane %v4964_v52, %v10847_v29 }
 0x5fa   :  { %5841 = vmatprep.mubr.bf16.mxu0 %v4835_v61  ;;  %6067 = vmatprep.mubr.bf16.mxu1 %v4835_v61 }
 0x601   :  { %5842 = vmatmul.mubr.bf16.gmra.mrb[124].mxu0 %v10189_v41  ;;  %6068 = vmatmul.mubr.bf16.gmra.mrb[124].mxu1 %v10189_v41 }
 0x69c   :  { %v5773_v0 = vpop.f32.mrb[96].mxu0  ;;  %v5999_v21 = vpop.f32.mrb[96].mxu1 }
 0x69d   :  { %v6584_v41 = vadd.f32 %v5773_v0, %v10253_v33  ;;  %v6616_v44 = vadd.f32 %v5999_v21, %v10256_v11  ;;  %v5775_v27 = vpop.f32.mrb[97].mxu0  ;;  %v6001_v63 = vpop.f32.mrb[97].mxu1 }
 0x69e   :  { %v6585_v36 = vadd.f32 %v5775_v27, %v10259_v32  ;;  %v6617_v23 = vadd.f32 %v6001_v63, %v10262_v8  ;;  %v5777_v40 = vpop.f32.mrb[98].mxu0  ;;  %v6003_v35 = vpop.f32.mrb[98].mxu1 }
 0x69f   :  { %6078 = vst [vmem:[#allocation8] sm:$0xff] %v6584_v41  ;;  %6080 = vst [vmem:[#allocation8 + $0x10] sm:$0xff] %v6616_v44  ;;  %v6586_v34 = vadd.f32 %v5777_v40, %v10253_v33  ;;  %v6618_v29 = vadd.f32 %v6003_v35, %v10256_v11  ;;  %v5779_v30 = vpop.f32.mrb[99].mxu0  ;;  %v6005_v7 = vpop.f32.mrb[99].mxu1 }
 0x6a0   :  { %6079 = vst [vmem:[#allocation8 + $0x8] sm:$0xff] %v6585_v36  ;;  %6081 = vst [vmem:[#allocation8 + $0x18] sm:$0xff] %v6617_v23  ;;  %v6587_v58 = vadd.f32 %v5779_v30, %v10259_v32  ;;  %v6619_v3 = vadd.f32 %v6005_v7, %v10262_v8 }
 0x6a1   :  { %6082 = vst [vmem:[#allocation8 + $0x20] sm:$0xff] %v6586_v34  ;;  %6084 = vst [vmem:[#allocation8 + $0x30] sm:$0xff] %v6618_v29 }
 0x6a2   :  { %6083 = vst [vmem:[#allocation8 + $0x28] sm:$0xff] %v6587_v58  ;;  %6085 = vst [vmem:[#allocation8 + $0x38] sm:$0xff] %v6619_v3 }
 0x6a4   :  { %v5783_v31 = vpop.f32.mrb[100].mxu0  ;;  %v6009_v6 = vpop.f32.mrb[100].mxu1 }
 0x6a5   :  { %v6588_v1 = vadd.f32 %v5783_v31, %v10253_v33  ;;  %v6620_v59 = vadd.f32 %v6009_v6, %v10256_v11  ;;  %v5785_v46 = vpop.f32.mrb[101].mxu0  ;;  %v6011_v51 = vpop.f32.mrb[101].mxu1 }
 0x6a6   :  { %v6589_v55 = vadd.f32 %v5785_v46, %v10259_v32  ;;  %v6621_v57 = vadd.f32 %v6011_v51, %v10262_v8  ;;  %v5787_v2 = vpop.f32.mrb[102].mxu0  ;;  %v6013_v48 = vpop.f32.mrb[102].mxu1 }
 0x6a7   :  { %6086 = vst [vmem:[#allocation8 + $0x40] sm:$0xff] %v6588_v1  ;;  %6088 = vst [vmem:[#allocation8 + $0x50] sm:$0xff] %v6620_v59  ;;  %v6590_v47 = vadd.f32 %v5787_v2, %v10253_v33  ;;  %v6622_v43 = vadd.f32 %v6013_v48, %v10256_v11  ;;  %v5789_v18 = vpop.f32.mrb[103].mxu0  ;;  %v6015_v19 = vpop.f32.mrb[103].mxu1 }
 0x6a8   :  { %6087 = vst [vmem:[#allocation8 + $0x48] sm:$0xff] %v6589_v55  ;;  %6089 = vst [vmem:[#allocation8 + $0x58] sm:$0xff] %v6621_v57  ;;  %v6591_v22 = vadd.f32 %v5789_v18, %v10259_v32  ;;  %v6623_v49 = vadd.f32 %v6015_v19, %v10262_v8 }
 0x6a9   :  { %6090 = vst [vmem:[#allocation8 + $0x60] sm:$0xff] %v6590_v47  ;;  %6092 = vst [vmem:[#allocation8 + $0x70] sm:$0xff] %v6622_v43 }
 0x6aa   :  { %6091 = vst [vmem:[#allocation8 + $0x68] sm:$0xff] %v6591_v22  ;;  %6093 = vst [vmem:[#allocation8 + $0x78] sm:$0xff] %v6623_v49 }
 0x6ac   :  { %v5793_v45 = vpop.f32.mrb[104].mxu0  ;;  %v6019_v42 = vpop.f32.mrb[104].mxu1 }
 0x6ad   :  { %v6592_v5 = vadd.f32 %v5793_v45, %v10253_v33  ;;  %v6624_v14 = vadd.f32 %v6019_v42, %v10256_v11  ;;  %v5795_v53 = vpop.f32.mrb[105].mxu0  ;;  %v6021_v62 = vpop.f32.mrb[105].mxu1 }
 0x6ae   :  { %v6593_v60 = vadd.f32 %v5795_v53, %v10259_v32  ;;  %v6625_v13 = vadd.f32 %v6021_v62, %v10262_v8  ;;  %v5797_v25 = vpop.f32.mrb[106].mxu0  ;;  %v6023_v4 = vpop.f32.mrb[106].mxu1 }
 0x6af   :  { %6094 = vst [vmem:[#allocation8 + $0x80] sm:$0xff] %v6592_v5  ;;  %6096 = vst [vmem:[#allocation8 + $0x90] sm:$0xff] %v6624_v14  ;;  %v6594_v54 = vadd.f32 %v5797_v25, %v10253_v33  ;;  %v6626_v16 = vadd.f32 %v6023_v4, %v10256_v11  ;;  %v5799_v10 = vpop.f32.mrb[107].mxu0  ;;  %v6025_v15 = vpop.f32.mrb[107].mxu1 }
 0x6b0   :  { %6095 = vst [vmem:[#allocation8 + $0x88] sm:$0xff] %v6593_v60  ;;  %6097 = vst [vmem:[#allocation8 + $0x98] sm:$0xff] %v6625_v13  ;;  %v6595_v39 = vadd.f32 %v5799_v10, %v10259_v32  ;;  %v6627_v56 = vadd.f32 %v6025_v15, %v10262_v8 }
 0x6b1   :  { %6098 = vst [vmem:[#allocation8 + $0xa0] sm:$0xff] %v6594_v54  ;;  %6100 = vst [vmem:[#allocation8 + $0xb0] sm:$0xff] %v6626_v16 }
 0x6b2   :  { %6099 = vst [vmem:[#allocation8 + $0xa8] sm:$0xff] %v6595_v39  ;;  %6101 = vst [vmem:[#allocation8 + $0xb8] sm:$0xff] %v6627_v56 }
 0x6b4   :  { %v5803_v38 = vpop.f32.mrb[108].mxu0  ;;  %v6029_v50 = vpop.f32.mrb[108].mxu1 }
 0x6b5   :  { %v6596_v9 = vadd.f32 %v5803_v38, %v10253_v33  ;;  %v6628_v26 = vadd.f32 %v6029_v50, %v10256_v11  ;;  %v5805_v24 = vpop.f32.mrb[109].mxu0  ;;  %v6031_v28 = vpop.f32.mrb[109].mxu1 }
 0x6b6   :  { %v6597_v37 = vadd.f32 %v5805_v24, %v10259_v32  ;;  %v6629_v20 = vadd.f32 %v6031_v28, %v10262_v8  ;;  %v5807_v12 = vpop.f32.mrb[110].mxu0  ;;  %v6033_v17 = vpop.f32.mrb[110].mxu1 }
 0x6b7   :  { %6102 = vst [vmem:[#allocation8 + $0xc0] sm:$0xff] %v6596_v9  ;;  %6104 = vst [vmem:[#allocation8 + $0xd0] sm:$0xff] %v6628_v26  ;;  %v6598_v61 = vadd.f32 %v5807_v12, %v10253_v33  ;;  %v6630_v52 = vadd.f32 %v6033_v17, %v10256_v11  ;;  %v5809_v0 = vpop.f32.mrb[111].mxu0  ;;  %v6035_v21 = vpop.f32.mrb[111].mxu1 }
 0x6b8   :  { %6103 = vst [vmem:[#allocation8 + $0xc8] sm:$0xff] %v6597_v37  ;;  %6105 = vst [vmem:[#allocation8 + $0xd8] sm:$0xff] %v6629_v20  ;;  %v6599_v41 = vadd.f32 %v5809_v0, %v10259_v32  ;;  %v6631_v44 = vadd.f32 %v6035_v21, %v10262_v8 }
 0x6b9   :  { %6106 = vst [vmem:[#allocation8 + $0xe0] sm:$0xff] %v6598_v61  ;;  %6108 = vst [vmem:[#allocation8 + $0xf0] sm:$0xff] %v6630_v52 }
 0x6ba   :  { %6107 = vst [vmem:[#allocation8 + $0xe8] sm:$0xff] %v6599_v41  ;;  %6109 = vst [vmem:[#allocation8 + $0xf8] sm:$0xff] %v6631_v44 }
 0x6bc   :  { %v5813_v27 = vpop.f32.mrb[112].mxu0  ;;  %v6039_v63 = vpop.f32.mrb[112].mxu1 }
 0x6bd   :  { %v6600_v36 = vadd.f32 %v5813_v27, %v10253_v33  ;;  %v6632_v23 = vadd.f32 %v6039_v63, %v10256_v11  ;;  %v5815_v40 = vpop.f32.mrb[113].mxu0  ;;  %v6041_v35 = vpop.f32.mrb[113].mxu1 }
 0x6be   :  { %v6601_v34 = vadd.f32 %v5815_v40, %v10259_v32  ;;  %v6633_v29 = vadd.f32 %v6041_v35, %v10262_v8  ;;  %v5817_v30 = vpop.f32.mrb[114].mxu0  ;;  %v6043_v7 = vpop.f32.mrb[114].mxu1 }
 0x6bf   :  { %6110 = vst [vmem:[#allocation8 + $0x100] sm:$0xff] %v6600_v36  ;;  %6112 = vst [vmem:[#allocation8 + $0x110] sm:$0xff] %v6632_v23  ;;  %v6602_v58 = vadd.f32 %v5817_v30, %v10253_v33  ;;  %v6634_v3 = vadd.f32 %v6043_v7, %v10256_v11  ;;  %v5819_v31 = vpop.f32.mrb[115].mxu0  ;;  %v6045_v6 = vpop.f32.mrb[115].mxu1 }
 0x6c0   :  { %6111 = vst [vmem:[#allocation8 + $0x108] sm:$0xff] %v6601_v34  ;;  %6113 = vst [vmem:[#allocation8 + $0x118] sm:$0xff] %v6633_v29  ;;  %v6603_v1 = vadd.f32 %v5819_v31, %v10259_v32  ;;  %v6635_v59 = vadd.f32 %v6045_v6, %v10262_v8 }
 0x6c1   :  { %6114 = vst [vmem:[#allocation8 + $0x120] sm:$0xff] %v6602_v58  ;;  %6116 = vst [vmem:[#allocation8 + $0x130] sm:$0xff] %v6634_v3 }
 0x6c2   :  { %6115 = vst [vmem:[#allocation8 + $0x128] sm:$0xff] %v6603_v1  ;;  %6117 = vst [vmem:[#allocation8 + $0x138] sm:$0xff] %v6635_v59 }
 0x6c4   :  { %v5823_v46 = vpop.f32.mrb[116].mxu0  ;;  %v6049_v51 = vpop.f32.mrb[116].mxu1 }
 0x6c5   :  { %v6604_v55 = vadd.f32 %v5823_v46, %v10253_v33  ;;  %v6636_v57 = vadd.f32 %v6049_v51, %v10256_v11  ;;  %v5825_v2 = vpop.f32.mrb[117].mxu0  ;;  %v6051_v48 = vpop.f32.mrb[117].mxu1 }
 0x6c6   :  { %v6605_v47 = vadd.f32 %v5825_v2, %v10259_v32  ;;  %v6637_v43 = vadd.f32 %v6051_v48, %v10262_v8  ;;  %v5827_v18 = vpop.f32.mrb[118].mxu0  ;;  %v6053_v19 = vpop.f32.mrb[118].mxu1 }
 0x6c7   :  { %6118 = vst [vmem:[#allocation8 + $0x140] sm:$0xff] %v6604_v55  ;;  %6120 = vst [vmem:[#allocation8 + $0x150] sm:$0xff] %v6636_v57  ;;  %v6606_v22 = vadd.f32 %v5827_v18, %v10253_v33  ;;  %v6638_v49 = vadd.f32 %v6053_v19, %v10256_v11  ;;  %v5829_v45 = vpop.f32.mrb[119].mxu0  ;;  %v6055_v42 = vpop.f32.mrb[119].mxu1 }
 0x6c8   :  { %6119 = vst [vmem:[#allocation8 + $0x148] sm:$0xff] %v6605_v47  ;;  %6121 = vst [vmem:[#allocation8 + $0x158] sm:$0xff] %v6637_v43  ;;  %v6607_v5 = vadd.f32 %v5829_v45, %v10259_v32  ;;  %v6639_v14 = vadd.f32 %v6055_v42, %v10262_v8 }
 0x6c9   :  { %6122 = vst [vmem:[#allocation8 + $0x160] sm:$0xff] %v6606_v22  ;;  %6124 = vst [vmem:[#allocation8 + $0x170] sm:$0xff] %v6638_v49 }
 0x6ca   :  { %6123 = vst [vmem:[#allocation8 + $0x168] sm:$0xff] %v6607_v5  ;;  %6125 = vst [vmem:[#allocation8 + $0x178] sm:$0xff] %v6639_v14 }
 0x6cc   :  { %v5833_v53 = vpop.f32.mrb[120].mxu0  ;;  %v6059_v62 = vpop.f32.mrb[120].mxu1 }
 0x6cd   :  { %v6608_v60 = vadd.f32 %v5833_v53, %v10253_v33  ;;  %v6640_v13 = vadd.f32 %v6059_v62, %v10256_v11  ;;  %v5835_v25 = vpop.f32.mrb[121].mxu0  ;;  %v6061_v4 = vpop.f32.mrb[121].mxu1 }
 0x6ce   :  { %v6609_v54 = vadd.f32 %v5835_v25, %v10259_v32  ;;  %v6641_v16 = vadd.f32 %v6061_v4, %v10262_v8  ;;  %v5837_v10 = vpop.f32.mrb[122].mxu0  ;;  %v6063_v15 = vpop.f32.mrb[122].mxu1 }
 0x6cf   :  { %6126 = vst [vmem:[#allocation8 + $0x180] sm:$0xff] %v6608_v60  ;;  %6128 = vst [vmem:[#allocation8 + $0x190] sm:$0xff] %v6640_v13  ;;  %v6610_v39 = vadd.f32 %v5837_v10, %v10253_v33  ;;  %v6642_v56 = vadd.f32 %v6063_v15, %v10256_v11  ;;  %v5839_v38 = vpop.f32.mrb[123].mxu0  ;;  %v6065_v50 = vpop.f32.mrb[123].mxu1 }
 0x6d0   :  { %6127 = vst [vmem:[#allocation8 + $0x188] sm:$0xff] %v6609_v54  ;;  %6129 = vst [vmem:[#allocation8 + $0x198] sm:$0xff] %v6641_v16  ;;  %v6611_v9 = vadd.f32 %v5839_v38, %v10259_v32  ;;  %v6643_v26 = vadd.f32 %v6065_v50, %v10262_v8 }
 0x6d1   :  { %6130 = vst [vmem:[#allocation8 + $0x1a0] sm:$0xff] %v6610_v39  ;;  %6132 = vst [vmem:[#allocation8 + $0x1b0] sm:$0xff] %v6642_v56 }
 0x6d2   :  { %6131 = vst [vmem:[#allocation8 + $0x1a8] sm:$0xff] %v6611_v9  ;;  %6133 = vst [vmem:[#allocation8 + $0x1b8] sm:$0xff] %v6643_v26 }
 0x6d4   :  { %v5843_v24 = vpop.f32.mrb[124].mxu0  ;;  %v6069_v28 = vpop.f32.mrb[124].mxu1 }
 0x6d5   :  { %v6612_v37 = vadd.f32 %v5843_v24, %v10253_v33  ;;  %v6644_v20 = vadd.f32 %v6069_v28, %v10256_v11  ;;  %v5845_v12 = vpop.f32.mrb[125].mxu0  ;;  %v6071_v17 = vpop.f32.mrb[125].mxu1 }
 0x6d6   :  { %v6613_v61 = vadd.f32 %v5845_v12, %v10259_v32  ;;  %v6645_v52 = vadd.f32 %v6071_v17, %v10262_v8  ;;  %v5847_v0 = vpop.f32.mrb[126].mxu0  ;;  %v6073_v21 = vpop.f32.mrb[126].mxu1 }
 0x6d7   :  { %6134 = vst [vmem:[#allocation8 + $0x1c0] sm:$0xff] %v6612_v37  ;;  %6136 = vst [vmem:[#allocation8 + $0x1d0] sm:$0xff] %v6644_v20  ;;  %v6614_v41 = vadd.f32 %v5847_v0, %v10253_v33  ;;  %v6646_v44 = vadd.f32 %v6073_v21, %v10256_v11  ;;  %v5849_v27 = vpop.f32.mrb[127].mxu0  ;;  %v6075_v63 = vpop.f32.mrb[127].mxu1 }
 0x6d8   :  { %6135 = vst [vmem:[#allocation8 + $0x1c8] sm:$0xff] %v6613_v61  ;;  %6137 = vst [vmem:[#allocation8 + $0x1d8] sm:$0xff] %v6645_v52  ;;  %v6615_v36 = vadd.f32 %v5849_v27, %v10259_v32  ;;  %v6647_v23 = vadd.f32 %v6075_v63, %v10262_v8 }
 0x6d9   :  { %6138 = vst [vmem:[#allocation8 + $0x1e0] sm:$0xff] %v6614_v41  ;;  %6140 = vst [vmem:[#allocation8 + $0x1f0] sm:$0xff] %v6646_v44 }
 0x6da   :  { %6139 = vst [vmem:[#allocation8 + $0x1e8] sm:$0xff] %v6615_v36  ;;  %6141 = vst [vmem:[#allocation8 + $0x1f8] sm:$0xff] %v6647_v23 }
 0x6db   :  { %7583 = shalt.err (!%p7580_p0)
}
 0x6dc   :  { %s7584_s4 = scalar_lea.hbm %s10352_s12, 8192 }
 0x6dd   :  { %p7585_p1 = scmp.ne.s32.totalorder %s10352_s12, %s7584_s4  ;;  %p7588_p2 = scmp.lt.u32.totalorder %s7584_s4, %s10352_s12 }
 0x6df   :  { %p7590_p3 = pnand %p7588_p2, %p7585_p1 }
 0x6e1   :  { %7593 = shalt.err (!%p7590_p3)
}
 0x6e2   :  { %s7608_s30 = smov 512   ;;  %s7609_s13 = smov 32  }
 0x6e3   :  { %6153 = dma.vmem_to_hbm [thread:$0]  %s6148_s27, 8192, %s10352_s12, [#allocation4], %s7608_s30, %s7608_s30, %s7609_s13  }
 0x6e4   :  { %7598 = dma.done.wait [#allocation4], 8192  }
 0x6e5   :  { %7599 = vsyncadd [#allocation4], 4294959104 }
 0x6e6   :  { %6157 = vsyncpa [#allocation3], 1 }
 0x6e7   :  { %6158 = vsyncpa [#allocation6], 1 }
 0x6e8   :  { %6159 = vsyncpa [#allocation4], 1 }

</bundles_post_ra>
